<compile_context>
chip_gen: v7x
topology: tpu7x:2x2x1
jax: 0.10.0
libtpu: 0.0.40
codegen_flags: <defaults>
</compile_context>

<pallas_src>
import functools

import jax
import jax.numpy as jnp
from jax.experimental import pallas as pl
from jax.experimental.pallas import tpu as pltpu


_TAPS_3x3 = tuple((oy, ox) for oy in (-1, 0, 1) for ox in (-1, 0, 1))
_TAPS_1x1 = ((0, 0),)


# ----------------------------------------------------------------------------
# In-kernel helpers (traced inline inside the fused kernel body)
# ----------------------------------------------------------------------------
def _shifted_tap(xf, oy, ox, ypos, xpos, h, w):
    """Shifted view of a flattened image in lane-dense (C, H*W) layout.

    tap[c, y*W + x] = x2d[c, y+oy, x+ox], zero outside the image ("same"
    zero padding).  Realised as a lane rotation (slice+concat) + iota mask.
    """
    hw = h * w
    s = (oy * w + ox) % hw
    if s == 0:
        shifted = xf
    else:
        shifted = jnp.concatenate([xf[:, s:], xf[:, :s]], axis=1)
    if oy == 0 and ox == 0:
        return shifted

    valid = None

    def _and(a, b):
        return b if a is None else jnp.logical_and(a, b)

    if oy > 0:
        valid = _and(valid, ypos < h - oy)
    elif oy < 0:
        valid = _and(valid, ypos >= -oy)
    if ox > 0:
        valid = _and(valid, xpos < w - ox)
    elif ox < 0:
        valid = _and(valid, xpos >= -ox)
    return jnp.where(valid, shifted, 0.0)


def _conv_layer(xf, w_ref, idx, cout, taps, relu, ypos, xpos, h, w):
    """'Same' conv as a single im2col matmul in (C, H*W) layout.

    xf: (Cin, H*W).  w_ref[idx, :cout, :k] holds the packed weights with
    k = len(taps)*Cin + 1; its last column is the bias, matched by a ones
    row appended to the im2col matrix.  Returns (cout, H*W).
    """
    hw = h * w
    cin = xf.shape[0]
    rows = [_shifted_tap(xf, oy, ox, ypos, xpos, h, w) for (oy, ox) in taps]
    rows.append(jnp.ones((1, hw), jnp.float32))
    patches = jnp.concatenate(rows, axis=0)          # (len(taps)*cin + 1, hw)
    k = len(taps) * cin + 1
    wmat = w_ref[idx][0:cout, 0:k]                   # (cout, k)
    out = jnp.dot(wmat, patches, preferred_element_type=jnp.float32)
    if relu:
        out = jnp.maximum(out, 0.0)
    return out


# ----------------------------------------------------------------------------
# Fused kernel: dAUTOMAP (2 domain transforms + 3 convs) + dual-encoder U-Net
# ----------------------------------------------------------------------------
def _fused_kernel(ks_ref, img_ref, dtk_ref, dtm_ref, dtb_ref, w_ref,
                  out_ref, pred_ref, *, h, w, ck, cr, cu):
    f32 = jnp.float32
    hw = h * w

    # flat-index -> (y, x) positions, used for the conv boundary masks
    pos = jax.lax.broadcasted_iota(jnp.int32, (1, hw), 1)
    if (w & (w - 1)) == 0:                           # power-of-two fast path
        xpos = jnp.bitwise_and(pos, w - 1)
        ypos = jnp.right_shift(pos, int(w).bit_length() - 1)
    else:
        xpos = pos % w
        ypos = pos // w

    # ---- model1: generalised domain-transform layers -----------------------
    # flatten(Wh[c] @ X[c] @ Ww[c]) == flatten(X[c]) @ K[c]  (K precomputed)
    def dt_layer(xc, layer, act):
        t = jnp.concatenate(
            [jnp.dot(xc[ci:ci + 1, :], dtk_ref[layer, ci],
                     preferred_element_type=f32) for ci in range(ck)],
            axis=0)                                  # (ck, hw)
        y = jnp.dot(dtm_ref[layer], t, preferred_element_type=f32)
        y = y + dtb_ref[layer]                       # (ck, hw) + (ck, 1)
        return jnp.tanh(y) if act else y

    xk = ks_ref[0]                                   # (ck, hw)
    xk = dt_layer(xk, 0, act=True)
    xk = dt_layer(xk, 1, act=False)

    # ---- model1: conv refinement block --------------------------------------
    r = _conv_layer(xk, w_ref, 0, cr, _TAPS_3x3, True, ypos, xpos, h, w)
    r = _conv_layer(r, w_ref, 1, cr, _TAPS_3x3, True, ypos, xpos, h, w)
    pred = _conv_layer(r, w_ref, 2, 1, _TAPS_1x1, False, ypos, xpos, h, w)
    pred_ref[0] = pred                               # (1, hw) lane-dense store

    # ---- model2: dual-encoder U-Net -----------------------------------------
    img = img_ref[0]                                 # (1, hw)
    e1 = _conv_layer(pred, w_ref, 3, cu, _TAPS_3x3, True, ypos, xpos, h, w)
    e2 = _conv_layer(img, w_ref, 4, cu, _TAPS_3x3, True, ypos, xpos, h, w)
    cat = jnp.concatenate([e1, e2], axis=0)          # (2*cu, hw)
    bn = _conv_layer(cat, w_ref, 5, cu, _TAPS_3x3, True, ypos, xpos, h, w)
    dc = _conv_layer(bn, w_ref, 6, cu, _TAPS_3x3, True, ypos, xpos, h, w)
    out = _conv_layer(dc, w_ref, 7, 1, _TAPS_1x1, False, ypos, xpos, h, w)
    out_ref[0] = out                                 # (1, hw) lane-dense store


# ----------------------------------------------------------------------------
# Wrapper-side parameter packing (plain XLA, one-time per call)
# ----------------------------------------------------------------------------
def _pack_conv(w, b, cout_max, kmax):
    """(kh, kw, cin, cout) HWIO weight + bias -> (cout_max, kmax) matrix whose
    columns are ordered (ky, kx, cin) with the bias in the last used column."""
    kh, kw, cin, cout = w.shape
    wm = jnp.transpose(w, (3, 0, 1, 2)).reshape(cout, kh * kw * cin)
    wm = jnp.concatenate([wm, b.reshape(cout, 1)], axis=1)
    return jnp.pad(wm, ((0, cout_max - cout), (0, kmax - wm.shape[1])))


def _dt_kron(wh, ww):
    """K[c] with flatten(Wh[c] @ X @ Ww[c]) = flatten(X) @ K[c] (row-major)."""
    ck, h, _ = wh.shape
    _, w, _ = ww.shape
    k = jnp.einsum('cap,cbq->cpbaq', wh, ww)         # [c, p1, p2, q1, q2]
    return k.reshape(ck, h * w, h * w)


def dautomap_dual_encoder_unet_forward(p, input_kspace, input_img):
    n, ck, h, w = input_kspace.shape
    hw = h * w
    cr = p["rw1"].shape[-1]
    cu = p["e1w"].shape[-1]

    dtk = jnp.stack([_dt_kron(p["wh1"], p["ww1"]),
                     _dt_kron(p["wh2"], p["ww2"])], axis=0)    # (2, ck, hw, hw)
    dtm = jnp.stack([p["m1"], p["m2"]], axis=0)                # (2, ck, ck)
    dtb = jnp.stack([p["b1"].reshape(ck, 1),
                     p["b2"].reshape(ck, 1)], axis=0)          # (2, ck, 1)

    convs = [("rw1", "rb1"), ("rw2", "rb2"), ("rw3", "rb3"),
             ("e1w", "e1b"), ("e2w", "e2b"), ("bw", "bb"),
             ("dw", "db"), ("ow", "ob")]
    cout_max = max(p[wn].shape[-1] for wn, _ in convs)
    kmax = max(p[wn].shape[0] * p[wn].shape[1] * p[wn].shape[2] + 1
               for wn, _ in convs)
    w_all = jnp.stack([_pack_conv(p[wn], p[bn], cout_max, kmax)
                       for wn, bn in convs], axis=0)           # (8, cout_max, kmax)

    ks_flat = input_kspace.reshape(n, ck, hw)
    img_flat = input_img.reshape(n, 1, hw)

    kernel = functools.partial(_fused_kernel, h=h, w=w, ck=ck, cr=cr, cu=cu)
    out_flat, pred_flat = pl.pallas_call(
        kernel,
        out_shape=(jax.ShapeDtypeStruct((n, 1, hw), jnp.float32),
                   jax.ShapeDtypeStruct((n, 1, hw), jnp.float32)),
        grid=(n,),
        in_specs=[
            pl.BlockSpec((1, ck, hw), lambda i: (i, 0, 0)),
            pl.BlockSpec((1, 1, hw), lambda i: (i, 0, 0)),
            pl.BlockSpec((2, ck, hw, hw), lambda i: (0, 0, 0, 0)),
            pl.BlockSpec((2, ck, ck), lambda i: (0, 0, 0)),
            pl.BlockSpec((2, ck, 1), lambda i: (0, 0, 0)),
            pl.BlockSpec((len(convs), cout_max, kmax), lambda i: (0, 0, 0)),
        ],
        out_specs=(pl.BlockSpec((1, 1, hw), lambda i: (i, 0, 0)),
                   pl.BlockSpec((1, 1, hw), lambda i: (i, 0, 0))),
        compiler_params=pltpu.CompilerParams(
            dimension_semantics=("parallel",)),
    )(ks_flat, img_flat, dtk, dtm, dtb, w_all)

    output = out_flat.reshape(n, 1, h, w)
    dautomap_pred = pred_flat.reshape(n, 1, h, w)
    return output, dautomap_pred


# ----------------------------------------------------------------------------
# Deterministic synthetic parameters (same structure/scales as before)
# ----------------------------------------------------------------------------
def init_params(key, h, w, ck=2, cr=8, cu=8):
    ks = jax.random.split(key, 24)

    def nrm(k, shape, scale=0.1):
        return (scale * jax.random.normal(k, shape)).astype(jnp.float32)

    return {
        "wh1": nrm(ks[0], (ck, h, h)), "ww1": nrm(ks[1], (ck, w, w)),
        "m1": nrm(ks[2], (ck, ck), 0.5), "b1": nrm(ks[3], (1, ck)),
        "wh2": nrm(ks[4], (ck, h, h)), "ww2": nrm(ks[5], (ck, w, w)),
        "m2": nrm(ks[6], (ck, ck), 0.5), "b2": nrm(ks[7], (1, ck)),
        "rw1": nrm(ks[8], (3, 3, ck, cr)), "rb1": nrm(ks[9], (1, cr)),
        "rw2": nrm(ks[10], (3, 3, cr, cr)), "rb2": nrm(ks[11], (1, cr)),
        "rw3": nrm(ks[12], (1, 1, cr, 1)), "rb3": nrm(ks[13], (1, 1)),
        "e1w": nrm(ks[14], (3, 3, 1, cu)), "e1b": nrm(ks[15], (1, cu)),
        "e2w": nrm(ks[16], (3, 3, 1, cu)), "e2b": nrm(ks[17], (1, cu)),
        "bw": nrm(ks[18], (3, 3, 2 * cu, cu)), "bb": nrm(ks[19], (1, cu)),
        "dw": nrm(ks[20], (3, 3, cu, cu)), "db": nrm(ks[21], (1, cu)),
        "ow": nrm(ks[22], (1, 1, cu, 1)), "ob": nrm(ks[23], (1, 1)),
    }


# ----------------------------------------------------------------------------
# Pure-JAX reference (for a loose numerical cross-check)
# ----------------------------------------------------------------------------
def _reference_forward(p, input_kspace, input_img):
    prec = jax.lax.Precision.HIGHEST

    def dt(x, wh, ww, m, b, act):
        t = jnp.einsum('cij,ncjk,ckl->ncil', wh, x, ww, precision=prec)
        y = jnp.einsum('oc,nchw->nohw', m, t, precision=prec)
        y = y + b.reshape(1, -1, 1, 1)
        return jnp.tanh(y) if act else y

    def conv(x, w, b, relu):
        kh, kw = w.shape[0], w.shape[1]
        ph, pw = kh // 2, kw // 2
        xp = jnp.pad(x, ((0, 0), (ph, ph), (pw, pw), (0, 0)))
        hh, ww_ = x.shape[1], x.shape[2]
        acc = jnp.zeros(x.shape[:3] + (w.shape[3],), jnp.float32)
        for dy in range(kh):
            for dx in range(kw):
                acc = acc + jnp.einsum('nhwc,co->nhwo',
                                       xp[:, dy:dy + hh, dx:dx + ww_, :],
                                       w[dy, dx], precision=prec)
        acc = acc + b.reshape(1, 1, 1, -1)
        return jnp.maximum(acc, 0.0) if relu else acc

    x = dt(input_kspace, p["wh1"], p["ww1"], p["m1"], p["b1"], True)
    x = dt(x, p["wh2"], p["ww2"], p["m2"], p["b2"], False)
    x = jnp.transpose(x, (0, 2, 3, 1))
    x = conv(x, p["rw1"], p["rb1"], True)
    x = conv(x, p["rw2"], p["rb2"], True)
    pred = conv(x, p["rw3"], p["rb3"], False)
    xi = jnp.transpose(input_img, (0, 2, 3, 1))
    e1 = conv(pred, p["e1w"], p["e1b"], True)
    e2 = conv(xi, p["e2w"], p["e2b"], True)
    cat = jnp.concatenate([e1, e2], axis=-1)
    bn = conv(cat, p["bw"], p["bb"], True)
    dc = conv(bn, p["dw"], p["db"], True)
    out = conv(dc, p["ow"], p["ob"], False)
    return (jnp.transpose(out, (0, 3, 1, 2)),
            jnp.transpose(pred, (0, 3, 1, 2)))


if __name__ == "__main__":
    N, H, W = 2, 16, 16
    key = jax.random.PRNGKey(0)
    kp, kk, ki = jax.random.split(key, 3)

    params = init_params(kp, H, W)
    input_kspace = jax.random.normal(kk, (N, 2, H, W), dtype=jnp.float32)
    input_img = jax.random.normal(ki, (N, 1, H, W), dtype=jnp.float32)

    fwd = jax.jit(dautomap_dual_encoder_unet_forward)
    output, dautomap_pred = fwd(params, input_kspace, input_img)
    jax.block_until_ready((output, dautomap_pred))

    assert output.shape == (N, 1, H, W)
    assert dautomap_pred.shape == (N, 1, H, W)

    ref_out, ref_pred = jax.jit(_reference_forward)(params, input_kspace,
                                                    input_img)
    jax.block_until_ready((ref_out, ref_pred))
    assert jnp.allclose(output, ref_out, rtol=1e-2, atol=1e-3), (
        "output mismatch, max abs diff = %e"
        % float(jnp.max(jnp.abs(output - ref_out))))
    assert jnp.allclose(dautomap_pred, ref_pred, rtol=1e-2, atol=1e-3), (
        "pred mismatch, max abs diff = %e"
        % float(jnp.max(jnp.abs(dautomap_pred - ref_pred))))

    print("KERNEL_OK")
</pallas_src>

<mosaic_0001>
module attributes {stable_mosaic.version = 11 : i64} {
  func.func @_fused_kernel(%arg0: i32, %arg1: memref<1x2x256xf32, #tpu.memory_space<vmem>>, %arg2: memref<1x1x256xf32, #tpu.memory_space<vmem>>, %arg3: memref<2x2x256x256xf32, #tpu.memory_space<vmem>>, %arg4: memref<2x2x2xf32, #tpu.memory_space<vmem>>, %arg5: memref<2x2x1xf32, #tpu.memory_space<vmem>>, %arg6: memref<8x8x145xf32, #tpu.memory_space<vmem>>, %arg7: memref<1x1x256xf32, #tpu.memory_space<vmem>>, %arg8: memref<1x1x256xf32, #tpu.memory_space<vmem>>) attributes {dimension_semantics = [#tpu.dimension_semantics<parallel>], iteration_bounds = array<i64: 2>, scalar_prefetch = 0 : i64, scratch_operands = 0 : i64, tpu.core_type = #tpu.core_type<tc>, window_params = [{transform_indices = @transform_0, window_bounds = array<i64: 1, 2, 256>}, {transform_indices = @transform_1, window_bounds = array<i64: 1, 1, 256>}, {pipeline_mode = #tpu.pipeline_mode<synchronous>, transform_indices = @transform_2, window_bounds = array<i64: 2, 2, 256, 256>}, {pipeline_mode = #tpu.pipeline_mode<synchronous>, transform_indices = @transform_3, window_bounds = array<i64: 2, 2, 2>}, {pipeline_mode = #tpu.pipeline_mode<synchronous>, transform_indices = @transform_4, window_bounds = array<i64: 2, 2, 1>}, {pipeline_mode = #tpu.pipeline_mode<synchronous>, transform_indices = @transform_5, window_bounds = array<i64: 8, 8, 145>}, {transform_indices = @transform_6, window_bounds = array<i64: 1, 1, 256>}, {transform_indices = @transform_7, window_bounds = array<i64: 1, 1, 256>}]} {
    %0 = tpu.iota {dimensions = array<i32: 1>} : vector<1x256xi32>
    %c15_i32 = arith.constant 15 : i32
    %1 = vector.broadcast %c15_i32 : i32 to vector<1x256xi32>
    %2 = arith.andi %0, %1 : vector<1x256xi32>
    %c4_i32 = arith.constant 4 : i32
    %3 = vector.broadcast %c4_i32 : i32 to vector<1x256xi32>
    %4 = arith.shrsi %0, %3 : vector<1x256xi32>
    %c0 = arith.constant 0 : index
    %c0_0 = arith.constant 0 : index
    %c0_1 = arith.constant 0 : index
    %5 = vector.load %arg1[%c0, %c0_0, %c0_1] : memref<1x2x256xf32, #tpu.memory_space<vmem>>, vector<1x2x256xf32>
    %6 = vector.shape_cast %5 : vector<1x2x256xf32> to vector<2x256xf32>
    %7 = vector.extract_strided_slice %6 {offsets = [0, 0], sizes = [1, 256], strides = [1, 1]} : vector<2x256xf32> to vector<1x256xf32>
    %c0_2 = arith.constant 0 : index
    %c0_3 = arith.constant 0 : index
    %c0_4 = arith.constant 0 : index
    %c0_5 = arith.constant 0 : index
    %8 = vector.load %arg3[%c0_2, %c0_3, %c0_4, %c0_5] : memref<2x2x256x256xf32, #tpu.memory_space<vmem>>, vector<1x1x256x256xf32>
    %9 = vector.shape_cast %8 : vector<1x1x256x256xf32> to vector<256x256xf32>
    %cst = arith.constant dense<0.000000e+00> : vector<1x256xf32>
    %10 = tpu.matmul %7, %9, %cst {dimension_numbers = #tpu.dot_dimension_numbers<[1], [0], [0], [1], [0, 0, 1, 1], [], []>} : vector<1x256xf32>, vector<256x256xf32>, vector<1x256xf32> -> vector<1x256xf32>
    %11 = vector.extract_strided_slice %6 {offsets = [1, 0], sizes = [1, 256], strides = [1, 1]} : vector<2x256xf32> to vector<1x256xf32>
    %c0_6 = arith.constant 0 : index
    %c1 = arith.constant 1 : index
    %c0_7 = arith.constant 0 : index
    %c0_8 = arith.constant 0 : index
    %12 = vector.load %arg3[%c0_6, %c1, %c0_7, %c0_8] : memref<2x2x256x256xf32, #tpu.memory_space<vmem>>, vector<1x1x256x256xf32>
    %13 = vector.shape_cast %12 : vector<1x1x256x256xf32> to vector<256x256xf32>
    %cst_9 = arith.constant dense<0.000000e+00> : vector<1x256xf32>
    %14 = tpu.matmul %11, %13, %cst_9 {dimension_numbers = #tpu.dot_dimension_numbers<[1], [0], [0], [1], [0, 0, 1, 1], [], []>} : vector<1x256xf32>, vector<256x256xf32>, vector<1x256xf32> -> vector<1x256xf32>
    %15 = tpu.concatenate %10, %14 in 0 : vector<1x256xf32>, vector<1x256xf32> -> vector<2x256xf32>
    %c0_10 = arith.constant 0 : index
    %c0_11 = arith.constant 0 : index
    %c0_12 = arith.constant 0 : index
    %16 = vector.load %arg4[%c0_10, %c0_11, %c0_12] : memref<2x2x2xf32, #tpu.memory_space<vmem>>, vector<1x2x2xf32>
    %17 = vector.shape_cast %16 : vector<1x2x2xf32> to vector<2x2xf32>
    %cst_13 = arith.constant dense<0.000000e+00> : vector<2x256xf32>
    %18 = tpu.matmul %17, %15, %cst_13 {dimension_numbers = #tpu.dot_dimension_numbers<[1], [0], [0], [1], [0, 0, 1, 1], [], []>} : vector<2x2xf32>, vector<2x256xf32>, vector<2x256xf32> -> vector<2x256xf32>
    %c0_14 = arith.constant 0 : index
    %c0_15 = arith.constant 0 : index
    %c0_16 = arith.constant 0 : index
    %19 = vector.load %arg5[%c0_14, %c0_15, %c0_16] : memref<2x2x1xf32, #tpu.memory_space<vmem>>, vector<1x2x1xf32>
    %20 = vector.shape_cast %19 : vector<1x2x1xf32> to vector<2x1xf32>
    %21 = vector.broadcast %20 : vector<2x1xf32> to vector<2x256xf32>
    %22 = arith.addf %18, %21 : vector<2x256xf32>
    %23 = math.tanh %22 : vector<2x256xf32>
    %24 = vector.extract_strided_slice %23 {offsets = [0, 0], sizes = [1, 256], strides = [1, 1]} : vector<2x256xf32> to vector<1x256xf32>
    %c1_17 = arith.constant 1 : index
    %c0_18 = arith.constant 0 : index
    %c0_19 = arith.constant 0 : index
    %c0_20 = arith.constant 0 : index
    %25 = vector.load %arg3[%c1_17, %c0_18, %c0_19, %c0_20] : memref<2x2x256x256xf32, #tpu.memory_space<vmem>>, vector<1x1x256x256xf32>
    %26 = vector.shape_cast %25 : vector<1x1x256x256xf32> to vector<256x256xf32>
    %cst_21 = arith.constant dense<0.000000e+00> : vector<1x256xf32>
    %27 = tpu.matmul %24, %26, %cst_21 {dimension_numbers = #tpu.dot_dimension_numbers<[1], [0], [0], [1], [0, 0, 1, 1], [], []>} : vector<1x256xf32>, vector<256x256xf32>, vector<1x256xf32> -> vector<1x256xf32>
    %28 = vector.extract_strided_slice %23 {offsets = [1, 0], sizes = [1, 256], strides = [1, 1]} : vector<2x256xf32> to vector<1x256xf32>
    %c1_22 = arith.constant 1 : index
    %c1_23 = arith.constant 1 : index
    %c0_24 = arith.constant 0 : index
    %c0_25 = arith.constant 0 : index
    %29 = vector.load %arg3[%c1_22, %c1_23, %c0_24, %c0_25] : memref<2x2x256x256xf32, #tpu.memory_space<vmem>>, vector<1x1x256x256xf32>
    %30 = vector.shape_cast %29 : vector<1x1x256x256xf32> to vector<256x256xf32>
    %cst_26 = arith.constant dense<0.000000e+00> : vector<1x256xf32>
    %31 = tpu.matmul %28, %30, %cst_26 {dimension_numbers = #tpu.dot_dimension_numbers<[1], [0], [0], [1], [0, 0, 1, 1], [], []>} : vector<1x256xf32>, vector<256x256xf32>, vector<1x256xf32> -> vector<1x256xf32>
    %32 = tpu.concatenate %27, %31 in 0 : vector<1x256xf32>, vector<1x256xf32> -> vector<2x256xf32>
    %c1_27 = arith.constant 1 : index
    %c0_28 = arith.constant 0 : index
    %c0_29 = arith.constant 0 : index
    %33 = vector.load %arg4[%c1_27, %c0_28, %c0_29] : memref<2x2x2xf32, #tpu.memory_space<vmem>>, vector<1x2x2xf32>
    %34 = vector.shape_cast %33 : vector<1x2x2xf32> to vector<2x2xf32>
    %cst_30 = arith.constant dense<0.000000e+00> : vector<2x256xf32>
    %35 = tpu.matmul %34, %32, %cst_30 {dimension_numbers = #tpu.dot_dimension_numbers<[1], [0], [0], [1], [0, 0, 1, 1], [], []>} : vector<2x2xf32>, vector<2x256xf32>, vector<2x256xf32> -> vector<2x256xf32>
    %c1_31 = arith.constant 1 : index
    %c0_32 = arith.constant 0 : index
    %c0_33 = arith.constant 0 : index
    %36 = vector.load %arg5[%c1_31, %c0_32, %c0_33] : memref<2x2x1xf32, #tpu.memory_space<vmem>>, vector<1x2x1xf32>
    %37 = vector.shape_cast %36 : vector<1x2x1xf32> to vector<2x1xf32>
    %38 = vector.broadcast %37 : vector<2x1xf32> to vector<2x256xf32>
    %39 = arith.addf %35, %38 : vector<2x256xf32>
    %40 = vector.extract_strided_slice %39 {offsets = [0, 239], sizes = [2, 17], strides = [1, 1]} : vector<2x256xf32> to vector<2x17xf32>
    %41 = vector.extract_strided_slice %39 {offsets = [0, 0], sizes = [2, 239], strides = [1, 1]} : vector<2x256xf32> to vector<2x239xf32>
    %42 = tpu.concatenate %40, %41 in 1 : vector<2x17xf32>, vector<2x239xf32> -> vector<2x256xf32>
    %c1_i32 = arith.constant 1 : i32
    %43 = vector.broadcast %c1_i32 : i32 to vector<1x256xi32>
    %44 = arith.cmpi sge, %4, %43 : vector<1x256xi32>
    %c1_i32_34 = arith.constant 1 : i32
    %45 = vector.broadcast %c1_i32_34 : i32 to vector<1x256xi32>
    %46 = arith.cmpi sge, %2, %45 : vector<1x256xi32>
    %47 = arith.andi %44, %46 : vector<1x256xi1>
    %cst_35 = arith.constant 0.000000e+00 : f32
    %48 = vector.shape_cast %47 : vector<1x256xi1> to vector<1x256xi1>
    %49 = vector.broadcast %48 : vector<1x256xi1> to vector<2x256xi1>
    %50 = vector.broadcast %cst_35 : f32 to vector<2x256xf32>
    %51 = arith.select %49, %42, %50 : vector<2x256xi1>, vector<2x256xf32>
    %52 = vector.extract_strided_slice %39 {offsets = [0, 240], sizes = [2, 16], strides = [1, 1]} : vector<2x256xf32> to vector<2x16xf32>
    %53 = vector.extract_strided_slice %39 {offsets = [0, 0], sizes = [2, 240], strides = [1, 1]} : vector<2x256xf32> to vector<2x240xf32>
    %54 = tpu.concatenate %52, %53 in 1 : vector<2x16xf32>, vector<2x240xf32> -> vector<2x256xf32>
    %c1_i32_36 = arith.constant 1 : i32
    %55 = vector.broadcast %c1_i32_36 : i32 to vector<1x256xi32>
    %56 = arith.cmpi sge, %4, %55 : vector<1x256xi32>
    %cst_37 = arith.constant 0.000000e+00 : f32
    %57 = vector.shape_cast %56 : vector<1x256xi1> to vector<1x256xi1>
    %58 = vector.broadcast %57 : vector<1x256xi1> to vector<2x256xi1>
    %59 = vector.broadcast %cst_37 : f32 to vector<2x256xf32>
    %60 = arith.select %58, %54, %59 : vector<2x256xi1>, vector<2x256xf32>
    %61 = vector.extract_strided_slice %39 {offsets = [0, 241], sizes = [2, 15], strides = [1, 1]} : vector<2x256xf32> to vector<2x15xf32>
    %62 = vector.extract_strided_slice %39 {offsets = [0, 0], sizes = [2, 241], strides = [1, 1]} : vector<2x256xf32> to vector<2x241xf32>
    %63 = tpu.concatenate %61, %62 in 1 : vector<2x15xf32>, vector<2x241xf32> -> vector<2x256xf32>
    %c1_i32_38 = arith.constant 1 : i32
    %64 = vector.broadcast %c1_i32_38 : i32 to vector<1x256xi32>
    %65 = arith.cmpi sge, %4, %64 : vector<1x256xi32>
    %c15_i32_39 = arith.constant 15 : i32
    %66 = vector.broadcast %c15_i32_39 : i32 to vector<1x256xi32>
    %67 = arith.cmpi slt, %2, %66 : vector<1x256xi32>
    %68 = arith.andi %65, %67 : vector<1x256xi1>
    %cst_40 = arith.constant 0.000000e+00 : f32
    %69 = vector.shape_cast %68 : vector<1x256xi1> to vector<1x256xi1>
    %70 = vector.broadcast %69 : vector<1x256xi1> to vector<2x256xi1>
    %71 = vector.broadcast %cst_40 : f32 to vector<2x256xf32>
    %72 = arith.select %70, %63, %71 : vector<2x256xi1>, vector<2x256xf32>
    %73 = vector.extract_strided_slice %39 {offsets = [0, 255], sizes = [2, 1], strides = [1, 1]} : vector<2x256xf32> to vector<2x1xf32>
    %74 = vector.extract_strided_slice %39 {offsets = [0, 0], sizes = [2, 255], strides = [1, 1]} : vector<2x256xf32> to vector<2x255xf32>
    %75 = tpu.concatenate %73, %74 in 1 : vector<2x1xf32>, vector<2x255xf32> -> vector<2x256xf32>
    %c1_i32_41 = arith.constant 1 : i32
    %76 = vector.broadcast %c1_i32_41 : i32 to vector<1x256xi32>
    %77 = arith.cmpi sge, %2, %76 : vector<1x256xi32>
    %cst_42 = arith.constant 0.000000e+00 : f32
    %78 = vector.shape_cast %77 : vector<1x256xi1> to vector<1x256xi1>
    %79 = vector.broadcast %78 : vector<1x256xi1> to vector<2x256xi1>
    %80 = vector.broadcast %cst_42 : f32 to vector<2x256xf32>
    %81 = arith.select %79, %75, %80 : vector<2x256xi1>, vector<2x256xf32>
    %82 = vector.extract_strided_slice %39 {offsets = [0, 1], sizes = [2, 255], strides = [1, 1]} : vector<2x256xf32> to vector<2x255xf32>
    %83 = vector.extract_strided_slice %39 {offsets = [0, 0], sizes = [2, 1], strides = [1, 1]} : vector<2x256xf32> to vector<2x1xf32>
    %84 = tpu.concatenate %82, %83 in 1 : vector<2x255xf32>, vector<2x1xf32> -> vector<2x256xf32>
    %c15_i32_43 = arith.constant 15 : i32
    %85 = vector.broadcast %c15_i32_43 : i32 to vector<1x256xi32>
    %86 = arith.cmpi slt, %2, %85 : vector<1x256xi32>
    %cst_44 = arith.constant 0.000000e+00 : f32
    %87 = vector.shape_cast %86 : vector<1x256xi1> to vector<1x256xi1>
    %88 = vector.broadcast %87 : vector<1x256xi1> to vector<2x256xi1>
    %89 = vector.broadcast %cst_44 : f32 to vector<2x256xf32>
    %90 = arith.select %88, %84, %89 : vector<2x256xi1>, vector<2x256xf32>
    %91 = vector.extract_strided_slice %39 {offsets = [0, 15], sizes = [2, 241], strides = [1, 1]} : vector<2x256xf32> to vector<2x241xf32>
    %92 = vector.extract_strided_slice %39 {offsets = [0, 0], sizes = [2, 15], strides = [1, 1]} : vector<2x256xf32> to vector<2x15xf32>
    %93 = tpu.concatenate %91, %92 in 1 : vector<2x241xf32>, vector<2x15xf32> -> vector<2x256xf32>
    %c15_i32_45 = arith.constant 15 : i32
    %94 = vector.broadcast %c15_i32_45 : i32 to vector<1x256xi32>
    %95 = arith.cmpi slt, %4, %94 : vector<1x256xi32>
    %c1_i32_46 = arith.constant 1 : i32
    %96 = vector.broadcast %c1_i32_46 : i32 to vector<1x256xi32>
    %97 = arith.cmpi sge, %2, %96 : vector<1x256xi32>
    %98 = arith.andi %95, %97 : vector<1x256xi1>
    %cst_47 = arith.constant 0.000000e+00 : f32
    %99 = vector.shape_cast %98 : vector<1x256xi1> to vector<1x256xi1>
    %100 = vector.broadcast %99 : vector<1x256xi1> to vector<2x256xi1>
    %101 = vector.broadcast %cst_47 : f32 to vector<2x256xf32>
    %102 = arith.select %100, %93, %101 : vector<2x256xi1>, vector<2x256xf32>
    %103 = vector.extract_strided_slice %39 {offsets = [0, 16], sizes = [2, 240], strides = [1, 1]} : vector<2x256xf32> to vector<2x240xf32>
    %104 = vector.extract_strided_slice %39 {offsets = [0, 0], sizes = [2, 16], strides = [1, 1]} : vector<2x256xf32> to vector<2x16xf32>
    %105 = tpu.concatenate %103, %104 in 1 : vector<2x240xf32>, vector<2x16xf32> -> vector<2x256xf32>
    %c15_i32_48 = arith.constant 15 : i32
    %106 = vector.broadcast %c15_i32_48 : i32 to vector<1x256xi32>
    %107 = arith.cmpi slt, %4, %106 : vector<1x256xi32>
    %cst_49 = arith.constant 0.000000e+00 : f32
    %108 = vector.shape_cast %107 : vector<1x256xi1> to vector<1x256xi1>
    %109 = vector.broadcast %108 : vector<1x256xi1> to vector<2x256xi1>
    %110 = vector.broadcast %cst_49 : f32 to vector<2x256xf32>
    %111 = arith.select %109, %105, %110 : vector<2x256xi1>, vector<2x256xf32>
    %112 = vector.extract_strided_slice %39 {offsets = [0, 17], sizes = [2, 239], strides = [1, 1]} : vector<2x256xf32> to vector<2x239xf32>
    %113 = vector.extract_strided_slice %39 {offsets = [0, 0], sizes = [2, 17], strides = [1, 1]} : vector<2x256xf32> to vector<2x17xf32>
    %114 = tpu.concatenate %112, %113 in 1 : vector<2x239xf32>, vector<2x17xf32> -> vector<2x256xf32>
    %c15_i32_50 = arith.constant 15 : i32
    %115 = vector.broadcast %c15_i32_50 : i32 to vector<1x256xi32>
    %116 = arith.cmpi slt, %4, %115 : vector<1x256xi32>
    %c15_i32_51 = arith.constant 15 : i32
    %117 = vector.broadcast %c15_i32_51 : i32 to vector<1x256xi32>
    %118 = arith.cmpi slt, %2, %117 : vector<1x256xi32>
    %119 = arith.andi %116, %118 : vector<1x256xi1>
    %cst_52 = arith.constant 0.000000e+00 : f32
    %120 = vector.shape_cast %119 : vector<1x256xi1> to vector<1x256xi1>
    %121 = vector.broadcast %120 : vector<1x256xi1> to vector<2x256xi1>
    %122 = vector.broadcast %cst_52 : f32 to vector<2x256xf32>
    %123 = arith.select %121, %114, %122 : vector<2x256xi1>, vector<2x256xf32>
    %cst_53 = arith.constant 1.000000e+00 : f32
    %124 = vector.broadcast %cst_53 : f32 to vector<1x256xf32>
    %125 = tpu.concatenate %51, %60, %72, %81, %39, %90, %102, %111, %123, %124 in 0 : vector<2x256xf32>, vector<2x256xf32>, vector<2x256xf32>, vector<2x256xf32>, vector<2x256xf32>, vector<2x256xf32>, vector<2x256xf32>, vector<2x256xf32>, vector<2x256xf32>, vector<1x256xf32> -> vector<19x256xf32>
    %c0_54 = arith.constant 0 : index
    %c0_55 = arith.constant 0 : index
    %c0_56 = arith.constant 0 : index
    %126 = vector.load %arg6[%c0_54, %c0_55, %c0_56] : memref<8x8x145xf32, #tpu.memory_space<vmem>>, vector<1x8x145xf32>
    %127 = vector.shape_cast %126 : vector<1x8x145xf32> to vector<8x145xf32>
    %128 = vector.extract_strided_slice %127 {offsets = [0, 0], sizes = [8, 19], strides = [1, 1]} : vector<8x145xf32> to vector<8x19xf32>
    %cst_57 = arith.constant dense<0.000000e+00> : vector<8x256xf32>
    %129 = tpu.matmul %128, %125, %cst_57 {dimension_numbers = #tpu.dot_dimension_numbers<[1], [0], [0], [1], [0, 0, 1, 1], [], []>} : vector<8x19xf32>, vector<19x256xf32>, vector<8x256xf32> -> vector<8x256xf32>
    %cst_58 = arith.constant 0.000000e+00 : f32
    %130 = vector.broadcast %cst_58 : f32 to vector<8x256xf32>
    %131 = arith.maximumf %129, %130 : vector<8x256xf32>
    %132 = vector.extract_strided_slice %131 {offsets = [0, 239], sizes = [8, 17], strides = [1, 1]} : vector<8x256xf32> to vector<8x17xf32>
    %133 = vector.extract_strided_slice %131 {offsets = [0, 0], sizes = [8, 239], strides = [1, 1]} : vector<8x256xf32> to vector<8x239xf32>
    %134 = tpu.concatenate %132, %133 in 1 : vector<8x17xf32>, vector<8x239xf32> -> vector<8x256xf32>
    %c1_i32_59 = arith.constant 1 : i32
    %135 = vector.broadcast %c1_i32_59 : i32 to vector<1x256xi32>
    %136 = arith.cmpi sge, %4, %135 : vector<1x256xi32>
    %c1_i32_60 = arith.constant 1 : i32
    %137 = vector.broadcast %c1_i32_60 : i32 to vector<1x256xi32>
    %138 = arith.cmpi sge, %2, %137 : vector<1x256xi32>
    %139 = arith.andi %136, %138 : vector<1x256xi1>
    %cst_61 = arith.constant 0.000000e+00 : f32
    %140 = vector.shape_cast %139 : vector<1x256xi1> to vector<1x256xi1>
    %141 = vector.broadcast %140 : vector<1x256xi1> to vector<8x256xi1>
    %142 = vector.broadcast %cst_61 : f32 to vector<8x256xf32>
    %143 = arith.select %141, %134, %142 : vector<8x256xi1>, vector<8x256xf32>
    %144 = vector.extract_strided_slice %131 {offsets = [0, 240], sizes = [8, 16], strides = [1, 1]} : vector<8x256xf32> to vector<8x16xf32>
    %145 = vector.extract_strided_slice %131 {offsets = [0, 0], sizes = [8, 240], strides = [1, 1]} : vector<8x256xf32> to vector<8x240xf32>
    %146 = tpu.concatenate %144, %145 in 1 : vector<8x16xf32>, vector<8x240xf32> -> vector<8x256xf32>
    %c1_i32_62 = arith.constant 1 : i32
    %147 = vector.broadcast %c1_i32_62 : i32 to vector<1x256xi32>
    %148 = arith.cmpi sge, %4, %147 : vector<1x256xi32>
    %cst_63 = arith.constant 0.000000e+00 : f32
    %149 = vector.shape_cast %148 : vector<1x256xi1> to vector<1x256xi1>
    %150 = vector.broadcast %149 : vector<1x256xi1> to vector<8x256xi1>
    %151 = vector.broadcast %cst_63 : f32 to vector<8x256xf32>
    %152 = arith.select %150, %146, %151 : vector<8x256xi1>, vector<8x256xf32>
    %153 = vector.extract_strided_slice %131 {offsets = [0, 241], sizes = [8, 15], strides = [1, 1]} : vector<8x256xf32> to vector<8x15xf32>
    %154 = vector.extract_strided_slice %131 {offsets = [0, 0], sizes = [8, 241], strides = [1, 1]} : vector<8x256xf32> to vector<8x241xf32>
    %155 = tpu.concatenate %153, %154 in 1 : vector<8x15xf32>, vector<8x241xf32> -> vector<8x256xf32>
    %c1_i32_64 = arith.constant 1 : i32
    %156 = vector.broadcast %c1_i32_64 : i32 to vector<1x256xi32>
    %157 = arith.cmpi sge, %4, %156 : vector<1x256xi32>
    %c15_i32_65 = arith.constant 15 : i32
    %158 = vector.broadcast %c15_i32_65 : i32 to vector<1x256xi32>
    %159 = arith.cmpi slt, %2, %158 : vector<1x256xi32>
    %160 = arith.andi %157, %159 : vector<1x256xi1>
    %cst_66 = arith.constant 0.000000e+00 : f32
    %161 = vector.shape_cast %160 : vector<1x256xi1> to vector<1x256xi1>
    %162 = vector.broadcast %161 : vector<1x256xi1> to vector<8x256xi1>
    %163 = vector.broadcast %cst_66 : f32 to vector<8x256xf32>
    %164 = arith.select %162, %155, %163 : vector<8x256xi1>, vector<8x256xf32>
    %165 = vector.extract_strided_slice %131 {offsets = [0, 255], sizes = [8, 1], strides = [1, 1]} : vector<8x256xf32> to vector<8x1xf32>
    %166 = vector.extract_strided_slice %131 {offsets = [0, 0], sizes = [8, 255], strides = [1, 1]} : vector<8x256xf32> to vector<8x255xf32>
    %167 = tpu.concatenate %165, %166 in 1 : vector<8x1xf32>, vector<8x255xf32> -> vector<8x256xf32>
    %c1_i32_67 = arith.constant 1 : i32
    %168 = vector.broadcast %c1_i32_67 : i32 to vector<1x256xi32>
    %169 = arith.cmpi sge, %2, %168 : vector<1x256xi32>
    %cst_68 = arith.constant 0.000000e+00 : f32
    %170 = vector.shape_cast %169 : vector<1x256xi1> to vector<1x256xi1>
    %171 = vector.broadcast %170 : vector<1x256xi1> to vector<8x256xi1>
    %172 = vector.broadcast %cst_68 : f32 to vector<8x256xf32>
    %173 = arith.select %171, %167, %172 : vector<8x256xi1>, vector<8x256xf32>
    %174 = vector.extract_strided_slice %131 {offsets = [0, 1], sizes = [8, 255], strides = [1, 1]} : vector<8x256xf32> to vector<8x255xf32>
    %175 = vector.extract_strided_slice %131 {offsets = [0, 0], sizes = [8, 1], strides = [1, 1]} : vector<8x256xf32> to vector<8x1xf32>
    %176 = tpu.concatenate %174, %175 in 1 : vector<8x255xf32>, vector<8x1xf32> -> vector<8x256xf32>
    %c15_i32_69 = arith.constant 15 : i32
    %177 = vector.broadcast %c15_i32_69 : i32 to vector<1x256xi32>
    %178 = arith.cmpi slt, %2, %177 : vector<1x256xi32>
    %cst_70 = arith.constant 0.000000e+00 : f32
    %179 = vector.shape_cast %178 : vector<1x256xi1> to vector<1x256xi1>
    %180 = vector.broadcast %179 : vector<1x256xi1> to vector<8x256xi1>
    %181 = vector.broadcast %cst_70 : f32 to vector<8x256xf32>
    %182 = arith.select %180, %176, %181 : vector<8x256xi1>, vector<8x256xf32>
    %183 = vector.extract_strided_slice %131 {offsets = [0, 15], sizes = [8, 241], strides = [1, 1]} : vector<8x256xf32> to vector<8x241xf32>
    %184 = vector.extract_strided_slice %131 {offsets = [0, 0], sizes = [8, 15], strides = [1, 1]} : vector<8x256xf32> to vector<8x15xf32>
    %185 = tpu.concatenate %183, %184 in 1 : vector<8x241xf32>, vector<8x15xf32> -> vector<8x256xf32>
    %c15_i32_71 = arith.constant 15 : i32
    %186 = vector.broadcast %c15_i32_71 : i32 to vector<1x256xi32>
    %187 = arith.cmpi slt, %4, %186 : vector<1x256xi32>
    %c1_i32_72 = arith.constant 1 : i32
    %188 = vector.broadcast %c1_i32_72 : i32 to vector<1x256xi32>
    %189 = arith.cmpi sge, %2, %188 : vector<1x256xi32>
    %190 = arith.andi %187, %189 : vector<1x256xi1>
    %cst_73 = arith.constant 0.000000e+00 : f32
    %191 = vector.shape_cast %190 : vector<1x256xi1> to vector<1x256xi1>
    %192 = vector.broadcast %191 : vector<1x256xi1> to vector<8x256xi1>
    %193 = vector.broadcast %cst_73 : f32 to vector<8x256xf32>
    %194 = arith.select %192, %185, %193 : vector<8x256xi1>, vector<8x256xf32>
    %195 = vector.extract_strided_slice %131 {offsets = [0, 16], sizes = [8, 240], strides = [1, 1]} : vector<8x256xf32> to vector<8x240xf32>
    %196 = vector.extract_strided_slice %131 {offsets = [0, 0], sizes = [8, 16], strides = [1, 1]} : vector<8x256xf32> to vector<8x16xf32>
    %197 = tpu.concatenate %195, %196 in 1 : vector<8x240xf32>, vector<8x16xf32> -> vector<8x256xf32>
    %c15_i32_74 = arith.constant 15 : i32
    %198 = vector.broadcast %c15_i32_74 : i32 to vector<1x256xi32>
    %199 = arith.cmpi slt, %4, %198 : vector<1x256xi32>
    %cst_75 = arith.constant 0.000000e+00 : f32
    %200 = vector.shape_cast %199 : vector<1x256xi1> to vector<1x256xi1>
    %201 = vector.broadcast %200 : vector<1x256xi1> to vector<8x256xi1>
    %202 = vector.broadcast %cst_75 : f32 to vector<8x256xf32>
    %203 = arith.select %201, %197, %202 : vector<8x256xi1>, vector<8x256xf32>
    %204 = vector.extract_strided_slice %131 {offsets = [0, 17], sizes = [8, 239], strides = [1, 1]} : vector<8x256xf32> to vector<8x239xf32>
    %205 = vector.extract_strided_slice %131 {offsets = [0, 0], sizes = [8, 17], strides = [1, 1]} : vector<8x256xf32> to vector<8x17xf32>
    %206 = tpu.concatenate %204, %205 in 1 : vector<8x239xf32>, vector<8x17xf32> -> vector<8x256xf32>
    %c15_i32_76 = arith.constant 15 : i32
    %207 = vector.broadcast %c15_i32_76 : i32 to vector<1x256xi32>
    %208 = arith.cmpi slt, %4, %207 : vector<1x256xi32>
    %c15_i32_77 = arith.constant 15 : i32
    %209 = vector.broadcast %c15_i32_77 : i32 to vector<1x256xi32>
    %210 = arith.cmpi slt, %2, %209 : vector<1x256xi32>
    %211 = arith.andi %208, %210 : vector<1x256xi1>
    %cst_78 = arith.constant 0.000000e+00 : f32
    %212 = vector.shape_cast %211 : vector<1x256xi1> to vector<1x256xi1>
    %213 = vector.broadcast %212 : vector<1x256xi1> to vector<8x256xi1>
    %214 = vector.broadcast %cst_78 : f32 to vector<8x256xf32>
    %215 = arith.select %213, %206, %214 : vector<8x256xi1>, vector<8x256xf32>
    %cst_79 = arith.constant 1.000000e+00 : f32
    %216 = vector.broadcast %cst_79 : f32 to vector<1x256xf32>
    %217 = tpu.concatenate %143, %152, %164, %173, %131, %182, %194, %203, %215, %216 in 0 : vector<8x256xf32>, vector<8x256xf32>, vector<8x256xf32>, vector<8x256xf32>, vector<8x256xf32>, vector<8x256xf32>, vector<8x256xf32>, vector<8x256xf32>, vector<8x256xf32>, vector<1x256xf32> -> vector<73x256xf32>
    %c1_80 = arith.constant 1 : index
    %c0_81 = arith.constant 0 : index
    %c0_82 = arith.constant 0 : index
    %218 = vector.load %arg6[%c1_80, %c0_81, %c0_82] : memref<8x8x145xf32, #tpu.memory_space<vmem>>, vector<1x8x145xf32>
    %219 = vector.shape_cast %218 : vector<1x8x145xf32> to vector<8x145xf32>
    %220 = vector.extract_strided_slice %219 {offsets = [0, 0], sizes = [8, 73], strides = [1, 1]} : vector<8x145xf32> to vector<8x73xf32>
    %cst_83 = arith.constant dense<0.000000e+00> : vector<8x256xf32>
    %221 = tpu.matmul %220, %217, %cst_83 {dimension_numbers = #tpu.dot_dimension_numbers<[1], [0], [0], [1], [0, 0, 1, 1], [], []>} : vector<8x73xf32>, vector<73x256xf32>, vector<8x256xf32> -> vector<8x256xf32>
    %cst_84 = arith.constant 0.000000e+00 : f32
    %222 = vector.broadcast %cst_84 : f32 to vector<8x256xf32>
    %223 = arith.maximumf %221, %222 : vector<8x256xf32>
    %cst_85 = arith.constant 1.000000e+00 : f32
    %224 = vector.broadcast %cst_85 : f32 to vector<1x256xf32>
    %225 = tpu.concatenate %223, %224 in 0 : vector<8x256xf32>, vector<1x256xf32> -> vector<9x256xf32>
    %c2 = arith.constant 2 : index
    %c0_86 = arith.constant 0 : index
    %c0_87 = arith.constant 0 : index
    %226 = vector.load %arg6[%c2, %c0_86, %c0_87] : memref<8x8x145xf32, #tpu.memory_space<vmem>>, vector<1x8x145xf32>
    %227 = vector.shape_cast %226 : vector<1x8x145xf32> to vector<8x145xf32>
    %228 = vector.extract_strided_slice %227 {offsets = [0, 0], sizes = [1, 9], strides = [1, 1]} : vector<8x145xf32> to vector<1x9xf32>
    %cst_88 = arith.constant dense<0.000000e+00> : vector<1x256xf32>
    %229 = tpu.matmul %228, %225, %cst_88 {dimension_numbers = #tpu.dot_dimension_numbers<[1], [0], [0], [1], [0, 0, 1, 1], [], []>} : vector<1x9xf32>, vector<9x256xf32>, vector<1x256xf32> -> vector<1x256xf32>
    %c0_89 = arith.constant 0 : index
    %c0_90 = arith.constant 0 : index
    %c0_91 = arith.constant 0 : index
    %230 = vector.load %arg8[%c0_89, %c0_90, %c0_91] : memref<1x1x256xf32, #tpu.memory_space<vmem>>, vector<1x1x256xf32>
    %231 = vector.shape_cast %230 : vector<1x1x256xf32> to vector<1x256xf32>
    %232 = vector.shape_cast %229 : vector<1x256xf32> to vector<1x1x256xf32>
    tpu.vector_store %arg8[%c0_89, %c0_90, %c0_91], %232 {strides = array<i32>} : memref<1x1x256xf32, #tpu.memory_space<vmem>>, vector<1x1x256xf32>,
    %c0_92 = arith.constant 0 : index
    %c0_93 = arith.constant 0 : index
    %c0_94 = arith.constant 0 : index
    %233 = vector.load %arg2[%c0_92, %c0_93, %c0_94] : memref<1x1x256xf32, #tpu.memory_space<vmem>>, vector<1x1x256xf32>
    %234 = vector.shape_cast %233 : vector<1x1x256xf32> to vector<1x256xf32>
    %235 = vector.extract_strided_slice %229 {offsets = [0, 239], sizes = [1, 17], strides = [1, 1]} : vector<1x256xf32> to vector<1x17xf32>
    %236 = vector.extract_strided_slice %229 {offsets = [0, 0], sizes = [1, 239], strides = [1, 1]} : vector<1x256xf32> to vector<1x239xf32>
    %237 = tpu.concatenate %235, %236 in 1 : vector<1x17xf32>, vector<1x239xf32> -> vector<1x256xf32>
    %c1_i32_95 = arith.constant 1 : i32
    %238 = vector.broadcast %c1_i32_95 : i32 to vector<1x256xi32>
    %239 = arith.cmpi sge, %4, %238 : vector<1x256xi32>
    %c1_i32_96 = arith.constant 1 : i32
    %240 = vector.broadcast %c1_i32_96 : i32 to vector<1x256xi32>
    %241 = arith.cmpi sge, %2, %240 : vector<1x256xi32>
    %242 = arith.andi %239, %241 : vector<1x256xi1>
    %cst_97 = arith.constant 0.000000e+00 : f32
    %243 = vector.broadcast %cst_97 : f32 to vector<1x256xf32>
    %244 = arith.select %242, %237, %243 : vector<1x256xi1>, vector<1x256xf32>
    %245 = vector.extract_strided_slice %229 {offsets = [0, 240], sizes = [1, 16], strides = [1, 1]} : vector<1x256xf32> to vector<1x16xf32>
    %246 = vector.extract_strided_slice %229 {offsets = [0, 0], sizes = [1, 240], strides = [1, 1]} : vector<1x256xf32> to vector<1x240xf32>
    %247 = tpu.concatenate %245, %246 in 1 : vector<1x16xf32>, vector<1x240xf32> -> vector<1x256xf32>
    %c1_i32_98 = arith.constant 1 : i32
    %248 = vector.broadcast %c1_i32_98 : i32 to vector<1x256xi32>
    %249 = arith.cmpi sge, %4, %248 : vector<1x256xi32>
    %cst_99 = arith.constant 0.000000e+00 : f32
    %250 = vector.broadcast %cst_99 : f32 to vector<1x256xf32>
    %251 = arith.select %249, %247, %250 : vector<1x256xi1>, vector<1x256xf32>
    %252 = vector.extract_strided_slice %229 {offsets = [0, 241], sizes = [1, 15], strides = [1, 1]} : vector<1x256xf32> to vector<1x15xf32>
    %253 = vector.extract_strided_slice %229 {offsets = [0, 0], sizes = [1, 241], strides = [1, 1]} : vector<1x256xf32> to vector<1x241xf32>
    %254 = tpu.concatenate %252, %253 in 1 : vector<1x15xf32>, vector<1x241xf32> -> vector<1x256xf32>
    %c1_i32_100 = arith.constant 1 : i32
    %255 = vector.broadcast %c1_i32_100 : i32 to vector<1x256xi32>
    %256 = arith.cmpi sge, %4, %255 : vector<1x256xi32>
    %c15_i32_101 = arith.constant 15 : i32
    %257 = vector.broadcast %c15_i32_101 : i32 to vector<1x256xi32>
    %258 = arith.cmpi slt, %2, %257 : vector<1x256xi32>
    %259 = arith.andi %256, %258 : vector<1x256xi1>
    %cst_102 = arith.constant 0.000000e+00 : f32
    %260 = vector.broadcast %cst_102 : f32 to vector<1x256xf32>
    %261 = arith.select %259, %254, %260 : vector<1x256xi1>, vector<1x256xf32>
    %262 = vector.extract_strided_slice %229 {offsets = [0, 255], sizes = [1, 1], strides = [1, 1]} : vector<1x256xf32> to vector<1x1xf32>
    %263 = vector.extract_strided_slice %229 {offsets = [0, 0], sizes = [1, 255], strides = [1, 1]} : vector<1x256xf32> to vector<1x255xf32>
    %264 = tpu.concatenate %262, %263 in 1 : vector<1x1xf32>, vector<1x255xf32> -> vector<1x256xf32>
    %c1_i32_103 = arith.constant 1 : i32
    %265 = vector.broadcast %c1_i32_103 : i32 to vector<1x256xi32>
    %266 = arith.cmpi sge, %2, %265 : vector<1x256xi32>
    %cst_104 = arith.constant 0.000000e+00 : f32
    %267 = vector.broadcast %cst_104 : f32 to vector<1x256xf32>
    %268 = arith.select %266, %264, %267 : vector<1x256xi1>, vector<1x256xf32>
    %269 = vector.extract_strided_slice %229 {offsets = [0, 1], sizes = [1, 255], strides = [1, 1]} : vector<1x256xf32> to vector<1x255xf32>
    %270 = vector.extract_strided_slice %229 {offsets = [0, 0], sizes = [1, 1], strides = [1, 1]} : vector<1x256xf32> to vector<1x1xf32>
    %271 = tpu.concatenate %269, %270 in 1 : vector<1x255xf32>, vector<1x1xf32> -> vector<1x256xf32>
    %c15_i32_105 = arith.constant 15 : i32
    %272 = vector.broadcast %c15_i32_105 : i32 to vector<1x256xi32>
    %273 = arith.cmpi slt, %2, %272 : vector<1x256xi32>
    %cst_106 = arith.constant 0.000000e+00 : f32
    %274 = vector.broadcast %cst_106 : f32 to vector<1x256xf32>
    %275 = arith.select %273, %271, %274 : vector<1x256xi1>, vector<1x256xf32>
    %276 = vector.extract_strided_slice %229 {offsets = [0, 15], sizes = [1, 241], strides = [1, 1]} : vector<1x256xf32> to vector<1x241xf32>
    %277 = vector.extract_strided_slice %229 {offsets = [0, 0], sizes = [1, 15], strides = [1, 1]} : vector<1x256xf32> to vector<1x15xf32>
    %278 = tpu.concatenate %276, %277 in 1 : vector<1x241xf32>, vector<1x15xf32> -> vector<1x256xf32>
    %c15_i32_107 = arith.constant 15 : i32
    %279 = vector.broadcast %c15_i32_107 : i32 to vector<1x256xi32>
    %280 = arith.cmpi slt, %4, %279 : vector<1x256xi32>
    %c1_i32_108 = arith.constant 1 : i32
    %281 = vector.broadcast %c1_i32_108 : i32 to vector<1x256xi32>
    %282 = arith.cmpi sge, %2, %281 : vector<1x256xi32>
    %283 = arith.andi %280, %282 : vector<1x256xi1>
    %cst_109 = arith.constant 0.000000e+00 : f32
    %284 = vector.broadcast %cst_109 : f32 to vector<1x256xf32>
    %285 = arith.select %283, %278, %284 : vector<1x256xi1>, vector<1x256xf32>
    %286 = vector.extract_strided_slice %229 {offsets = [0, 16], sizes = [1, 240], strides = [1, 1]} : vector<1x256xf32> to vector<1x240xf32>
    %287 = vector.extract_strided_slice %229 {offsets = [0, 0], sizes = [1, 16], strides = [1, 1]} : vector<1x256xf32> to vector<1x16xf32>
    %288 = tpu.concatenate %286, %287 in 1 : vector<1x240xf32>, vector<1x16xf32> -> vector<1x256xf32>
    %c15_i32_110 = arith.constant 15 : i32
    %289 = vector.broadcast %c15_i32_110 : i32 to vector<1x256xi32>
    %290 = arith.cmpi slt, %4, %289 : vector<1x256xi32>
    %cst_111 = arith.constant 0.000000e+00 : f32
    %291 = vector.broadcast %cst_111 : f32 to vector<1x256xf32>
    %292 = arith.select %290, %288, %291 : vector<1x256xi1>, vector<1x256xf32>
    %293 = vector.extract_strided_slice %229 {offsets = [0, 17], sizes = [1, 239], strides = [1, 1]} : vector<1x256xf32> to vector<1x239xf32>
    %294 = vector.extract_strided_slice %229 {offsets = [0, 0], sizes = [1, 17], strides = [1, 1]} : vector<1x256xf32> to vector<1x17xf32>
    %295 = tpu.concatenate %293, %294 in 1 : vector<1x239xf32>, vector<1x17xf32> -> vector<1x256xf32>
    %c15_i32_112 = arith.constant 15 : i32
    %296 = vector.broadcast %c15_i32_112 : i32 to vector<1x256xi32>
    %297 = arith.cmpi slt, %4, %296 : vector<1x256xi32>
    %c15_i32_113 = arith.constant 15 : i32
    %298 = vector.broadcast %c15_i32_113 : i32 to vector<1x256xi32>
    %299 = arith.cmpi slt, %2, %298 : vector<1x256xi32>
    %300 = arith.andi %297, %299 : vector<1x256xi1>
    %cst_114 = arith.constant 0.000000e+00 : f32
    %301 = vector.broadcast %cst_114 : f32 to vector<1x256xf32>
    %302 = arith.select %300, %295, %301 : vector<1x256xi1>, vector<1x256xf32>
    %cst_115 = arith.constant 1.000000e+00 : f32
    %303 = vector.broadcast %cst_115 : f32 to vector<1x256xf32>
    %304 = tpu.concatenate %244, %251, %261, %268, %229, %275, %285, %292, %302, %303 in 0 : vector<1x256xf32>, vector<1x256xf32>, vector<1x256xf32>, vector<1x256xf32>, vector<1x256xf32>, vector<1x256xf32>, vector<1x256xf32>, vector<1x256xf32>, vector<1x256xf32>, vector<1x256xf32> -> vector<10x256xf32>
    %c3 = arith.constant 3 : index
    %c0_116 = arith.constant 0 : index
    %c0_117 = arith.constant 0 : index
    %305 = vector.load %arg6[%c3, %c0_116, %c0_117] : memref<8x8x145xf32, #tpu.memory_space<vmem>>, vector<1x8x145xf32>
    %306 = vector.shape_cast %305 : vector<1x8x145xf32> to vector<8x145xf32>
    %307 = vector.extract_strided_slice %306 {offsets = [0, 0], sizes = [8, 10], strides = [1, 1]} : vector<8x145xf32> to vector<8x10xf32>
    %cst_118 = arith.constant dense<0.000000e+00> : vector<8x256xf32>
    %308 = tpu.matmul %307, %304, %cst_118 {dimension_numbers = #tpu.dot_dimension_numbers<[1], [0], [0], [1], [0, 0, 1, 1], [], []>} : vector<8x10xf32>, vector<10x256xf32>, vector<8x256xf32> -> vector<8x256xf32>
    %cst_119 = arith.constant 0.000000e+00 : f32
    %309 = vector.broadcast %cst_119 : f32 to vector<8x256xf32>
    %310 = arith.maximumf %308, %309 : vector<8x256xf32>
    %311 = vector.extract_strided_slice %234 {offsets = [0, 239], sizes = [1, 17], strides = [1, 1]} : vector<1x256xf32> to vector<1x17xf32>
    %312 = vector.extract_strided_slice %234 {offsets = [0, 0], sizes = [1, 239], strides = [1, 1]} : vector<1x256xf32> to vector<1x239xf32>
    %313 = tpu.concatenate %311, %312 in 1 : vector<1x17xf32>, vector<1x239xf32> -> vector<1x256xf32>
    %c1_i32_120 = arith.constant 1 : i32
    %314 = vector.broadcast %c1_i32_120 : i32 to vector<1x256xi32>
    %315 = arith.cmpi sge, %4, %314 : vector<1x256xi32>
    %c1_i32_121 = arith.constant 1 : i32
    %316 = vector.broadcast %c1_i32_121 : i32 to vector<1x256xi32>
    %317 = arith.cmpi sge, %2, %316 : vector<1x256xi32>
    %318 = arith.andi %315, %317 : vector<1x256xi1>
    %cst_122 = arith.constant 0.000000e+00 : f32
    %319 = vector.broadcast %cst_122 : f32 to vector<1x256xf32>
    %320 = arith.select %318, %313, %319 : vector<1x256xi1>, vector<1x256xf32>
    %321 = vector.extract_strided_slice %234 {offsets = [0, 240], sizes = [1, 16], strides = [1, 1]} : vector<1x256xf32> to vector<1x16xf32>
    %322 = vector.extract_strided_slice %234 {offsets = [0, 0], sizes = [1, 240], strides = [1, 1]} : vector<1x256xf32> to vector<1x240xf32>
    %323 = tpu.concatenate %321, %322 in 1 : vector<1x16xf32>, vector<1x240xf32> -> vector<1x256xf32>
    %c1_i32_123 = arith.constant 1 : i32
    %324 = vector.broadcast %c1_i32_123 : i32 to vector<1x256xi32>
    %325 = arith.cmpi sge, %4, %324 : vector<1x256xi32>
    %cst_124 = arith.constant 0.000000e+00 : f32
    %326 = vector.broadcast %cst_124 : f32 to vector<1x256xf32>
    %327 = arith.select %325, %323, %326 : vector<1x256xi1>, vector<1x256xf32>
    %328 = vector.extract_strided_slice %234 {offsets = [0, 241], sizes = [1, 15], strides = [1, 1]} : vector<1x256xf32> to vector<1x15xf32>
    %329 = vector.extract_strided_slice %234 {offsets = [0, 0], sizes = [1, 241], strides = [1, 1]} : vector<1x256xf32> to vector<1x241xf32>
    %330 = tpu.concatenate %328, %329 in 1 : vector<1x15xf32>, vector<1x241xf32> -> vector<1x256xf32>
    %c1_i32_125 = arith.constant 1 : i32
    %331 = vector.broadcast %c1_i32_125 : i32 to vector<1x256xi32>
    %332 = arith.cmpi sge, %4, %331 : vector<1x256xi32>
    %c15_i32_126 = arith.constant 15 : i32
    %333 = vector.broadcast %c15_i32_126 : i32 to vector<1x256xi32>
    %334 = arith.cmpi slt, %2, %333 : vector<1x256xi32>
    %335 = arith.andi %332, %334 : vector<1x256xi1>
    %cst_127 = arith.constant 0.000000e+00 : f32
    %336 = vector.broadcast %cst_127 : f32 to vector<1x256xf32>
    %337 = arith.select %335, %330, %336 : vector<1x256xi1>, vector<1x256xf32>
    %338 = vector.extract_strided_slice %234 {offsets = [0, 255], sizes = [1, 1], strides = [1, 1]} : vector<1x256xf32> to vector<1x1xf32>
    %339 = vector.extract_strided_slice %234 {offsets = [0, 0], sizes = [1, 255], strides = [1, 1]} : vector<1x256xf32> to vector<1x255xf32>
    %340 = tpu.concatenate %338, %339 in 1 : vector<1x1xf32>, vector<1x255xf32> -> vector<1x256xf32>
    %c1_i32_128 = arith.constant 1 : i32
    %341 = vector.broadcast %c1_i32_128 : i32 to vector<1x256xi32>
    %342 = arith.cmpi sge, %2, %341 : vector<1x256xi32>
    %cst_129 = arith.constant 0.000000e+00 : f32
    %343 = vector.broadcast %cst_129 : f32 to vector<1x256xf32>
    %344 = arith.select %342, %340, %343 : vector<1x256xi1>, vector<1x256xf32>
    %345 = vector.extract_strided_slice %234 {offsets = [0, 1], sizes = [1, 255], strides = [1, 1]} : vector<1x256xf32> to vector<1x255xf32>
    %346 = vector.extract_strided_slice %234 {offsets = [0, 0], sizes = [1, 1], strides = [1, 1]} : vector<1x256xf32> to vector<1x1xf32>
    %347 = tpu.concatenate %345, %346 in 1 : vector<1x255xf32>, vector<1x1xf32> -> vector<1x256xf32>
    %c15_i32_130 = arith.constant 15 : i32
    %348 = vector.broadcast %c15_i32_130 : i32 to vector<1x256xi32>
    %349 = arith.cmpi slt, %2, %348 : vector<1x256xi32>
    %cst_131 = arith.constant 0.000000e+00 : f32
    %350 = vector.broadcast %cst_131 : f32 to vector<1x256xf32>
    %351 = arith.select %349, %347, %350 : vector<1x256xi1>, vector<1x256xf32>
    %352 = vector.extract_strided_slice %234 {offsets = [0, 15], sizes = [1, 241], strides = [1, 1]} : vector<1x256xf32> to vector<1x241xf32>
    %353 = vector.extract_strided_slice %234 {offsets = [0, 0], sizes = [1, 15], strides = [1, 1]} : vector<1x256xf32> to vector<1x15xf32>
    %354 = tpu.concatenate %352, %353 in 1 : vector<1x241xf32>, vector<1x15xf32> -> vector<1x256xf32>
    %c15_i32_132 = arith.constant 15 : i32
    %355 = vector.broadcast %c15_i32_132 : i32 to vector<1x256xi32>
    %356 = arith.cmpi slt, %4, %355 : vector<1x256xi32>
    %c1_i32_133 = arith.constant 1 : i32
    %357 = vector.broadcast %c1_i32_133 : i32 to vector<1x256xi32>
    %358 = arith.cmpi sge, %2, %357 : vector<1x256xi32>
    %359 = arith.andi %356, %358 : vector<1x256xi1>
    %cst_134 = arith.constant 0.000000e+00 : f32
    %360 = vector.broadcast %cst_134 : f32 to vector<1x256xf32>
    %361 = arith.select %359, %354, %360 : vector<1x256xi1>, vector<1x256xf32>
    %362 = vector.extract_strided_slice %234 {offsets = [0, 16], sizes = [1, 240], strides = [1, 1]} : vector<1x256xf32> to vector<1x240xf32>
    %363 = vector.extract_strided_slice %234 {offsets = [0, 0], sizes = [1, 16], strides = [1, 1]} : vector<1x256xf32> to vector<1x16xf32>
    %364 = tpu.concatenate %362, %363 in 1 : vector<1x240xf32>, vector<1x16xf32> -> vector<1x256xf32>
    %c15_i32_135 = arith.constant 15 : i32
    %365 = vector.broadcast %c15_i32_135 : i32 to vector<1x256xi32>
    %366 = arith.cmpi slt, %4, %365 : vector<1x256xi32>
    %cst_136 = arith.constant 0.000000e+00 : f32
    %367 = vector.broadcast %cst_136 : f32 to vector<1x256xf32>
    %368 = arith.select %366, %364, %367 : vector<1x256xi1>, vector<1x256xf32>
    %369 = vector.extract_strided_slice %234 {offsets = [0, 17], sizes = [1, 239], strides = [1, 1]} : vector<1x256xf32> to vector<1x239xf32>
    %370 = vector.extract_strided_slice %234 {offsets = [0, 0], sizes = [1, 17], strides = [1, 1]} : vector<1x256xf32> to vector<1x17xf32>
    %371 = tpu.concatenate %369, %370 in 1 : vector<1x239xf32>, vector<1x17xf32> -> vector<1x256xf32>
    %c15_i32_137 = arith.constant 15 : i32
    %372 = vector.broadcast %c15_i32_137 : i32 to vector<1x256xi32>
    %373 = arith.cmpi slt, %4, %372 : vector<1x256xi32>
    %c15_i32_138 = arith.constant 15 : i32
    %374 = vector.broadcast %c15_i32_138 : i32 to vector<1x256xi32>
    %375 = arith.cmpi slt, %2, %374 : vector<1x256xi32>
    %376 = arith.andi %373, %375 : vector<1x256xi1>
    %cst_139 = arith.constant 0.000000e+00 : f32
    %377 = vector.broadcast %cst_139 : f32 to vector<1x256xf32>
    %378 = arith.select %376, %371, %377 : vector<1x256xi1>, vector<1x256xf32>
    %cst_140 = arith.constant 1.000000e+00 : f32
    %379 = vector.broadcast %cst_140 : f32 to vector<1x256xf32>
    %380 = tpu.concatenate %320, %327, %337, %344, %234, %351, %361, %368, %378, %379 in 0 : vector<1x256xf32>, vector<1x256xf32>, vector<1x256xf32>, vector<1x256xf32>, vector<1x256xf32>, vector<1x256xf32>, vector<1x256xf32>, vector<1x256xf32>, vector<1x256xf32>, vector<1x256xf32> -> vector<10x256xf32>
    %c4 = arith.constant 4 : index
    %c0_141 = arith.constant 0 : index
    %c0_142 = arith.constant 0 : index
    %381 = vector.load %arg6[%c4, %c0_141, %c0_142] : memref<8x8x145xf32, #tpu.memory_space<vmem>>, vector<1x8x145xf32>
    %382 = vector.shape_cast %381 : vector<1x8x145xf32> to vector<8x145xf32>
    %383 = vector.extract_strided_slice %382 {offsets = [0, 0], sizes = [8, 10], strides = [1, 1]} : vector<8x145xf32> to vector<8x10xf32>
    %cst_143 = arith.constant dense<0.000000e+00> : vector<8x256xf32>
    %384 = tpu.matmul %383, %380, %cst_143 {dimension_numbers = #tpu.dot_dimension_numbers<[1], [0], [0], [1], [0, 0, 1, 1], [], []>} : vector<8x10xf32>, vector<10x256xf32>, vector<8x256xf32> -> vector<8x256xf32>
    %cst_144 = arith.constant 0.000000e+00 : f32
    %385 = vector.broadcast %cst_144 : f32 to vector<8x256xf32>
    %386 = arith.maximumf %384, %385 : vector<8x256xf32>
    %387 = tpu.concatenate %310, %386 in 0 : vector<8x256xf32>, vector<8x256xf32> -> vector<16x256xf32>
    %388 = vector.extract_strided_slice %387 {offsets = [0, 239], sizes = [16, 17], strides = [1, 1]} : vector<16x256xf32> to vector<16x17xf32>
    %389 = vector.extract_strided_slice %387 {offsets = [0, 0], sizes = [16, 239], strides = [1, 1]} : vector<16x256xf32> to vector<16x239xf32>
    %390 = tpu.concatenate %388, %389 in 1 : vector<16x17xf32>, vector<16x239xf32> -> vector<16x256xf32>
    %c1_i32_145 = arith.constant 1 : i32
    %391 = vector.broadcast %c1_i32_145 : i32 to vector<1x256xi32>
    %392 = arith.cmpi sge, %4, %391 : vector<1x256xi32>
    %c1_i32_146 = arith.constant 1 : i32
    %393 = vector.broadcast %c1_i32_146 : i32 to vector<1x256xi32>
    %394 = arith.cmpi sge, %2, %393 : vector<1x256xi32>
    %395 = arith.andi %392, %394 : vector<1x256xi1>
    %cst_147 = arith.constant 0.000000e+00 : f32
    %396 = vector.shape_cast %395 : vector<1x256xi1> to vector<1x256xi1>
    %397 = vector.broadcast %396 : vector<1x256xi1> to vector<16x256xi1>
    %398 = vector.broadcast %cst_147 : f32 to vector<16x256xf32>
    %399 = arith.select %397, %390, %398 : vector<16x256xi1>, vector<16x256xf32>
    %400 = vector.extract_strided_slice %387 {offsets = [0, 240], sizes = [16, 16], strides = [1, 1]} : vector<16x256xf32> to vector<16x16xf32>
    %401 = vector.extract_strided_slice %387 {offsets = [0, 0], sizes = [16, 240], strides = [1, 1]} : vector<16x256xf32> to vector<16x240xf32>
    %402 = tpu.concatenate %400, %401 in 1 : vector<16x16xf32>, vector<16x240xf32> -> vector<16x256xf32>
    %c1_i32_148 = arith.constant 1 : i32
    %403 = vector.broadcast %c1_i32_148 : i32 to vector<1x256xi32>
    %404 = arith.cmpi sge, %4, %403 : vector<1x256xi32>
    %cst_149 = arith.constant 0.000000e+00 : f32
    %405 = vector.shape_cast %404 : vector<1x256xi1> to vector<1x256xi1>
    %406 = vector.broadcast %405 : vector<1x256xi1> to vector<16x256xi1>
    %407 = vector.broadcast %cst_149 : f32 to vector<16x256xf32>
    %408 = arith.select %406, %402, %407 : vector<16x256xi1>, vector<16x256xf32>
    %409 = vector.extract_strided_slice %387 {offsets = [0, 241], sizes = [16, 15], strides = [1, 1]} : vector<16x256xf32> to vector<16x15xf32>
    %410 = vector.extract_strided_slice %387 {offsets = [0, 0], sizes = [16, 241], strides = [1, 1]} : vector<16x256xf32> to vector<16x241xf32>
    %411 = tpu.concatenate %409, %410 in 1 : vector<16x15xf32>, vector<16x241xf32> -> vector<16x256xf32>
    %c1_i32_150 = arith.constant 1 : i32
    %412 = vector.broadcast %c1_i32_150 : i32 to vector<1x256xi32>
    %413 = arith.cmpi sge, %4, %412 : vector<1x256xi32>
    %c15_i32_151 = arith.constant 15 : i32
    %414 = vector.broadcast %c15_i32_151 : i32 to vector<1x256xi32>
    %415 = arith.cmpi slt, %2, %414 : vector<1x256xi32>
    %416 = arith.andi %413, %415 : vector<1x256xi1>
    %cst_152 = arith.constant 0.000000e+00 : f32
    %417 = vector.shape_cast %416 : vector<1x256xi1> to vector<1x256xi1>
    %418 = vector.broadcast %417 : vector<1x256xi1> to vector<16x256xi1>
    %419 = vector.broadcast %cst_152 : f32 to vector<16x256xf32>
    %420 = arith.select %418, %411, %419 : vector<16x256xi1>, vector<16x256xf32>
    %421 = vector.extract_strided_slice %387 {offsets = [0, 255], sizes = [16, 1], strides = [1, 1]} : vector<16x256xf32> to vector<16x1xf32>
    %422 = vector.extract_strided_slice %387 {offsets = [0, 0], sizes = [16, 255], strides = [1, 1]} : vector<16x256xf32> to vector<16x255xf32>
    %423 = tpu.concatenate %421, %422 in 1 : vector<16x1xf32>, vector<16x255xf32> -> vector<16x256xf32>
    %c1_i32_153 = arith.constant 1 : i32
    %424 = vector.broadcast %c1_i32_153 : i32 to vector<1x256xi32>
    %425 = arith.cmpi sge, %2, %424 : vector<1x256xi32>
    %cst_154 = arith.constant 0.000000e+00 : f32
    %426 = vector.shape_cast %425 : vector<1x256xi1> to vector<1x256xi1>
    %427 = vector.broadcast %426 : vector<1x256xi1> to vector<16x256xi1>
    %428 = vector.broadcast %cst_154 : f32 to vector<16x256xf32>
    %429 = arith.select %427, %423, %428 : vector<16x256xi1>, vector<16x256xf32>
    %430 = vector.extract_strided_slice %387 {offsets = [0, 1], sizes = [16, 255], strides = [1, 1]} : vector<16x256xf32> to vector<16x255xf32>
    %431 = vector.extract_strided_slice %387 {offsets = [0, 0], sizes = [16, 1], strides = [1, 1]} : vector<16x256xf32> to vector<16x1xf32>
    %432 = tpu.concatenate %430, %431 in 1 : vector<16x255xf32>, vector<16x1xf32> -> vector<16x256xf32>
    %c15_i32_155 = arith.constant 15 : i32
    %433 = vector.broadcast %c15_i32_155 : i32 to vector<1x256xi32>
    %434 = arith.cmpi slt, %2, %433 : vector<1x256xi32>
    %cst_156 = arith.constant 0.000000e+00 : f32
    %435 = vector.shape_cast %434 : vector<1x256xi1> to vector<1x256xi1>
    %436 = vector.broadcast %435 : vector<1x256xi1> to vector<16x256xi1>
    %437 = vector.broadcast %cst_156 : f32 to vector<16x256xf32>
    %438 = arith.select %436, %432, %437 : vector<16x256xi1>, vector<16x256xf32>
    %439 = vector.extract_strided_slice %387 {offsets = [0, 15], sizes = [16, 241], strides = [1, 1]} : vector<16x256xf32> to vector<16x241xf32>
    %440 = vector.extract_strided_slice %387 {offsets = [0, 0], sizes = [16, 15], strides = [1, 1]} : vector<16x256xf32> to vector<16x15xf32>
    %441 = tpu.concatenate %439, %440 in 1 : vector<16x241xf32>, vector<16x15xf32> -> vector<16x256xf32>
    %c15_i32_157 = arith.constant 15 : i32
    %442 = vector.broadcast %c15_i32_157 : i32 to vector<1x256xi32>
    %443 = arith.cmpi slt, %4, %442 : vector<1x256xi32>
    %c1_i32_158 = arith.constant 1 : i32
    %444 = vector.broadcast %c1_i32_158 : i32 to vector<1x256xi32>
    %445 = arith.cmpi sge, %2, %444 : vector<1x256xi32>
    %446 = arith.andi %443, %445 : vector<1x256xi1>
    %cst_159 = arith.constant 0.000000e+00 : f32
    %447 = vector.shape_cast %446 : vector<1x256xi1> to vector<1x256xi1>
    %448 = vector.broadcast %447 : vector<1x256xi1> to vector<16x256xi1>
    %449 = vector.broadcast %cst_159 : f32 to vector<16x256xf32>
    %450 = arith.select %448, %441, %449 : vector<16x256xi1>, vector<16x256xf32>
    %451 = vector.extract_strided_slice %387 {offsets = [0, 16], sizes = [16, 240], strides = [1, 1]} : vector<16x256xf32> to vector<16x240xf32>
    %452 = vector.extract_strided_slice %387 {offsets = [0, 0], sizes = [16, 16], strides = [1, 1]} : vector<16x256xf32> to vector<16x16xf32>
    %453 = tpu.concatenate %451, %452 in 1 : vector<16x240xf32>, vector<16x16xf32> -> vector<16x256xf32>
    %c15_i32_160 = arith.constant 15 : i32
    %454 = vector.broadcast %c15_i32_160 : i32 to vector<1x256xi32>
    %455 = arith.cmpi slt, %4, %454 : vector<1x256xi32>
    %cst_161 = arith.constant 0.000000e+00 : f32
    %456 = vector.shape_cast %455 : vector<1x256xi1> to vector<1x256xi1>
    %457 = vector.broadcast %456 : vector<1x256xi1> to vector<16x256xi1>
    %458 = vector.broadcast %cst_161 : f32 to vector<16x256xf32>
    %459 = arith.select %457, %453, %458 : vector<16x256xi1>, vector<16x256xf32>
    %460 = vector.extract_strided_slice %387 {offsets = [0, 17], sizes = [16, 239], strides = [1, 1]} : vector<16x256xf32> to vector<16x239xf32>
    %461 = vector.extract_strided_slice %387 {offsets = [0, 0], sizes = [16, 17], strides = [1, 1]} : vector<16x256xf32> to vector<16x17xf32>
    %462 = tpu.concatenate %460, %461 in 1 : vector<16x239xf32>, vector<16x17xf32> -> vector<16x256xf32>
    %c15_i32_162 = arith.constant 15 : i32
    %463 = vector.broadcast %c15_i32_162 : i32 to vector<1x256xi32>
    %464 = arith.cmpi slt, %4, %463 : vector<1x256xi32>
    %c15_i32_163 = arith.constant 15 : i32
    %465 = vector.broadcast %c15_i32_163 : i32 to vector<1x256xi32>
    %466 = arith.cmpi slt, %2, %465 : vector<1x256xi32>
    %467 = arith.andi %464, %466 : vector<1x256xi1>
    %cst_164 = arith.constant 0.000000e+00 : f32
    %468 = vector.shape_cast %467 : vector<1x256xi1> to vector<1x256xi1>
    %469 = vector.broadcast %468 : vector<1x256xi1> to vector<16x256xi1>
    %470 = vector.broadcast %cst_164 : f32 to vector<16x256xf32>
    %471 = arith.select %469, %462, %470 : vector<16x256xi1>, vector<16x256xf32>
    %cst_165 = arith.constant 1.000000e+00 : f32
    %472 = vector.broadcast %cst_165 : f32 to vector<1x256xf32>
    %473 = tpu.concatenate %399, %408, %420, %429, %387, %438, %450, %459, %471, %472 in 0 : vector<16x256xf32>, vector<16x256xf32>, vector<16x256xf32>, vector<16x256xf32>, vector<16x256xf32>, vector<16x256xf32>, vector<16x256xf32>, vector<16x256xf32>, vector<16x256xf32>, vector<1x256xf32> -> vector<145x256xf32>
    %c5 = arith.constant 5 : index
    %c0_166 = arith.constant 0 : index
    %c0_167 = arith.constant 0 : index
    %474 = vector.load %arg6[%c5, %c0_166, %c0_167] : memref<8x8x145xf32, #tpu.memory_space<vmem>>, vector<1x8x145xf32>
    %475 = vector.shape_cast %474 : vector<1x8x145xf32> to vector<8x145xf32>
    %cst_168 = arith.constant dense<0.000000e+00> : vector<8x256xf32>
    %476 = tpu.matmul %475, %473, %cst_168 {dimension_numbers = #tpu.dot_dimension_numbers<[1], [0], [0], [1], [0, 0, 1, 1], [], []>} : vector<8x145xf32>, vector<145x256xf32>, vector<8x256xf32> -> vector<8x256xf32>
    %cst_169 = arith.constant 0.000000e+00 : f32
    %477 = vector.broadcast %cst_169 : f32 to vector<8x256xf32>
    %478 = arith.maximumf %476, %477 : vector<8x256xf32>
    %479 = vector.extract_strided_slice %478 {offsets = [0, 239], sizes = [8, 17], strides = [1, 1]} : vector<8x256xf32> to vector<8x17xf32>
    %480 = vector.extract_strided_slice %478 {offsets = [0, 0], sizes = [8, 239], strides = [1, 1]} : vector<8x256xf32> to vector<8x239xf32>
    %481 = tpu.concatenate %479, %480 in 1 : vector<8x17xf32>, vector<8x239xf32> -> vector<8x256xf32>
    %c1_i32_170 = arith.constant 1 : i32
    %482 = vector.broadcast %c1_i32_170 : i32 to vector<1x256xi32>
    %483 = arith.cmpi sge, %4, %482 : vector<1x256xi32>
    %c1_i32_171 = arith.constant 1 : i32
    %484 = vector.broadcast %c1_i32_171 : i32 to vector<1x256xi32>
    %485 = arith.cmpi sge, %2, %484 : vector<1x256xi32>
    %486 = arith.andi %483, %485 : vector<1x256xi1>
    %cst_172 = arith.constant 0.000000e+00 : f32
    %487 = vector.shape_cast %486 : vector<1x256xi1> to vector<1x256xi1>
    %488 = vector.broadcast %487 : vector<1x256xi1> to vector<8x256xi1>
    %489 = vector.broadcast %cst_172 : f32 to vector<8x256xf32>
    %490 = arith.select %488, %481, %489 : vector<8x256xi1>, vector<8x256xf32>
    %491 = vector.extract_strided_slice %478 {offsets = [0, 240], sizes = [8, 16], strides = [1, 1]} : vector<8x256xf32> to vector<8x16xf32>
    %492 = vector.extract_strided_slice %478 {offsets = [0, 0], sizes = [8, 240], strides = [1, 1]} : vector<8x256xf32> to vector<8x240xf32>
    %493 = tpu.concatenate %491, %492 in 1 : vector<8x16xf32>, vector<8x240xf32> -> vector<8x256xf32>
    %c1_i32_173 = arith.constant 1 : i32
    %494 = vector.broadcast %c1_i32_173 : i32 to vector<1x256xi32>
    %495 = arith.cmpi sge, %4, %494 : vector<1x256xi32>
    %cst_174 = arith.constant 0.000000e+00 : f32
    %496 = vector.shape_cast %495 : vector<1x256xi1> to vector<1x256xi1>
    %497 = vector.broadcast %496 : vector<1x256xi1> to vector<8x256xi1>
    %498 = vector.broadcast %cst_174 : f32 to vector<8x256xf32>
    %499 = arith.select %497, %493, %498 : vector<8x256xi1>, vector<8x256xf32>
    %500 = vector.extract_strided_slice %478 {offsets = [0, 241], sizes = [8, 15], strides = [1, 1]} : vector<8x256xf32> to vector<8x15xf32>
    %501 = vector.extract_strided_slice %478 {offsets = [0, 0], sizes = [8, 241], strides = [1, 1]} : vector<8x256xf32> to vector<8x241xf32>
    %502 = tpu.concatenate %500, %501 in 1 : vector<8x15xf32>, vector<8x241xf32> -> vector<8x256xf32>
    %c1_i32_175 = arith.constant 1 : i32
    %503 = vector.broadcast %c1_i32_175 : i32 to vector<1x256xi32>
    %504 = arith.cmpi sge, %4, %503 : vector<1x256xi32>
    %c15_i32_176 = arith.constant 15 : i32
    %505 = vector.broadcast %c15_i32_176 : i32 to vector<1x256xi32>
    %506 = arith.cmpi slt, %2, %505 : vector<1x256xi32>
    %507 = arith.andi %504, %506 : vector<1x256xi1>
    %cst_177 = arith.constant 0.000000e+00 : f32
    %508 = vector.shape_cast %507 : vector<1x256xi1> to vector<1x256xi1>
    %509 = vector.broadcast %508 : vector<1x256xi1> to vector<8x256xi1>
    %510 = vector.broadcast %cst_177 : f32 to vector<8x256xf32>
    %511 = arith.select %509, %502, %510 : vector<8x256xi1>, vector<8x256xf32>
    %512 = vector.extract_strided_slice %478 {offsets = [0, 255], sizes = [8, 1], strides = [1, 1]} : vector<8x256xf32> to vector<8x1xf32>
    %513 = vector.extract_strided_slice %478 {offsets = [0, 0], sizes = [8, 255], strides = [1, 1]} : vector<8x256xf32> to vector<8x255xf32>
    %514 = tpu.concatenate %512, %513 in 1 : vector<8x1xf32>, vector<8x255xf32> -> vector<8x256xf32>
    %c1_i32_178 = arith.constant 1 : i32
    %515 = vector.broadcast %c1_i32_178 : i32 to vector<1x256xi32>
    %516 = arith.cmpi sge, %2, %515 : vector<1x256xi32>
    %cst_179 = arith.constant 0.000000e+00 : f32
    %517 = vector.shape_cast %516 : vector<1x256xi1> to vector<1x256xi1>
    %518 = vector.broadcast %517 : vector<1x256xi1> to vector<8x256xi1>
    %519 = vector.broadcast %cst_179 : f32 to vector<8x256xf32>
    %520 = arith.select %518, %514, %519 : vector<8x256xi1>, vector<8x256xf32>
    %521 = vector.extract_strided_slice %478 {offsets = [0, 1], sizes = [8, 255], strides = [1, 1]} : vector<8x256xf32> to vector<8x255xf32>
    %522 = vector.extract_strided_slice %478 {offsets = [0, 0], sizes = [8, 1], strides = [1, 1]} : vector<8x256xf32> to vector<8x1xf32>
    %523 = tpu.concatenate %521, %522 in 1 : vector<8x255xf32>, vector<8x1xf32> -> vector<8x256xf32>
    %c15_i32_180 = arith.constant 15 : i32
    %524 = vector.broadcast %c15_i32_180 : i32 to vector<1x256xi32>
    %525 = arith.cmpi slt, %2, %524 : vector<1x256xi32>
    %cst_181 = arith.constant 0.000000e+00 : f32
    %526 = vector.shape_cast %525 : vector<1x256xi1> to vector<1x256xi1>
    %527 = vector.broadcast %526 : vector<1x256xi1> to vector<8x256xi1>
    %528 = vector.broadcast %cst_181 : f32 to vector<8x256xf32>
    %529 = arith.select %527, %523, %528 : vector<8x256xi1>, vector<8x256xf32>
    %530 = vector.extract_strided_slice %478 {offsets = [0, 15], sizes = [8, 241], strides = [1, 1]} : vector<8x256xf32> to vector<8x241xf32>
    %531 = vector.extract_strided_slice %478 {offsets = [0, 0], sizes = [8, 15], strides = [1, 1]} : vector<8x256xf32> to vector<8x15xf32>
    %532 = tpu.concatenate %530, %531 in 1 : vector<8x241xf32>, vector<8x15xf32> -> vector<8x256xf32>
    %c15_i32_182 = arith.constant 15 : i32
    %533 = vector.broadcast %c15_i32_182 : i32 to vector<1x256xi32>
    %534 = arith.cmpi slt, %4, %533 : vector<1x256xi32>
    %c1_i32_183 = arith.constant 1 : i32
    %535 = vector.broadcast %c1_i32_183 : i32 to vector<1x256xi32>
    %536 = arith.cmpi sge, %2, %535 : vector<1x256xi32>
    %537 = arith.andi %534, %536 : vector<1x256xi1>
    %cst_184 = arith.constant 0.000000e+00 : f32
    %538 = vector.shape_cast %537 : vector<1x256xi1> to vector<1x256xi1>
    %539 = vector.broadcast %538 : vector<1x256xi1> to vector<8x256xi1>
    %540 = vector.broadcast %cst_184 : f32 to vector<8x256xf32>
    %541 = arith.select %539, %532, %540 : vector<8x256xi1>, vector<8x256xf32>
    %542 = vector.extract_strided_slice %478 {offsets = [0, 16], sizes = [8, 240], strides = [1, 1]} : vector<8x256xf32> to vector<8x240xf32>
    %543 = vector.extract_strided_slice %478 {offsets = [0, 0], sizes = [8, 16], strides = [1, 1]} : vector<8x256xf32> to vector<8x16xf32>
    %544 = tpu.concatenate %542, %543 in 1 : vector<8x240xf32>, vector<8x16xf32> -> vector<8x256xf32>
    %c15_i32_185 = arith.constant 15 : i32
    %545 = vector.broadcast %c15_i32_185 : i32 to vector<1x256xi32>
    %546 = arith.cmpi slt, %4, %545 : vector<1x256xi32>
    %cst_186 = arith.constant 0.000000e+00 : f32
    %547 = vector.shape_cast %546 : vector<1x256xi1> to vector<1x256xi1>
    %548 = vector.broadcast %547 : vector<1x256xi1> to vector<8x256xi1>
    %549 = vector.broadcast %cst_186 : f32 to vector<8x256xf32>
    %550 = arith.select %548, %544, %549 : vector<8x256xi1>, vector<8x256xf32>
    %551 = vector.extract_strided_slice %478 {offsets = [0, 17], sizes = [8, 239], strides = [1, 1]} : vector<8x256xf32> to vector<8x239xf32>
    %552 = vector.extract_strided_slice %478 {offsets = [0, 0], sizes = [8, 17], strides = [1, 1]} : vector<8x256xf32> to vector<8x17xf32>
    %553 = tpu.concatenate %551, %552 in 1 : vector<8x239xf32>, vector<8x17xf32> -> vector<8x256xf32>
    %c15_i32_187 = arith.constant 15 : i32
    %554 = vector.broadcast %c15_i32_187 : i32 to vector<1x256xi32>
    %555 = arith.cmpi slt, %4, %554 : vector<1x256xi32>
    %c15_i32_188 = arith.constant 15 : i32
    %556 = vector.broadcast %c15_i32_188 : i32 to vector<1x256xi32>
    %557 = arith.cmpi slt, %2, %556 : vector<1x256xi32>
    %558 = arith.andi %555, %557 : vector<1x256xi1>
    %cst_189 = arith.constant 0.000000e+00 : f32
    %559 = vector.shape_cast %558 : vector<1x256xi1> to vector<1x256xi1>
    %560 = vector.broadcast %559 : vector<1x256xi1> to vector<8x256xi1>
    %561 = vector.broadcast %cst_189 : f32 to vector<8x256xf32>
    %562 = arith.select %560, %553, %561 : vector<8x256xi1>, vector<8x256xf32>
    %cst_190 = arith.constant 1.000000e+00 : f32
    %563 = vector.broadcast %cst_190 : f32 to vector<1x256xf32>
    %564 = tpu.concatenate %490, %499, %511, %520, %478, %529, %541, %550, %562, %563 in 0 : vector<8x256xf32>, vector<8x256xf32>, vector<8x256xf32>, vector<8x256xf32>, vector<8x256xf32>, vector<8x256xf32>, vector<8x256xf32>, vector<8x256xf32>, vector<8x256xf32>, vector<1x256xf32> -> vector<73x256xf32>
    %c6 = arith.constant 6 : index
    %c0_191 = arith.constant 0 : index
    %c0_192 = arith.constant 0 : index
    %565 = vector.load %arg6[%c6, %c0_191, %c0_192] : memref<8x8x145xf32, #tpu.memory_space<vmem>>, vector<1x8x145xf32>
    %566 = vector.shape_cast %565 : vector<1x8x145xf32> to vector<8x145xf32>
    %567 = vector.extract_strided_slice %566 {offsets = [0, 0], sizes = [8, 73], strides = [1, 1]} : vector<8x145xf32> to vector<8x73xf32>
    %cst_193 = arith.constant dense<0.000000e+00> : vector<8x256xf32>
    %568 = tpu.matmul %567, %564, %cst_193 {dimension_numbers = #tpu.dot_dimension_numbers<[1], [0], [0], [1], [0, 0, 1, 1], [], []>} : vector<8x73xf32>, vector<73x256xf32>, vector<8x256xf32> -> vector<8x256xf32>
    %cst_194 = arith.constant 0.000000e+00 : f32
    %569 = vector.broadcast %cst_194 : f32 to vector<8x256xf32>
    %570 = arith.maximumf %568, %569 : vector<8x256xf32>
    %cst_195 = arith.constant 1.000000e+00 : f32
    %571 = vector.broadcast %cst_195 : f32 to vector<1x256xf32>
    %572 = tpu.concatenate %570, %571 in 0 : vector<8x256xf32>, vector<1x256xf32> -> vector<9x256xf32>
    %c7 = arith.constant 7 : index
    %c0_196 = arith.constant 0 : index
    %c0_197 = arith.constant 0 : index
    %573 = vector.load %arg6[%c7, %c0_196, %c0_197] : memref<8x8x145xf32, #tpu.memory_space<vmem>>, vector<1x8x145xf32>
    %574 = vector.shape_cast %573 : vector<1x8x145xf32> to vector<8x145xf32>
    %575 = vector.extract_strided_slice %574 {offsets = [0, 0], sizes = [1, 9], strides = [1, 1]} : vector<8x145xf32> to vector<1x9xf32>
    %cst_198 = arith.constant dense<0.000000e+00> : vector<1x256xf32>
    %576 = tpu.matmul %575, %572, %cst_198 {dimension_numbers = #tpu.dot_dimension_numbers<[1], [0], [0], [1], [0, 0, 1, 1], [], []>} : vector<1x9xf32>, vector<9x256xf32>, vector<1x256xf32> -> vector<1x256xf32>
    %c0_199 = arith.constant 0 : index
    %c0_200 = arith.constant 0 : index
    %c0_201 = arith.constant 0 : index
    %577 = vector.load %arg7[%c0_199, %c0_200, %c0_201] : memref<1x1x256xf32, #tpu.memory_space<vmem>>, vector<1x1x256xf32>
    %578 = vector.shape_cast %577 : vector<1x1x256xf32> to vector<1x256xf32>
    %579 = vector.shape_cast %576 : vector<1x256xf32> to vector<1x1x256xf32>
    tpu.vector_store %arg7[%c0_199, %c0_200, %c0_201], %579 {strides = array<i32>} : memref<1x1x256xf32, #tpu.memory_space<vmem>>, vector<1x1x256xf32>,
    return
  }
  func.func @transform_0(%arg0: i32) -> (i32, i32, i32) {
    %c0_i32 = arith.constant 0 : i32
    %c0_i32_0 = arith.constant 0 : i32
    %c0_i32_1 = arith.constant 0 : i32
    return %arg0, %c0_i32, %c0_i32_0 : i32, i32, i32
  }
  func.func @transform_1(%arg0: i32) -> (i32, i32, i32) {
    %c0_i32 = arith.constant 0 : i32
    %c0_i32_0 = arith.constant 0 : i32
    %c0_i32_1 = arith.constant 0 : i32
    return %arg0, %c0_i32, %c0_i32_0 : i32, i32, i32
  }
  func.func @transform_2(%arg0: i32) -> (i32, i32, i32, i32) {
    %c0_i32 = arith.constant 0 : i32
    %c0_i32_0 = arith.constant 0 : i32
    %c0_i32_1 = arith.constant 0 : i32
    %c0_i32_2 = arith.constant 0 : i32
    %c0_i32_3 = arith.constant 0 : i32
    return %c0_i32, %c0_i32_0, %c0_i32_1, %c0_i32_2 : i32, i32, i32, i32
  }
  func.func @transform_3(%arg0: i32) -> (i32, i32, i32) {
    %c0_i32 = arith.constant 0 : i32
    %c0_i32_0 = arith.constant 0 : i32
    %c0_i32_1 = arith.constant 0 : i32
    %c0_i32_2 = arith.constant 0 : i32
    return %c0_i32, %c0_i32_0, %c0_i32_1 : i32, i32, i32
  }
  func.func @transform_4(%arg0: i32) -> (i32, i32, i32) {
    %c0_i32 = arith.constant 0 : i32
    %c0_i32_0 = arith.constant 0 : i32
    %c0_i32_1 = arith.constant 0 : i32
    %c0_i32_2 = arith.constant 0 : i32
    return %c0_i32, %c0_i32_0, %c0_i32_1 : i32, i32, i32
  }
  func.func @transform_5(%arg0: i32) -> (i32, i32, i32) {
    %c0_i32 = arith.constant 0 : i32
    %c0_i32_0 = arith.constant 0 : i32
    %c0_i32_1 = arith.constant 0 : i32
    %c0_i32_2 = arith.constant 0 : i32
    return %c0_i32, %c0_i32_0, %c0_i32_1 : i32, i32, i32
  }
  func.func @transform_6(%arg0: i32) -> (i32, i32, i32) {
    %c0_i32 = arith.constant 0 : i32
    %c0_i32_0 = arith.constant 0 : i32
    %c0_i32_1 = arith.constant 0 : i32
    return %arg0, %c0_i32, %c0_i32_0 : i32, i32, i32
  }
  func.func @transform_7(%arg0: i32) -> (i32, i32, i32) {
    %c0_i32 = arith.constant 0 : i32
    %c0_i32_0 = arith.constant 0 : i32
    %c0_i32_1 = arith.constant 0 : i32
    return %arg0, %c0_i32, %c0_i32_0 : i32, i32, i32
  }
}

</mosaic_0001>

<bundles_post_ra>
// kernel: dautomap_dual_encoder_unet_forward.1
= control target key start
LH: loop header
LB: loop body
LE: loop exit
PB: predicated region body
PF: predicated region fallthrough
CT: control target
= control target key end

     0   :  { %s3787_s24 = smov 0   ;;  %s5389_s0 = inlined_call_operand.vmem [shape: f32[2,2,256], index: 0, kind: input, shape index: {}]   ;;  %s5390_s1 = inlined_call_operand.vmem [shape: f32[2,1,256], index: 1, kind: input, shape index: {}]   ;;  %s5391_s2 = inlined_call_operand.vmem [shape: f32[2,2,256,256], index: 2, kind: input, shape index: {}]   ;;  %s5392_s3 = inlined_call_operand.vmem [shape: f32[2,2,2], index: 3, kind: input, shape index: {}]   ;;  %s5393_s4 = inlined_call_operand.vmem [shape: f32[2,2,1], index: 4, kind: input, shape index: {}]   ;;  %s5394_s5 = inlined_call_operand.vmem [shape: f32[8,8,145], index: 5, kind: input, shape index: {}]   ;;  %s5395_s6 = inlined_call_operand.vmem [shape: f32[2,1,256], index: 6, kind: output, shape index: {0}]   ;;  %s5396_s7 = inlined_call_operand.vmem [shape: f32[2,1,256], index: 7, kind: output, shape index: {1}]  }
   0x1 LB: > { %s2720_s25 = sadd.s32 4294967295, %s3732_s24   ;;  %p2724_p0 = scmp.ge.s32.totalorder %s3732_s24, 1  ;;  %s3732_s24 = sphi %s3787_s24, %s18_s24  }
   0x2   : > { %p249_p1 = scmp.lt.s32.totalorder %s3732_s24, 3 }
   0x4   : > { %p250_p2 = pnand %p2724_p0, %p249_p1 }
   0x5   : > { %v2731_v0 = vld [vmem:[%s5391_s2 + $0x208] sm:$0xff] (!%p250_p2)  ;;  %v2733_v1 = vld [vmem:[%s5391_s2 + $0x218] sm:$0xff] (!%p250_p2)  ;;  %v2730_v5 = vld [vmem:[%s5391_s2 + $0x200] sm:$0xff] (!%p250_p2)  ;;  %p4001_p3 = scmp.lt.s32.totalorder (!%p250_p2), %s2720_s25, 1  ;;  %vm5397_vm0 = vcmask (!%p250_p2), 1040384   ;;  %vm5399_vm1 = vcmask (!%p250_p2), 1041408  }
   0x6   : > { %253 = sbr.rel (%p250_p2) target bundleno = 3227 (0xc9b), region = 44  ;;  %v314_v2 = vld [vmem:[%s5391_s2 + $0x8] sm:$0xff] (!%p250_p2)  ;;  %v3093_v3 = vpack.c.bf16 (!%p250_p2), %v2733_v1, %v2731_v0  ;;  %v316_v4 = vld [vmem:[%s5391_s2 + $0x18] sm:$0xff] (!%p250_p2)  ;;  %v2732_v6 = vld [vmem:[%s5391_s2 + $0x210] sm:$0xff] (!%p250_p2)  ;;  %vm621_vm2 = vcmask (!%p250_p2), 15360   ;;  %s3736_s30 = smov (!%p250_p2), 15  }
   0x7   : > { %v3029_v7 = vpack.c.bf16 (!%p250_p2), %v316_v4, %v314_v2  ;;  %v3095_v8 = vpack.c.bf16 (!%p250_p2), %v2732_v6, %v2730_v5  ;;  %v313_v9 = vld [vmem:[%s5391_s2] sm:$0xff] (!%p250_p2)  ;;  %v315_v10 = vld [vmem:[%s5391_s2 + $0x10] sm:$0xff] (!%p250_p2)  ;;  %v2735_v11 = vld [vmem:[%s5391_s2 + $0x228] sm:$0xff] (!%p250_p2)  ;;  %s3738_s9 = smov (!%p250_p2), 17   ;;  %s3740_s10 = smov (!%p250_p2), 112   ;;  %vm5400_vm4 = vcmask (!%p250_p2), 121856  }
   0x8   : > { %3094 = vmatprep.subr.bf16.mxu1 (!%p250_p2), %v3093_v3  ;;  %v3031_v12 = vpack.c.bf16 (!%p250_p2), %v315_v10, %v313_v9  ;;  %v2737_v13 = vld [vmem:[%s5391_s2 + $0x238] sm:$0xff] (!%p250_p2)  ;;  %v318_v14 = vld [vmem:[%s5391_s2 + $0x28] sm:$0xff] (!%p250_p2)  ;;  %v2734_v18 = vld [vmem:[%s5391_s2 + $0x220] sm:$0xff] (!%p250_p2)  ;;  %s3741_s12 = smov (!%p250_p2), 113   ;;  %s3742_s14 = smov (!%p250_p2), 111   ;;  %vm5398_vm5 = vcmask (!%p250_p2), 130048  }
   0x9   : > { %v320_v15 = vld [vmem:[%s5391_s2 + $0x38] sm:$0xff] (!%p250_p2)  ;;  %3030 = vmatprep.subr.bf16.mxu0 (!%p250_p2), %v3029_v7  ;;  %3096 = vmatpush1.bf16.msra.mxu1 (!%p250_p2), %v3095_v8  ;;  %v3097_v16 = vpack.c.bf16 (!%p250_p2), %v2737_v13, %v2735_v11  ;;  %v2736_v19 = vld [vmem:[%s5391_s2 + $0x230] sm:$0xff] (!%p250_p2)  ;;  %v317_v20 = vld [vmem:[%s5391_s2 + $0x20] sm:$0xff] (!%p250_p2)  ;;  %s3743_s15 = smov (!%p250_p2), 1   ;;  %vm5404_vm9 = vcmask (!%p250_p2), 138240   ;;  %vm5401_vm12 = vcmask (!%p250_p2), 1039360  }
   0xa   : > { %v3033_v17 = vpack.c.bf16 (!%p250_p2), %v320_v15, %v318_v14  ;;  %3032 = vmatpush1.bf16.msra.mxu0 (!%p250_p2), %v3031_v12  ;;  %v3099_v21 = vpack.c.bf16 (!%p250_p2), %v2736_v19, %v2734_v18  ;;  %v319_v22 = vld [vmem:[%s5391_s2 + $0x30] sm:$0xff] (!%p250_p2)  ;;  %v2739_v23 = vld [vmem:[%s5391_s2 + $0x248] sm:$0xff] (!%p250_p2)  ;;  %v2741_v24 = vld [vmem:[%s5391_s2 + $0x258] sm:$0xff] (!%p250_p2) }
   0xb   : > { %3098 = vmatprep.subr.bf16.mxu1 (!%p250_p2), %v3097_v16  ;;  %v3035_v25 = vpack.c.bf16 (!%p250_p2), %v319_v22, %v317_v20  ;;  %v3101_v26 = vpack.c.bf16 (!%p250_p2), %v2741_v24, %v2739_v23  ;;  %v322_v27 = vld [vmem:[%s5391_s2 + $0x48] sm:$0xff] (!%p250_p2)  ;;  %v324_v28 = vld [vmem:[%s5391_s2 + $0x58] sm:$0xff] (!%p250_p2)  ;;  %v2738_v29 = vld [vmem:[%s5391_s2 + $0x240] sm:$0xff] (!%p250_p2) }
   0xc   : > { %3034 = vmatprep.subr.bf16.mxu0 (!%p250_p2), %v3033_v17  ;;  %v3037_v30 = vpack.c.bf16 (!%p250_p2), %v324_v28, %v322_v27  ;;  %v2740_v31 = vld [vmem:[%s5391_s2 + $0x250] sm:$0xff] (!%p250_p2)  ;;  %v321_v32 = vld [vmem:[%s5391_s2 + $0x40] sm:$0xff] (!%p250_p2)  ;;  %v2743_v35 = vld [vmem:[%s5391_s2 + $0x268] sm:$0xff] (!%p250_p2) }
   0xd   : > { %v323_v33 = vld [vmem:[%s5391_s2 + $0x50] sm:$0xff]  ;;  %3100 = vmatpush1.bf16.msra.mxu1 %v3099_v21  ;;  %v3103_v34 = vpack.c.bf16 %v2740_v31, %v2738_v29  ;;  %v2745_v36 = vld [vmem:[%s5391_s2 + $0x278] sm:$0xff]  ;;  %v326_v37 = vld [vmem:[%s5391_s2 + $0x68] sm:$0xff]  ;;  %s5716_s25 = smov (!%p4001_p3, %s2720_s25), 1 }
   0xe   : > { %3036 = vmatpush1.bf16.msra.mxu0 %v3035_v25  ;;  %3102 = vmatprep.subr.bf16.mxu1 %v3101_v26  ;;  %v3039_v38 = vpack.c.bf16 %v323_v33, %v321_v32  ;;  %v3105_v39 = vpack.c.bf16 %v2745_v36, %v2743_v35  ;;  %v328_v40 = vld [vmem:[%s5391_s2 + $0x78] sm:$0xff]  ;;  %v2742_v41 = vld [vmem:[%s5391_s2 + $0x260] sm:$0xff]  ;;  %v2744_v42 = vld [vmem:[%s5391_s2 + $0x270] sm:$0xff]  ;;  %s3028_s27 = sshll.u32 %s5716_s25, 2  ;;  %s4073_s11 = sshll.u32 %s5716_s25, 1 }
   0xf   : > { %3038 = vmatprep.subr.bf16.mxu0 %v3037_v30  ;;  %v3041_v43 = vpack.c.bf16 %v328_v40, %v326_v37  ;;  %v325_v44 = vld [vmem:[%s5391_s2 + $0x60] sm:$0xff]  ;;  %v327_v45 = vld [vmem:[%s5391_s2 + $0x70] sm:$0xff]  ;;  %v2747_v46 = vld [vmem:[%s5391_s2 + $0x288] sm:$0xff]  ;;  %v3107_v50 = vpack.c.bf16 %v2744_v42, %v2742_v41  ;;  %s292_s23 = scalar_lea.vmem %s5389_s0, %s3028_s27  ;;  %s296_s8 = scalar_lea.vmem %s5390_s1, %s4073_s11 }
  0x10   : > { %v2749_v47 = vld [vmem:[%s5391_s2 + $0x298] sm:$0xff]  ;;  %v330_v48 = vld [vmem:[%s5391_s2 + $0x88] sm:$0xff]  ;;  %v3043_v51 = vpack.c.bf16 %v327_v45, %v325_v44  ;;  %v2746_v53 = vld [vmem:[%s5391_s2 + $0x280] sm:$0xff]  ;;  %s3739_s27 = smov 127   ;;  %s304_s22 = scalar_lea.vmem %s5396_s7, %s4073_s11 }
  0x11   : > { %v332_v49 = vld [vmem:[%s5391_s2 + $0x98] sm:$0xff]  ;;  %3104 = vmatpush1.bf16.msra.mxu1 %v3103_v34  ;;  %v3109_v52 = vpack.c.bf16 %v2749_v47, %v2747_v46  ;;  %v2748_v54 = vld [vmem:[%s5391_s2 + $0x290] sm:$0xff]  ;;  %v329_v55 = vld [vmem:[%s5391_s2 + $0x80] sm:$0xff]  ;;  %v305_v46 = vlaneseq }
  0x12   : > { %3040 = vmatpush1.bf16.msra.mxu0 %v3039_v38  ;;  %3106 = vmatprep.subr.bf16.mxu1 %v3105_v39  ;;  %v3045_v56 = vpack.c.bf16 %v332_v49, %v330_v48  ;;  %v331_v57 = vld [vmem:[%s5391_s2 + $0x90] sm:$0xff]  ;;  %v2751_v58 = vld [vmem:[%s5391_s2 + $0x2a8] sm:$0xff]  ;;  %v2753_v59 = vld [vmem:[%s5391_s2 + $0x2b8] sm:$0xff]  ;;  %v3111_v62 = vpack.c.bf16 %v2748_v54, %v2746_v53 }
  0x13   : > { %3042 = vmatprep.subr.bf16.mxu0 %v3041_v43  ;;  %v334_v60 = vld [vmem:[%s5391_s2 + $0xa8] sm:$0xff]  ;;  %v336_v61 = vld [vmem:[%s5391_s2 + $0xb8] sm:$0xff]  ;;  %v3047_v63 = vpack.c.bf16 %v331_v57, %v329_v55  ;;  %v3113_v0 = vpack.c.bf16 %v2753_v59, %v2751_v58  ;;  %v2750_v1 = vld [vmem:[%s5391_s2 + $0x2a0] sm:$0xff]  ;;  %v4060_v59 = vshrl.u32 %v305_v46, 7 }
  0x14   : > { %v2752_v2 = vld [vmem:[%s5391_s2 + $0x2b0] sm:$0xff]  ;;  %v333_v3 = vld [vmem:[%s5391_s2 + $0xa0] sm:$0xff]  ;;  %v3049_v4 = vpack.c.bf16 %v336_v61, %v334_v60  ;;  %v2755_v6 = vld [vmem:[%s5391_s2 + $0x2c8] sm:$0xff] }
  0x15   : > { %3108 = vmatpush1.bf16.msra.mxu1 %v3107_v50  ;;  %v335_v5 = vld [vmem:[%s5391_s2 + $0xb0] sm:$0xff]  ;;  %v2757_v7 = vld [vmem:[%s5391_s2 + $0x2d8] sm:$0xff]  ;;  %v338_v8 = vld [vmem:[%s5391_s2 + $0xc8] sm:$0xff]  ;;  %v3115_v10 = vpack.c.bf16 %v2752_v2, %v2750_v1 }
  0x16   : > { %3044 = vmatpush1.bf16.msra.mxu0 %v3043_v51  ;;  %3110 = vmatprep.subr.bf16.mxu1 %v3109_v52  ;;  %v340_v9 = vld [vmem:[%s5391_s2 + $0xd8] sm:$0xff]  ;;  %v3051_v11 = vpack.c.bf16 %v335_v5, %v333_v3  ;;  %v3117_v12 = vpack.c.bf16 %v2757_v7, %v2755_v6  ;;  %v2754_v13 = vld [vmem:[%s5391_s2 + $0x2c0] sm:$0xff]  ;;  %v2756_v14 = vld [vmem:[%s5391_s2 + $0x2d0] sm:$0xff] }
  0x17   : > { %3046 = vmatprep.subr.bf16.mxu0 %v3045_v56  ;;  %v337_v15 = vld [vmem:[%s5391_s2 + $0xc0] sm:$0xff]  ;;  %v3053_v16 = vpack.c.bf16 %v340_v9, %v338_v8  ;;  %v339_v17 = vld [vmem:[%s5391_s2 + $0xd0] sm:$0xff]  ;;  %v2759_v18 = vld [vmem:[%s5391_s2 + $0x2e8] sm:$0xff]  ;;  %v3119_v22 = vpack.c.bf16 %v2756_v14, %v2754_v13  ;;  %v530_v8 = vsub.s32 3, %v4060_v59  ;;  %v384_v9 = vsub.s32 2, %v4060_v59 }
  0x18   : > { %v2761_v19 = vld [vmem:[%s5391_s2 + $0x2f8] sm:$0xff]  ;;  %v342_v20 = vld [vmem:[%s5391_s2 + $0xe8] sm:$0xff]  ;;  %v3055_v23 = vpack.c.bf16 %v339_v17, %v337_v15  ;;  %v2758_v25 = vld [vmem:[%s5391_s2 + $0x2e0] sm:$0xff] }
  0x19   : > { %3112 = vmatpush1.bf16.msra.mxu1 %v3111_v62  ;;  %v344_v21 = vld [vmem:[%s5391_s2 + $0xf8] sm:$0xff]  ;;  %v3121_v24 = vpack.c.bf16 %v2761_v19, %v2759_v18  ;;  %v2760_v26 = vld [vmem:[%s5391_s2 + $0x2f0] sm:$0xff]  ;;  %v341_v27 = vld [vmem:[%s5391_s2 + $0xe0] sm:$0xff] }
  0x1a   : > { %3048 = vmatpush1.bf16.msra.mxu0 %v3047_v63  ;;  %3114 = vmatprep.subr.bf16.mxu1 %v3113_v0  ;;  %v3057_v28 = vpack.c.bf16 %v344_v21, %v342_v20  ;;  %v343_v29 = vld [vmem:[%s5391_s2 + $0xf0] sm:$0xff]  ;;  %v2763_v30 = vld [vmem:[%s5391_s2 + $0x308] sm:$0xff]  ;;  %v2765_v31 = vld [vmem:[%s5391_s2 + $0x318] sm:$0xff]  ;;  %v3123_v34 = vpack.c.bf16 %v2760_v26, %v2758_v25  ;;  %v526_v21 = vsub.s32 1, %v4060_v59 }
  0x1b   : > { %3050 = vmatprep.subr.bf16.mxu0 %v3049_v4  ;;  %v346_v32 = vld [vmem:[%s5391_s2 + $0x108] sm:$0xff]  ;;  %v348_v33 = vld [vmem:[%s5391_s2 + $0x118] sm:$0xff]  ;;  %v3059_v35 = vpack.c.bf16 %v343_v29, %v341_v27  ;;  %v3125_v36 = vpack.c.bf16 %v2765_v31, %v2763_v30  ;;  %v2762_v37 = vld [vmem:[%s5391_s2 + $0x300] sm:$0xff] }
  0x1c   : > { %v2764_v38 = vld [vmem:[%s5391_s2 + $0x310] sm:$0xff]  ;;  %v345_v39 = vld [vmem:[%s5391_s2 + $0x100] sm:$0xff]  ;;  %v3061_v40 = vpack.c.bf16 %v348_v33, %v346_v32  ;;  %v2767_v42 = vld [vmem:[%s5391_s2 + $0x328] sm:$0xff] }
  0x1d   : > { %3116 = vmatpush1.bf16.msra.mxu1 %v3115_v10  ;;  %v347_v41 = vld [vmem:[%s5391_s2 + $0x110] sm:$0xff]  ;;  %v2769_v43 = vld [vmem:[%s5391_s2 + $0x338] sm:$0xff]  ;;  %v350_v44 = vld [vmem:[%s5391_s2 + $0x128] sm:$0xff]  ;;  %v3127_v47 = vpack.c.bf16 %v2764_v38, %v2762_v37 }
  0x1e   : > { %3052 = vmatpush1.bf16.msra.mxu0 %v3051_v11  ;;  %3118 = vmatprep.subr.bf16.mxu1 %v3117_v12  ;;  %v352_v45 = vld [vmem:[%s5391_s2 + $0x138] sm:$0xff]  ;;  %v3063_v48 = vpack.c.bf16 %v347_v41, %v345_v39  ;;  %v3129_v49 = vpack.c.bf16 %v2769_v43, %v2767_v42  ;;  %v2766_v50 = vld [vmem:[%s5391_s2 + $0x320] sm:$0xff]  ;;  %v2768_v51 = vld [vmem:[%s5391_s2 + $0x330] sm:$0xff] }
  0x1f   : > { %3054 = vmatprep.subr.bf16.mxu0 %v3053_v16  ;;  %v349_v52 = vld [vmem:[%s5391_s2 + $0x120] sm:$0xff]  ;;  %v3065_v53 = vpack.c.bf16 %v352_v45, %v350_v44  ;;  %v351_v54 = vld [vmem:[%s5391_s2 + $0x130] sm:$0xff]  ;;  %v2771_v55 = vld [vmem:[%s5391_s2 + $0x348] sm:$0xff]  ;;  %v3131_v60 = vpack.c.bf16 %v2768_v51, %v2766_v50 }
  0x20   : > { %v2773_v56 = vld [vmem:[%s5391_s2 + $0x358] sm:$0xff]  ;;  %v354_v57 = vld [vmem:[%s5391_s2 + $0x148] sm:$0xff]  ;;  %v3067_v61 = vpack.c.bf16 %v351_v54, %v349_v52  ;;  %v2770_v63 = vld [vmem:[%s5391_s2 + $0x340] sm:$0xff] }
  0x21   : > { %3120 = vmatpush1.bf16.msra.mxu1 %v3119_v22  ;;  %v356_v58 = vld [vmem:[%s5391_s2 + $0x158] sm:$0xff]  ;;  %v3133_v62 = vpack.c.bf16 %v2773_v56, %v2771_v55  ;;  %v2772_v0 = vld [vmem:[%s5391_s2 + $0x350] sm:$0xff]  ;;  %v353_v1 = vld [vmem:[%s5391_s2 + $0x140] sm:$0xff]  ;;  %v380_v22 = vsub.s32 0, %v4060_v59 }
  0x22   : > { %3056 = vmatpush1.bf16.msra.mxu0 %v3055_v23  ;;  %3122 = vmatprep.subr.bf16.mxu1 %v3121_v24  ;;  %v3069_v2 = vpack.c.bf16 %v356_v58, %v354_v57  ;;  %v355_v3 = vld [vmem:[%s5391_s2 + $0x150] sm:$0xff]  ;;  %v2775_v4 = vld [vmem:[%s5391_s2 + $0x368] sm:$0xff]  ;;  %v2777_v5 = vld [vmem:[%s5391_s2 + $0x378] sm:$0xff]  ;;  %v3135_v10 = vpack.c.bf16 %v2772_v0, %v2770_v63 }
  0x23   : > { %3058 = vmatprep.subr.bf16.mxu0 %v3057_v28  ;;  %v358_v6 = vld [vmem:[%s5391_s2 + $0x168] sm:$0xff]  ;;  %v360_v7 = vld [vmem:[%s5391_s2 + $0x178] sm:$0xff]  ;;  %v2774_v11 = vld [vmem:[%s5391_s2 + $0x360] sm:$0xff]  ;;  %v3071_v12 = vpack.c.bf16 %v355_v3, %v353_v1  ;;  %v3137_v13 = vpack.c.bf16 %v2777_v5, %v2775_v4 }
  0x24   : > { %v2776_v14 = vld [vmem:[%s5391_s2 + $0x370] sm:$0xff]  ;;  %v357_v15 = vld [vmem:[%s5391_s2 + $0x160] sm:$0xff]  ;;  %v3073_v17 = vpack.c.bf16 %v360_v7, %v358_v6  ;;  %v2779_v18 = vld [vmem:[%s5391_s2 + $0x388] sm:$0xff] }
  0x25   : > { %3124 = vmatpush1.bf16.msra.mxu1 %v3123_v34  ;;  %v359_v16 = vld [vmem:[%s5391_s2 + $0x170] sm:$0xff]  ;;  %v2781_v19 = vld [vmem:[%s5391_s2 + $0x398] sm:$0xff]  ;;  %v4117_v20 = vld [vmem:[%s292_s23] sm:$0xf]  ;;  %v3139_v28 = vpack.c.bf16 %v2776_v14, %v2774_v11 }
  0x26   : > { %3060 = vmatpush1.bf16.msra.mxu0 %v3059_v35  ;;  %3126 = vmatprep.subr.bf16.mxu1 %v3125_v36  ;;  %v362_v23 = vld [vmem:[%s5391_s2 + $0x188] sm:$0xff]  ;;  %v364_v24 = vld [vmem:[%s5391_s2 + $0x198] sm:$0xff]  ;;  %v531_v25 = vrot.slane %v4117_v20, %v530_v8  ;;  %v385_v26 = vrot.slane %v4117_v20, %v384_v9  ;;  %v1635_v27 = vld [vmem:[%s296_s8] sm:$0x3]  ;;  %v3075_v31 = vpack.c.bf16 %v359_v16, %v357_v15  ;;  %v3734_v16 = vmov 0.0   ;;  %s3737_s8 = smov 16  }
  0x27   : > { %3062 = vmatprep.subr.bf16.mxu0 %v3061_v40  ;;  %v4131_v29 = vrot.slane %v1635_v27, %v526_v21  ;;  %v4135_v30 = vrot.slane %v1635_v27, %v380_v22  ;;  %v3141_v32 = vpack.c.bf16 %v2781_v19, %v2779_v18  ;;  %v2778_v33 = vld [vmem:[%s5391_s2 + $0x380] sm:$0xff]  ;;  %v2780_v34 = vld [vmem:[%s5391_s2 + $0x390] sm:$0xff]  ;;  %v3077_v36 = vpack.c.bf16 %v364_v24, %v362_v23  ;;  %v2783_v38 = vld [vmem:[%s5391_s2 + $0x3a8] sm:$0xff] }
  0x28   : > { %v361_v35 = vld [vmem:[%s5391_s2 + $0x180] sm:$0xff]  ;;  %v363_v37 = vld [vmem:[%s5391_s2 + $0x190] sm:$0xff]  ;;  %v2785_v39 = vld [vmem:[%s5391_s2 + $0x3b8] sm:$0xff]  ;;  %598 = vmatprep.mubr.f32.mxu1 %v531_v25  ;;  %452 = vmatprep.mubr.f32.mxu0 %v385_v26  ;;  %v3143_v42 = vpack.c.bf16 %v2780_v34, %v2778_v33  ;;  %v527_v14 = vrot.slane %v4117_v20, %v526_v21  ;;  %v381_v15 = vrot.slane %v4117_v20, %v380_v22  ;;  %v3735_v19 = vmov 0  }
  0x29   : > { %3128 = vmatpush1.bf16.msra.mxu1 %v3127_v47  ;;  %v366_v40 = vld [vmem:[%s5391_s2 + $0x1a8] sm:$0xff]  ;;  %v368_v41 = vld [vmem:[%s5391_s2 + $0x1b8] sm:$0xff]  ;;  %v3079_v43 = vpack.c.bf16 %v363_v37, %v361_v35  ;;  %v3145_v44 = vpack.c.bf16 %v2785_v39, %v2783_v38  ;;  %v2782_v45 = vld [vmem:[%s5391_s2 + $0x3a0] sm:$0xff]  ;;  %3446 = vset.pattern.permute.xlu0 %v3735_v19 }
  0x2a   : > { %3064 = vmatpush1.bf16.msra.mxu0 %v3063_v48  ;;  %3130 = vmatprep.subr.bf16.mxu1 %v3129_v49  ;;  %v2784_v47 = vld [vmem:[%s5391_s2 + $0x3b0] sm:$0xff]  ;;  %v365_v48 = vld [vmem:[%s5391_s2 + $0x1a0] sm:$0xff]  ;;  %v3081_v49 = vpack.c.bf16 %v368_v41, %v366_v40  ;;  %v2787_v51 = vld [vmem:[%s5391_s2 + $0x3c8] sm:$0xff] }
  0x2b   : > { %3066 = vmatprep.subr.bf16.mxu0 %v3065_v53  ;;  %v367_v50 = vld [vmem:[%s5391_s2 + $0x1b0] sm:$0xff]  ;;  %v2789_v52 = vld [vmem:[%s5391_s2 + $0x3d8] sm:$0xff]  ;;  %v370_v53 = vld [vmem:[%s5391_s2 + $0x1c8] sm:$0xff]  ;;  %v3147_v55 = vpack.c.bf16 %v2784_v47, %v2782_v45 }
  0x2c   : > { %v372_v54 = vld [vmem:[%s5391_s2 + $0x1d8] sm:$0xff]  ;;  %v3083_v56 = vpack.c.bf16 %v367_v50, %v365_v48  ;;  %v3149_v57 = vpack.c.bf16 %v2789_v52, %v2787_v51  ;;  %v2786_v58 = vld [vmem:[%s5391_s2 + $0x3c0] sm:$0xff]  ;;  %v371_v63 = vld [vmem:[%s5391_s2 + $0x1d0] sm:$0xff] }
  0x2d   : > { %3132 = vmatpush1.bf16.msra.mxu1 %v3131_v60  ;;  %v2788_v60 = vld [vmem:[%s5391_s2 + $0x3d0] sm:$0xff]  ;;  %v2791_v0 = vld [vmem:[%s5391_s2 + $0x3e8] sm:$0xff]  ;;  %v2793_v1 = vld [vmem:[%s5391_s2 + $0x3f8] sm:$0xff] }
  0x2e   : > { %3068 = vmatpush1.bf16.msra.mxu0 %v3067_v61  ;;  %3134 = vmatprep.subr.bf16.mxu1 %v3133_v62  ;;  %v369_v61 = vld [vmem:[%s5391_s2 + $0x1c0] sm:$0xff]  ;;  %v3085_v62 = vpack.c.bf16 %v372_v54, %v370_v53  ;;  %v376_v3 = vld [vmem:[%s5391_s2 + $0x1f8] sm:$0xff]  ;;  %v3151_v4 = vpack.c.bf16 %v2788_v60, %v2786_v58  ;;  %v3153_v6 = vpack.c.bf16 %v2793_v1, %v2791_v0  ;;  %v2792_v8 = vld [vmem:[%s5391_s2 + $0x3f0] sm:$0xff] }
  0x2f   : > { %3070 = vmatprep.subr.bf16.mxu0 %v3069_v2  ;;  %v374_v2 = vld [vmem:[%s5391_s2 + $0x1e8] sm:$0xff]  ;;  %v3087_v5 = vpack.c.bf16 %v371_v63, %v369_v61  ;;  %v2790_v7 = vld [vmem:[%s5391_s2 + $0x3e0] sm:$0xff]  ;;  %v375_v11 = vld [vmem:[%s5391_s2 + $0x1f0] sm:$0xff] }
  0x30   : > { %v3089_v9 = vpack.c.bf16 %v376_v3, %v374_v2  ;;  %v2798_v18 = vld [vmem:[%s5391_s2 + $0x408] sm:$0xff]  ;;  %v2800_v20 = vld [vmem:[%s5391_s2 + $0x418] sm:$0xff]  ;;  %v2797_v21 = vld [vmem:[%s5391_s2 + $0x400] sm:$0xff] }
  0x31   : > { %3136 = vmatpush1.bf16.msra.mxu1 %v3135_v10  ;;  %v373_v10 = vld [vmem:[%s5391_s2 + $0x1e0] sm:$0xff]  ;;  %v2799_v22 = vld [vmem:[%s5391_s2 + $0x410] sm:$0xff]  ;;  %v3157_v23 = vpack.c.bf16 %v2800_v20, %v2798_v18  ;;  %v2802_v26 = vld [vmem:[%s5391_s2 + $0x428] sm:$0xff] }
  0x32   : > { %3072 = vmatpush1.bf16.msra.mxu0 %v3071_v12  ;;  %3138 = vmatprep.subr.bf16.mxu1 %v3137_v13  ;;  %v3155_v12 = vpack.c.bf16 %v2792_v8, %v2790_v7  ;;  %v3091_v13 = vpack.c.bf16 %v375_v11, %v373_v10  ;;  %v3159_v24 = vpack.c.bf16 %v2799_v22, %v2797_v21  ;;  %v2926_v25 = vld [vmem:[%s5393_s4 + $0x2] sm:$0x3]  ;;  %v2804_v27 = vld [vmem:[%s5391_s2 + $0x438] sm:$0xff]  ;;  %v2806_v34 = vld [vmem:[%s5391_s2 + $0x448] sm:$0xff] }
  0x33   : > { %3074 = vmatprep.subr.bf16.mxu0 %v3073_v17  ;;  %v615_v17 = vld [vmem:[%s5393_s4] sm:$0x3]  ;;  %v2808_v35 = vld [vmem:[%s5391_s2 + $0x458] sm:$0xff]  ;;  %v2807_v38 = vld [vmem:[%s5391_s2 + $0x450] sm:$0xff] }
  0x34   : > { %618 = vperm.xlu0 %3446, %v615_v17   ;;  %v3165_v37 = vpack.c.bf16 %v2808_v35, %v2806_v34  ;;  %v2810_v40 = vld [vmem:[%s5391_s2 + $0x468] sm:$0xff]  ;;  %v2812_v41 = vld [vmem:[%s5391_s2 + $0x478] sm:$0xff]  ;;  %v2813_v50 = vld [vmem:[%s5391_s2 + $0x480] sm:$0xff] }
  0x35   : > { %3140 = vmatpush1.bf16.msra.mxu1 %v3139_v28  ;;  %v3161_v28 = vpack.c.bf16 %v2804_v27, %v2802_v26  ;;  %v2814_v47 = vld [vmem:[%s5391_s2 + $0x488] sm:$0xff]  ;;  %v2816_v48 = vld [vmem:[%s5391_s2 + $0x498] sm:$0xff]  ;;  %v2815_v51 = vld [vmem:[%s5391_s2 + $0x490] sm:$0xff] }
  0x36   : > { %3076 = vmatpush1.bf16.msra.mxu0 %v3075_v31  ;;  %3142 = vmatprep.subr.bf16.mxu1 %v3141_v32  ;;  %v2801_v31 = vld [vmem:[%s5391_s2 + $0x420] sm:$0xff]  ;;  %v2803_v32 = vld [vmem:[%s5391_s2 + $0x430] sm:$0xff]  ;;  %v3175_v52 = vpack.c.bf16 %v2815_v51, %v2813_v50  ;;  %v2818_v53 = vld [vmem:[%s5391_s2 + $0x4a8] sm:$0xff] }
  0x37   : > { %3078 = vmatprep.subr.bf16.mxu0 %v3077_v36  ;;  %v3163_v33 = vpack.c.bf16 %v2803_v32, %v2801_v31  ;;  %v2805_v36 = vld [vmem:[%s5391_s2 + $0x440] sm:$0xff]  ;;  %v2820_v54 = vld [vmem:[%s5391_s2 + $0x4b8] sm:$0xff]  ;;  %v2822_v60 = vld [vmem:[%s5391_s2 + $0x4c8] sm:$0xff] }
  0x38   : > { %997 = vperm.xlu0 %3446, %v2926_v25   ;;  %v3167_v39 = vpack.c.bf16 %v2807_v38, %v2805_v36  ;;  %v2824_v61 = vld [vmem:[%s5391_s2 + $0x4d8] sm:$0xff]  ;;  %v2821_v63 = vld [vmem:[%s5391_s2 + $0x4c0] sm:$0xff]  ;;  %v2823_v0 = vld [vmem:[%s5391_s2 + $0x4d0] sm:$0xff] }
  0x39   : > { %3144 = vmatpush1.bf16.msra.mxu1 %v3143_v42  ;;  %v3169_v42 = vpack.c.bf16 %v2812_v41, %v2810_v40  ;;  %v3183_v1 = vpack.c.bf16 %v2823_v0, %v2821_v63  ;;  %v2826_v2 = vld [vmem:[%s5391_s2 + $0x4e8] sm:$0xff]  ;;  %v2828_v3 = vld [vmem:[%s5391_s2 + $0x4f8] sm:$0xff]  ;;  %v2829_v11 = vld [vmem:[%s5391_s2 + $0x500] sm:$0xff] }
  0x3a   : > { %3080 = vmatpush1.bf16.msra.mxu0 %v3079_v43  ;;  %3146 = vmatprep.subr.bf16.mxu1 %v3145_v44  ;;  %v2809_v43 = vld [vmem:[%s5391_s2 + $0x460] sm:$0xff]  ;;  %v2811_v44 = vld [vmem:[%s5391_s2 + $0x470] sm:$0xff]  ;;  %v2830_v8 = vld [vmem:[%s5391_s2 + $0x508] sm:$0xff] }
  0x3b   : > { %3082 = vmatprep.subr.bf16.mxu0 %v3081_v49  ;;  %v3171_v45 = vpack.c.bf16 %v2811_v44, %v2809_v43  ;;  %v3173_v49 = vpack.c.bf16 %v2816_v48, %v2814_v47  ;;  %v2833_v18 = vld [vmem:[%s5391_s2 + $0x520] sm:$0xff]  ;;  %v2835_v19 = vld [vmem:[%s5391_s2 + $0x530] sm:$0xff]  ;;  %v2838_v21 = vld [vmem:[%s5391_s2 + $0x548] sm:$0xff] }
  0x3c   : > { %v3195_v20 = vpack.c.bf16 %v2835_v19, %v2833_v18  ;;  %v2840_v22 = vld [vmem:[%s5391_s2 + $0x558] sm:$0xff]  ;;  %v2839_v25 = vld [vmem:[%s5391_s2 + $0x550] sm:$0xff]  ;;  %v2842_v27 = vld [vmem:[%s5391_s2 + $0x568] sm:$0xff] }
  0x3d   : > { %3148 = vmatpush1.bf16.msra.mxu1 %v3147_v55  ;;  %v3177_v55 = vpack.c.bf16 %v2820_v54, %v2818_v53  ;;  %v2841_v32 = vld [vmem:[%s5391_s2 + $0x560] sm:$0xff]  ;;  %v2862_v36 = vld [vmem:[%s5391_s2 + $0x608] sm:$0xff]  ;;  %v2868_v47 = vld [vmem:[%s5391_s2 + $0x638] sm:$0xff] }
  0x3e   : > { %3084 = vmatpush1.bf16.msra.mxu0 %v3083_v56  ;;  %3150 = vmatprep.subr.bf16.mxu1 %v3149_v57  ;;  %v2817_v56 = vld [vmem:[%s5391_s2 + $0x4a0] sm:$0xff]  ;;  %v2819_v57 = vld [vmem:[%s5391_s2 + $0x4b0] sm:$0xff]  ;;  %v2874_v63 = vld [vmem:[%s5391_s2 + $0x668] sm:$0xff] }
  0x3f   : > { %3086 = vmatprep.subr.bf16.mxu0 %v3085_v62  ;;  %v3179_v58 = vpack.c.bf16 %v2819_v57, %v2817_v56  ;;  %v3181_v62 = vpack.c.bf16 %v2824_v61, %v2822_v60  ;;  %v2861_v41 = vld [vmem:[%s5391_s2 + $0x600] sm:$0xff]  ;;  %v2870_v56 = vld [vmem:[%s5391_s2 + $0x648] sm:$0xff]  ;;  %v2872_v57 = vld [vmem:[%s5391_s2 + $0x658] sm:$0xff] }
  0x40   : > { %v614_v51 = vld [vmem:[%s5392_s3] sm:$0x3]  ;;  %v3229_v60 = vpack.c.bf16 %v2872_v57, %v2870_v56  ;;  %v2876_v0 = vld [vmem:[%s5391_s2 + $0x678] sm:$0xff]  ;;  %v2886_v18 = vld [vmem:[%s5391_s2 + $0x6c8] sm:$0xff] }
  0x41   : > { %3152 = vmatpush1.bf16.msra.mxu1 %v3151_v4  ;;  %v3185_v4 = vpack.c.bf16 %v2828_v3, %v2826_v2  ;;  %v2865_v54 = vld [vmem:[%s5391_s2 + $0x620] sm:$0xff]  ;;  %v3233_v2 = vpack.c.bf16 %v2876_v0, %v2874_v63  ;;  %v2888_v19 = vld [vmem:[%s5391_s2 + $0x6d8] sm:$0xff]  ;;  %v2907_v56 = vld [vmem:[%s5391_s2 + $0x770] sm:$0xff] }
  0x42   : > { %3088 = vmatpush1.bf16.msra.mxu0 %v3087_v5  ;;  %3154 = vmatprep.subr.bf16.mxu1 %v3153_v6  ;;  %v2825_v5 = vld [vmem:[%s5391_s2 + $0x4e0] sm:$0xff]  ;;  %v2827_v6 = vld [vmem:[%s5391_s2 + $0x4f0] sm:$0xff] }
  0x43   : > { %3090 = vmatprep.subr.bf16.mxu0 %v3089_v9  ;;  %v3187_v7 = vpack.c.bf16 %v2827_v6, %v2825_v5  ;;  %v2832_v9 = vld [vmem:[%s5391_s2 + $0x518] sm:$0xff]  ;;  %v2869_v61 = vld [vmem:[%s5391_s2 + $0x640] sm:$0xff]  ;;  %v2878_v5 = vld [vmem:[%s5391_s2 + $0x688] sm:$0xff] }
  0x44   : > { %v3189_v10 = vpack.c.bf16 %v2832_v9, %v2830_v8  ;;  %v2873_v3 = vld [vmem:[%s5391_s2 + $0x660] sm:$0xff]  ;;  %v2880_v6 = vld [vmem:[%s5391_s2 + $0x698] sm:$0xff]  ;;  %v2847_v63 = vld [vmem:[%s5391_s2 + $0x590] sm:$0xff] }
  0x45   : > { %3156 = vmatpush1.bf16.msra.mxu1 %v3155_v12  ;;  %v2831_v12 = vld [vmem:[%s5391_s2 + $0x510] sm:$0xff]  ;;  %v3237_v8 = vpack.c.bf16 %v2880_v6, %v2878_v5  ;;  %v2877_v9 = vld [vmem:[%s5391_s2 + $0x680] sm:$0xff] }
  0x46   : > { %3092 = vmatpush1.bf16.msra.mxu0 %v3091_v13  ;;  %3158 = vmatprep.subr.bf16.mxu1 %v3157_v23  ;;  %v3191_v13 = vpack.c.bf16 %v2831_v12, %v2829_v11  ;;  %v3197_v23 = vpack.c.bf16 %v2840_v22, %v2838_v21  ;;  %v2882_v11 = vld [vmem:[%s5391_s2 + $0x6a8] sm:$0xff]  ;;  %v2884_v12 = vld [vmem:[%s5391_s2 + $0x6b8] sm:$0xff]  ;;  %v3245_v21 = vpack.c.bf16 %v2888_v19, %v2886_v18  ;;  %v2885_v22 = vld [vmem:[%s5391_s2 + $0x6c0] sm:$0xff] }
  0x47   : > { %v2911_v5 = vld [vmem:[%s5391_s2 + $0x790] sm:$0xff]  ;;  %v2854_v19 = vld [vmem:[%s5391_s2 + $0x5c8] sm:$0xff] }
  0x48   : > { %599 = vmatmul.mubr.f32.vlgmr.msra.gmra.mrb[0].mxu1 %v527_v14  ;;  %v2834_v14 = vld [vmem:[%s5391_s2 + $0x528] sm:$0xff]  ;;  %v2915_v18 = vld [vmem:[%s5391_s2 + $0x7b0] sm:$0xff] }
  0x49   : > { %453 = vmatmul.mubr.f32.vlgmr.msra.gmra.mrb[0].mxu0 %v381_v15  ;;  %3160 = vmatpush1.bf16.msra.mxu1 %v3159_v24  ;;  %v2836_v15 = vld [vmem:[%s5391_s2 + $0x538] sm:$0xff]  ;;  %v2837_v24 = vld [vmem:[%s5391_s2 + $0x540] sm:$0xff] }
  0x4a   : > { %696 = vmatprep.mubr.f32.mxu0 %v3734_v16  ;;  %3162 = vmatprep.subr.bf16.mxu1 %v3161_v28  ;;  %v3193_v17 = vpack.c.bf16 %v2836_v15, %v2834_v14  ;;  %v3199_v26 = vpack.c.bf16 %v2839_v25, %v2837_v24  ;;  %v2844_v28 = vld [vmem:[%s5391_s2 + $0x578] sm:$0xff]  ;;  %v3241_v14 = vpack.c.bf16 %v2884_v12, %v2882_v11  ;;  %v2881_v15 = vld [vmem:[%s5391_s2 + $0x6a0] sm:$0xff]  ;;  %v2890_v24 = vld [vmem:[%s5391_s2 + $0x6e8] sm:$0xff] }
  0x4b   : > { %v3201_v31 = vpack.c.bf16 %v2844_v28, %v2842_v27  ;;  %v2892_v25 = vld [vmem:[%s5391_s2 + $0x6f8] sm:$0xff]  ;;  %v2889_v28 = vld [vmem:[%s5391_s2 + $0x6e0] sm:$0xff]  ;;  %v2851_v11 = vld [vmem:[%s5391_s2 + $0x5b0] sm:$0xff] }
  0x4c   : > { %v3249_v27 = vpack.c.bf16 %v2892_v25, %v2890_v24 }
  0x4d   : > { %3164 = vmatpush1.bf16.msra.mxu1 %v3163_v33  ;;  %v2843_v33 = vld [vmem:[%s5391_s2 + $0x570] sm:$0xff] }
  0x4e   : > { %3166 = vmatprep.subr.bf16.mxu1 %v3165_v37  ;;  %v3203_v34 = vpack.c.bf16 %v2843_v33, %v2841_v32  ;;  %v2864_v37 = vld [vmem:[%s5391_s2 + $0x618] sm:$0xff]  ;;  %v2894_v32 = vld [vmem:[%s5391_s2 + $0x708] sm:$0xff] }
  0x4f   : > { %v2896_v33 = vld [vmem:[%s5391_s2 + $0x718] sm:$0xff] }
  0x51   : > { %3168 = vmatpush1.bf16.msra.mxu1 %v3167_v39 }
  0x52   : > { %3170 = vmatprep.subr.bf16.mxu1 %v3169_v42  ;;  %v2863_v42 = vld [vmem:[%s5391_s2 + $0x610] sm:$0xff] }
  0x55   : > { %3172 = vmatpush1.bf16.msra.mxu1 %v3171_v45  ;;  %v2866_v45 = vld [vmem:[%s5391_s2 + $0x628] sm:$0xff] }
  0x56   : > { %3174 = vmatprep.subr.bf16.mxu1 %v3173_v49  ;;  %v3221_v49 = vpack.c.bf16 %v2864_v37, %v2862_v36  ;;  %v3225_v53 = vpack.c.bf16 %v2868_v47, %v2866_v45  ;;  %v2893_v36 = vld [vmem:[%s5391_s2 + $0x700] sm:$0xff]  ;;  %v2895_v37 = vld [vmem:[%s5391_s2 + $0x710] sm:$0xff]  ;;  %v2904_v45 = vld [vmem:[%s5391_s2 + $0x758] sm:$0xff] }
  0x59   : > { %3176 = vmatpush1.bf16.msra.mxu1 %v3175_v52  ;;  %v3223_v52 = vpack.c.bf16 %v2863_v42, %v2861_v41  ;;  %v2897_v42 = vld [vmem:[%s5391_s2 + $0x720] sm:$0xff] }
  0x5a   : > { %3178 = vmatprep.subr.bf16.mxu1 %v3177_v55  ;;  %v2867_v55 = vld [vmem:[%s5391_s2 + $0x630] sm:$0xff] }
  0x5d   : > { %3180 = vmatpush1.bf16.msra.mxu1 %v3179_v58  ;;  %v3227_v58 = vpack.c.bf16 %v2867_v55, %v2865_v54  ;;  %v2905_v55 = vld [vmem:[%s5391_s2 + $0x760] sm:$0xff] }
  0x5e   : > { %3182 = vmatprep.subr.bf16.mxu1 %v3181_v62  ;;  %v2871_v62 = vld [vmem:[%s5391_s2 + $0x650] sm:$0xff]  ;;  %v3267_v57 = vpack.c.bf16 %v2907_v56, %v2905_v55 }
  0x61   : > { %3184 = vmatpush1.bf16.msra.mxu1 %v3183_v1  ;;  %v3231_v1 = vpack.c.bf16 %v2871_v62, %v2869_v61  ;;  %v2845_v62 = vld [vmem:[%s5391_s2 + $0x580] sm:$0xff] }
  0x62   : > { %3186 = vmatprep.subr.bf16.mxu1 %v3185_v4  ;;  %v2875_v4 = vld [vmem:[%s5391_s2 + $0x670] sm:$0xff]  ;;  %v3207_v0 = vpack.c.bf16 %v2847_v63, %v2845_v62 }
  0x65   : > { %3188 = vmatpush1.bf16.msra.mxu1 %v3187_v7  ;;  %v3235_v7 = vpack.c.bf16 %v2875_v4, %v2873_v3  ;;  %v2909_v4 = vld [vmem:[%s5391_s2 + $0x780] sm:$0xff] }
  0x66   : > { %3190 = vmatprep.subr.bf16.mxu1 %v3189_v10  ;;  %v2879_v10 = vld [vmem:[%s5391_s2 + $0x690] sm:$0xff]  ;;  %v3271_v6 = vpack.c.bf16 %v2911_v5, %v2909_v4 }
  0x69   : > { %3192 = vmatpush1.bf16.msra.mxu1 %v3191_v13  ;;  %v3239_v13 = vpack.c.bf16 %v2879_v10, %v2877_v9  ;;  %v2849_v10 = vld [vmem:[%s5391_s2 + $0x5a0] sm:$0xff] }
  0x6a   : > { %3194 = vmatprep.subr.bf16.mxu1 %v3193_v17  ;;  %v2883_v17 = vld [vmem:[%s5391_s2 + $0x6b0] sm:$0xff]  ;;  %v3211_v12 = vpack.c.bf16 %v2851_v11, %v2849_v10 }
  0x6d   : > { %3196 = vmatpush1.bf16.msra.mxu1 %v3195_v20  ;;  %v3243_v20 = vpack.c.bf16 %v2883_v17, %v2881_v15  ;;  %v2913_v17 = vld [vmem:[%s5391_s2 + $0x7a0] sm:$0xff] }
  0x6e   : > { %3198 = vmatprep.subr.bf16.mxu1 %v3197_v23  ;;  %v2887_v23 = vld [vmem:[%s5391_s2 + $0x6d0] sm:$0xff] }
  0x71   : > { %3200 = vmatpush1.bf16.msra.mxu1 %v3199_v26  ;;  %v3247_v26 = vpack.c.bf16 %v2887_v23, %v2885_v22  ;;  %v2853_v22 = vld [vmem:[%s5391_s2 + $0x5c0] sm:$0xff]  ;;  %v2855_v23 = vld [vmem:[%s5391_s2 + $0x5d0] sm:$0xff] }
  0x72   : > { %3202 = vmatprep.subr.bf16.mxu1 %v3201_v31  ;;  %v2891_v31 = vld [vmem:[%s5391_s2 + $0x6f0] sm:$0xff]  ;;  %v3215_v25 = vpack.c.bf16 %v2855_v23, %v2853_v22  ;;  %v5471_v22 = vmov 0 }
  0x75   : > { %3204 = vmatpush1.bf16.msra.mxu1 %v3203_v34  ;;  %v3251_v34 = vpack.c.bf16 %v2891_v31, %v2889_v28  ;;  %v2917_v28 = vld [vmem:[%s5391_s2 + $0x7c0] sm:$0xff] }
 0x11b   : > { %v600_v35 = vpop.f32.mrb[0].mxu1 }
 0x11c   : > { %v607_v38 = vrot.slane %v600_v35, 7  ;;  %v454_v39 = vpop.f32.mrb[0].mxu0  ;;  %v602_v40 = vpop.f32.mrb[1].mxu1  ;;  %v3253_v35 = vpack.c.bf16 %v2896_v33, %v2894_v32  ;;  %v2919_v32 = vld [vmem:[%s5391_s2 + $0x7d0] sm:$0xff]  ;;  %v2858_v33 = vld [vmem:[%s5391_s2 + $0x5e8] sm:$0xff] }
 0x11d   : > { %v608_v43 = vrot.slane %v602_v40, 7  ;;  %v456_v44 = vpop.f32.mrb[1].mxu0  ;;  %v3255_v40 = vpack.c.bf16 %v2895_v37, %v2893_v36  ;;  %v2857_v37 = vld [vmem:[%s5391_s2 + $0x5e0] sm:$0xff] }
 0x11e   : > { %v612_v48 = vsel %vm5397_vm0, %v454_v39, %v607_v38  ;;  %v2898_v38 = vld [vmem:[%s5391_s2 + $0x728] sm:$0xff]  ;;  %v2900_v39 = vld [vmem:[%s5391_s2 + $0x738] sm:$0xff] }
 0x11f   : > { %v613_v50 = vsel %vm5397_vm0, %v456_v44, %v608_v43  ;;  %v3257_v41 = vpack.c.bf16 %v2900_v39, %v2898_v38  ;;  %v2899_v43 = vld [vmem:[%s5391_s2 + $0x730] sm:$0xff]  ;;  %v2902_v44 = vld [vmem:[%s5391_s2 + $0x748] sm:$0xff] }
 0x120   : > { %2794 = vmatprep.subr.msk.mxu0 %vm5399_vm1, %v613_v50  ;;  %v3259_v47 = vpack.c.bf16 %v2899_v43, %v2897_v42  ;;  %v2903_v50 = vld [vmem:[%s5391_s2 + $0x750] sm:$0xff]  ;;  %v2922_v39 = vld [vmem:[%s5391_s2 + $0x7e8] sm:$0xff]  ;;  %v2921_v43 = vld [vmem:[%s5391_s2 + $0x7e0] sm:$0xff] }
 0x121   : > { %2795 = vmatpush1.msk.msra.mxu0 %vm5399_vm1, %v612_v48  ;;  %v3261_v48 = vpack.c.bf16 %v2904_v45, %v2902_v44  ;;  %v2859_v38 = vld [vmem:[%s5391_s2 + $0x5f0] sm:$0xff] }
 0x122   : > { %2796 = vmatmul.mubr.msk.f32.vlgmr.msra.gmra.mrb[2].mxu0 %vm621_vm2, %v614_v51  ;;  %3222 = vmatprep.subr.bf16.mxu0 %v3221_v49  ;;  %v2901_v49 = vld [vmem:[%s5391_s2 + $0x740] sm:$0xff]  ;;  %v2906_v51 = vld [vmem:[%s5391_s2 + $0x768] sm:$0xff]  ;;  %v2923_v44 = vld [vmem:[%s5391_s2 + $0x7f0] sm:$0xff] }
 0x123   : > { %3224 = vmatpush1.bf16.msra.mxu0 %v3223_v52  ;;  %v2908_v52 = vld [vmem:[%s5391_s2 + $0x778] sm:$0xff]  ;;  %v3283_v45 = vpack.c.bf16 %v2923_v44, %v2921_v43  ;;  %v5485_v43 = vmov 0  ;;  %v5487_v44 = vmov 0 }
 0x124   : > { %3226 = vmatprep.subr.bf16.mxu0 %v3225_v53  ;;  %v3263_v53 = vpack.c.bf16 %v2903_v50, %v2901_v49  ;;  %v3265_v54 = vpack.c.bf16 %v2908_v52, %v2906_v51 }
 0x127   : > { %3228 = vmatpush1.bf16.msra.mxu0 %v3227_v58  ;;  %v2846_v58 = vld [vmem:[%s5391_s2 + $0x588] sm:$0xff] }
 0x128   : > { %3230 = vmatprep.subr.bf16.mxu0 %v3229_v60  ;;  %v2848_v60 = vld [vmem:[%s5391_s2 + $0x598] sm:$0xff] }
 0x129   : > { %v3205_v61 = vpack.c.bf16 %v2848_v60, %v2846_v58 }
 0x12b   : > { %3232 = vmatpush1.bf16.msra.mxu0 %v3231_v1  ;;  %v2910_v1 = vld [vmem:[%s5391_s2 + $0x788] sm:$0xff]  ;;  %3206 = vmatprep.subr.bf16.mxu1 %v3205_v61 }
 0x12c   : > { %3234 = vmatprep.subr.bf16.mxu0 %v3233_v2  ;;  %v2912_v2 = vld [vmem:[%s5391_s2 + $0x798] sm:$0xff]  ;;  %3208 = vmatpush1.bf16.msra.mxu1 %v3207_v0 }
 0x12d   : > { %v3269_v3 = vpack.c.bf16 %v2912_v2, %v2910_v1  ;;  %v2925_v1 = vld [vmem:[%s5392_s3 + $0x2] sm:$0x3] }
 0x12f   : > { %3236 = vmatpush1.bf16.msra.mxu0 %v3235_v7  ;;  %v2850_v7 = vld [vmem:[%s5391_s2 + $0x5a8] sm:$0xff] }
 0x130   : > { %3238 = vmatprep.subr.bf16.mxu0 %v3237_v8  ;;  %v2852_v8 = vld [vmem:[%s5391_s2 + $0x5b8] sm:$0xff] }
 0x131   : > { %v3209_v9 = vpack.c.bf16 %v2852_v8, %v2850_v7 }
 0x133   : > { %3240 = vmatpush1.bf16.msra.mxu0 %v3239_v13  ;;  %v2914_v13 = vld [vmem:[%s5391_s2 + $0x7a8] sm:$0xff]  ;;  %3210 = vmatprep.subr.bf16.mxu1 %v3209_v9  ;;  %v306_v9 = vand.u32 127, %v305_v46 }
 0x134   : > { %3242 = vmatprep.subr.bf16.mxu0 %v3241_v14  ;;  %v2916_v14 = vld [vmem:[%s5391_s2 + $0x7b8] sm:$0xff]  ;;  %3212 = vmatpush1.bf16.msra.mxu1 %v3211_v12 }
 0x135   : > { %v3273_v15 = vpack.c.bf16 %v2916_v14, %v2914_v13  ;;  %v307_v10 = vadd.s32 128, %v306_v9  ;;  %v310_v11 = vshra.s32 %v306_v9, 4  ;;  %v308_v12 = vand.u32 15, %v306_v9 }
 0x137   : > { %3244 = vmatpush1.bf16.msra.mxu0 %v3243_v20  ;;  %v3275_v20 = vpack.c.bf16 %v2915_v18, %v2913_v17  ;;  %v311_v13 = vshra.s32 %v307_v10, 4  ;;  %v309_v14 = vand.u32 15, %v307_v10  ;;  %vm4657_vm3 = vcmp.ge.s32.totalorder %v310_v11, 1 }
 0x138   : > { %3246 = vmatprep.subr.bf16.mxu0 %v3245_v21  ;;  %v2856_v21 = vld [vmem:[%s5391_s2 + $0x5d8] sm:$0xff]  ;;  %vm4665_vm7 = vcmp.lt.s32.totalorder %v308_v12, 15  ;;  %vm4673_vm10 = vcmp.ge.s32.totalorder %v308_v12, 1  ;;  %vm4683_vm13 = vcmp.lt.s32.totalorder %v310_v11, 15 }
 0x139   : > { %v3213_v24 = vpack.c.bf16 %v2856_v21, %v2854_v19  ;;  %vm4661_vm6 = vcmp.ge.s32.totalorder %v311_v13, 1  ;;  %v5472_v22 = vsel %vm4665_vm7, 4294967295, %v5471_v22  ;;  %vm4669_vm8 = vcmp.lt.s32.totalorder %v309_v14, 15  ;;  %vm4691_vm14 = vmand %vm4657_vm3, %vm4665_vm7 }
 0x13a   : > { %vm4677_vm11 = vcmp.ge.s32.totalorder %v309_v14, 1  ;;  %vm4699_vm15 = vmand %vm4661_vm6, %vm4669_vm8 }
 0x13b   : > { %3248 = vmatpush1.bf16.msra.mxu0 %v3247_v26  ;;  %v2918_v26 = vld [vmem:[%s5391_s2 + $0x7c8] sm:$0xff]  ;;  %3214 = vmatprep.subr.bf16.mxu1 %v3213_v24 }
 0x13c   : > { %3250 = vmatprep.subr.bf16.mxu0 %v3249_v27  ;;  %v2920_v27 = vld [vmem:[%s5391_s2 + $0x7d8] sm:$0xff]  ;;  %3216 = vmatpush1.bf16.msra.mxu1 %v3215_v25  ;;  %v5473_v25 = vmov 0 }
 0x13d   : > { %v3277_v31 = vpack.c.bf16 %v2920_v27, %v2918_v26  ;;  %v5474_v25 = vsel %vm4669_vm8, 4294967295, %v5473_v25  ;;  %v5475_v26 = vmov 0  ;;  %v5477_v27 = vmov 0 }
 0x13e   : > { %v5476_v26 = vsel %vm4673_vm10, 4294967295, %v5475_v26  ;;  %v5478_v27 = vsel %vm4677_vm11, 4294967295, %v5477_v27 }
 0x13f   : > { %3252 = vmatpush1.bf16.msra.mxu0 %v3251_v34  ;;  %v2860_v34 = vld [vmem:[%s5391_s2 + $0x5f8] sm:$0xff] }
 0x140   : > { %3254 = vmatprep.subr.bf16.mxu0 %v3253_v35  ;;  %v3279_v35 = vpack.c.bf16 %v2919_v32, %v2917_v28  ;;  %v3217_v36 = vpack.c.bf16 %v2860_v34, %v2858_v33  ;;  %v5479_v34 = vmov 0 }
 0x141   : > { %v5480_v34 = vsel %vm4683_vm13, 4294967295, %v5479_v34 }
 0x142   : > { %3218 = vmatprep.subr.bf16.mxu1 %v3217_v36 }
 0x143   : > { %3256 = vmatpush1.bf16.msra.mxu0 %v3255_v40  ;;  %v3219_v40 = vpack.c.bf16 %v2859_v38, %v2857_v37 }
 0x144   : > { %3258 = vmatprep.subr.bf16.mxu0 %v3257_v41  ;;  %v2924_v41 = vld [vmem:[%s5391_s2 + $0x7f8] sm:$0xff] }
 0x145   : > { %v3281_v42 = vpack.c.bf16 %v2924_v41, %v2922_v39  ;;  %3220 = vmatpush1.bf16.msra.mxu1 %v3219_v40  ;;  %v5483_v40 = vmov 0 }
 0x146   : > { %v5484_v40 = vsel %vm4699_vm15, 4294967295, %v5483_v40 }
 0x147   : > { %3260 = vmatpush1.bf16.msra.mxu0 %v3259_v47  ;;  %v619_v47 = vpop.permute.xlu0 %618 }
 0x148   : > { %3262 = vmatprep.subr.bf16.mxu0 %v3261_v48 }
 0x14b   : > { %3264 = vmatpush1.bf16.msra.mxu0 %v3263_v53  ;;  %v998_v2 = vpop.permute.xlu0 %997 }
 0x14c   : > { %3266 = vmatprep.subr.bf16.mxu0 %v3265_v54 }
 0x14f   : > { %3268 = vmatpush1.bf16.msra.mxu0 %v3267_v57 }
 0x150   : > { %3270 = vmatprep.subr.bf16.mxu0 %v3269_v3 }
 0x153   : > { %3272 = vmatpush1.bf16.msra.mxu0 %v3271_v6 }
 0x154   : > { %3274 = vmatprep.subr.bf16.mxu0 %v3273_v15 }
 0x157   : > { %3276 = vmatpush1.bf16.msra.mxu0 %v3275_v20  ;;  %v5467_v20 = vmov 0 }
 0x158   : > { %3278 = vmatprep.subr.bf16.mxu0 %v3277_v31  ;;  %v5468_v20 = vsel %vm4657_vm3, 4294967295, %v5467_v20 }
 0x15b   : > { %3280 = vmatpush1.bf16.msra.mxu0 %v3279_v35  ;;  %v5481_v35 = vmov 0 }
 0x15c   : > { %3282 = vmatprep.subr.bf16.mxu0 %v3281_v42  ;;  %v5482_v35 = vsel %vm4691_vm14, 4294967295, %v5481_v35 }
 0x15f   : > { %3284 = vmatpush1.bf16.msra.mxu0 %v3283_v45 }
 0x1f5   : > { %v698_v48 = vpop.f32.mrb[2].mxu0 }
 0x1f6   : > { %v699_v49 = vadd.f32 %v698_v48, %v619_v47  ;;  %v700_v50 = vpop.f32.mrb[3].mxu0 }
 0x1f7   : > { %v701_v51 = vadd.f32 %v700_v50, %v619_v47 }
 0x1f8   : > { %3722 = vtanh.f32 %v699_v49 }
 0x1f9   : > { %3724 = vtanh.f32 %v701_v51 }
 0x202   : > { %v3723_v52 = vpop.eup %3722 }
 0x203   : > { %v3725_v53 = vpop.eup %3724  ;;  %v908_v55 = vrot.slane %v3723_v52, 1 }
 0x204   : > { %834 = vmatprep.mubr.f32.mxu1 %v3725_v53  ;;  %v909_v54 = vrot.slane %v3725_v53, 1 }
 0x205   : > { %835 = vmatmul.mubr.f32.vlgmr.msra.gmra.mrb[2].mxu1 %v3723_v52  ;;  %v5489_v52 = vmov 0 }
 0x206   : > { %976 = vmatprep.mubr.f32.mxu0 %v909_v54  ;;  %1073 = vmatprep.mubr.f32.mxu1 %v3734_v16 }
 0x207   : > { %977 = vmatmul.mubr.f32.vlgmr.msra.gmra.mrb[4].mxu0 %v908_v55 }
 0x208   : > { %1605 = vmatprep.mubr.f32.mxu0 %v3734_v16 }
 0x2d8   : > { %v836_v56 = vpop.f32.mrb[2].mxu1 }
 0x2d9   : > { %v838_v57 = vpop.f32.mrb[3].mxu1 }
 0x2da   : > { %v978_v58 = vpop.f32.mrb[4].mxu0 }
 0x2db   : > { %v985_v60 = vrot.slane %v978_v58, 7  ;;  %v980_v61 = vpop.f32.mrb[5].mxu0 }
 0x2dc   : > { %v986_v62 = vrot.slane %v980_v61, 7 }
 0x2dd   : > { %v989_v63 = vsel %vm5397_vm0, %v836_v56, %v985_v60  ;;  %v5491_v60 = vmov 0 }
 0x2de   : > { %v990_v0 = vsel %vm5397_vm0, %v838_v57, %v986_v62  ;;  %vm4727_vm0 = vmand %vm4661_vm6, %vm4677_vm11 }
 0x2df   : > { %2927 = vmatprep.subr.msk.mxu1 %vm5399_vm1, %v990_v0  ;;  %v5490_v52 = vsel %vm4727_vm0, 4294967295, %v5489_v52 }
 0x2e0   : > { %2928 = vmatpush1.msk.msra.mxu1 %vm5399_vm1, %v989_v63  ;;  %v5493_v63 = vmov 0  ;;  %vm5495_vm1 = vcmask 916480  }
 0x2e1   : > { %2929 = vmatmul.mubr.msk.f32.vlgmr.msra.gmra.mrb[4].mxu1 %vm621_vm2, %v2925_v1  ;;  %vm4705_vm2 = vcmp.lt.s32.totalorder %v311_v13, 15 }
 0x2e2   : > { %1354 = vmatprep.mubr.f32.mxu1 %v3734_v16  ;;  %v5486_v43 = vsel %vm4705_vm2, 4294967295, %v5485_v43 }
 0x3b4   : > { %v1075_v3 = vpop.f32.mrb[4].mxu1 }
 0x3b5   : > { %v4637_v4 = vadd.f32 %v1075_v3, %v998_v2  ;;  %v1077_v5 = vpop.f32.mrb[5].mxu1 }
 0x3b6   : > { %v4639_v6 = vadd.f32 %v1077_v5, %v998_v2 }
 0x3b8   : > { %v3457_v7 = vpack.i.bf16 %v4637_v4, %v4639_v6  ;;  %v3452_v8 = vpack.i.bf16 %v4639_v6, %v4637_v4 }
 0x3ba   : > { %3458 = vrot.lane.b32.xlu0 %v3457_v7, %s3736_s30  ;;  %3448 = vrot.lane.b32.xlu1 %v3457_v7, %s3737_s8 }
 0x3be   : > { %3468 = vrot.lane.b32.xlu0 %v3457_v7, %s3738_s9  ;;  %3453 = vrot.lane.b32.xlu1 %v3452_v8, %s3739_s27 }
 0x3c2   : > { %3478 = vrot.lane.b32.xlu0 %v3452_v8, %s3740_s10  ;;  %3463 = vrot.lane.b32.xlu1 %v3452_v8, %s3741_s12 }
 0x3c6   : > { %1210 = vrot.lane.b32.xlu0 %v4639_v6, %s3742_s14  ;;  %3473 = vrot.lane.b32.xlu1 %v3457_v7, %s3743_s15 }
 0x3ca   : > { %1208 = vrot.lane.b32.xlu1 %v4637_v4, %s3742_s14 }
 0x42c   : > { %v3459_v15 = vpop.permute.xlu0 %3458  ;;  %v3449_v17 = vpop.permute.xlu1 %3448 }
 0x42d   : > { %v3451_v18 = vunpack.i.h.bf16 %v3449_v17  ;;  %v3450_v19 = vunpack.i.l.bf16 %v3449_v17  ;;  %v3461_v23 = vunpack.i.h.bf16 %v3459_v15  ;;  %v3460_v24 = vunpack.i.l.bf16 %v3459_v15 }
 0x42f   : > { %v1110_v32 = vsel %vm5398_vm5, %v3451_v18, %v3450_v19  ;;  %v1113_v33 = vsel %vm5398_vm5, %v3450_v19, %v3451_v18  ;;  %v1126_v41 = vsel %vm5400_vm4, %v3461_v23, %v3460_v24  ;;  %v1129_v42 = vsel %vm5400_vm4, %v3460_v24, %v3461_v23  ;;  %vm4713_vm5 = vmand %vm4657_vm3, %vm4673_vm10 }
 0x430   : > { %v3469_v28 = vpop.permute.xlu0 %3468  ;;  %v3454_v31 = vpop.permute.xlu1 %3453  ;;  %v5488_v44 = vsel %vm4713_vm5, 4294967295, %v5487_v44  ;;  %v1118_v50 = vsel %vm4657_vm3, %v1113_v33, 0.0  ;;  %v1119_v51 = vsel %vm4661_vm6, %v1110_v32, 0.0  ;;  %v1138_v55 = vsel %vm4691_vm14, %v1129_v42, 0.0  ;;  %vm4744_vm4 = vmand %vm4683_vm13, %vm4673_vm10 }
 0x431   : > { %v3471_v36 = vunpack.i.h.bf16 %v3469_v28  ;;  %v3470_v37 = vunpack.i.l.bf16 %v3469_v28  ;;  %v3456_v38 = vunpack.i.h.bf16 %v3454_v31  ;;  %v3455_v39 = vunpack.i.l.bf16 %v3454_v31 }
 0x432   : > { %v1139_v56 = vsel %vm4699_vm15, %v1126_v41, 0.0  ;;  %v5492_v60 = vsel %vm4744_vm4, 4294967295, %v5491_v60  ;;  %v1228_v2 = vrot.slane %v1118_v50, 6  ;;  %v1229_v3 = vrot.slane %v1119_v51, 6 }
 0x433   : > { %v1161_v45 = vsel %vm5401_vm12, %v3455_v39, %v3456_v38  ;;  %v1165_v47 = vsel %vm5401_vm12, %v3456_v38, %v3455_v39  ;;  %v1088_v57 = vsel %vm5404_vm9, %v3471_v36, %v3470_v37  ;;  %v1091_v61 = vsel %vm5404_vm9, %v3470_v37, %v3471_v36  ;;  %vm4753_vm12 = vmand %vm4705_vm2, %vm4677_vm11 }
 0x434   : > { %v3479_v48 = vpop.permute.xlu0 %3478  ;;  %v3464_v49 = vpop.permute.xlu1 %3463  ;;  %v1170_v53 = vsel %vm4665_vm7, %v1161_v45, 0.0  ;;  %v1171_v54 = vsel %vm4669_vm8, %v1165_v47, 0.0  ;;  %v5494_v63 = vsel %vm4753_vm12, 4294967295, %v5493_v63  ;;  %vm5496_vm9 = vmmov %vm5495_vm1  ;;  %vm5497_vm15 = vcmask 924672  }
 0x435   : > { %v3481_v58 = vunpack.i.h.bf16 %v3479_v48  ;;  %v3480_v62 = vunpack.i.l.bf16 %v3479_v48  ;;  %v3466_v0 = vunpack.i.h.bf16 %v3464_v49  ;;  %v3465_v1 = vunpack.i.l.bf16 %v3464_v49  ;;  %vm5498_vm3 = vmmov %vm5497_vm15 }
 0x436   : > { %v1246_v5 = vrot.slane %v1170_v53, 6  ;;  %v1247_v7 = vrot.slane %v1171_v54, 6  ;;  %v1102_v13 = vsel %vm4713_vm5, %v1091_v61, 0.0  ;;  %v1103_v14 = vsel %vm4727_vm0, %v1088_v57, 0.0 }
 0x437   : > { %v1197_v9 = vsel %vm5495_vm1, %v3480_v62, %v3481_v58  ;;  %v1201_v10 = vsel %vm5496_vm9, %v3481_v58, %v3480_v62  ;;  %v1177_v11 = vsel %vm5497_vm15, %v3465_v1, %v3466_v0  ;;  %v1181_v12 = vsel %vm5498_vm3, %v3466_v0, %v3465_v1 }
 0x438   : > { %v3474_v8 = vpop.permute.xlu1 %3473  ;;  %v1190_v15 = vsel %vm4744_vm4, %v1177_v11, 0.0  ;;  %v1191_v17 = vsel %vm4753_vm12, %v1181_v12, 0.0  ;;  %v1206_v18 = vsel %vm4683_vm13, %v1197_v9, 0.0  ;;  %v1207_v19 = vsel %vm4705_vm2, %v1201_v10, 0.0  ;;  %v1211_v49 = vpop.permute.xlu0 %1210  ;;  %v1278_v11 = vld [vmem:[%s5394_s5] sm:$0xff] }
 0x439   : > { %v1252_v23 = vrot.slane %v1190_v15, 4  ;;  %v1253_v24 = vrot.slane %v1191_v17, 4  ;;  %v1234_v28 = vrot.slane %v1138_v55, 4  ;;  %v1235_v31 = vrot.slane %v1139_v56, 4 }
 0x43a   : > { %v3476_v32 = vunpack.i.h.bf16 %v3474_v8  ;;  %v3475_v33 = vunpack.i.l.bf16 %v3474_v8  ;;  %vm5499_vm1 = vcmask 1041408   ;;  %v1258_v42 = vrot.slane %v1206_v18, 2 }
 0x43b   : > { %v1262_v36 = vsel %vm5499_vm1, %v1102_v13, %v1228_v2  ;;  %vm5500_vm3 = vmmov %vm5499_vm1  ;;  %v1259_v45 = vrot.slane %v1207_v19, 2  ;;  %vm5503_vm14 = vcmask 7168   ;;  %vm5512_vm12 = vcmask 1045504  }
 0x43c   : > { %v1270_v37 = vsel %vm5500_vm3, %v4637_v4, %v1246_v5  ;;  %v1209_v38 = vpop.permute.xlu1 %1208  ;;  %vm5501_vm9 = vmmov %vm5499_vm1  ;;  %v1146_v47 = vsel %vm5503_vm14, %v3476_v32, %v3475_v33  ;;  %v5516_v2 = vmov 0 }
 0x43d   : > { %v1263_v39 = vsel %vm5501_vm9, %v1103_v14, %v1229_v3  ;;  %vm5502_vm15 = vmmov %vm5499_vm1  ;;  %v1155_v51 = vsel %vm4677_vm11, %v1146_v47, 0.0  ;;  %vm5505_vm1 = vcmask 1043456  }
 0x43e   : > { %v1271_v41 = vsel %vm5502_vm15, %v4639_v6, %v1247_v7  ;;  %vm5504_vm4 = vmmov %vm5503_vm14  ;;  %v1241_v55 = vrot.slane %v1155_v51, 2  ;;  %v5507_v6 = vmov 0 }
 0x43f   : > { %v1149_v48 = vsel %vm5504_vm4, %v3475_v33, %v3476_v32  ;;  %v1273_v4 = vsel %vm5505_vm1, %v1271_v41, %v1253_v24  ;;  %vm5506_vm3 = vmmov %vm5505_vm1  ;;  %vm5509_vm4 = vcmask 908288  }
 0x440   : > { %v1154_v50 = vsel %vm4673_vm10, %v1149_v48, 0.0  ;;  %v1272_v53 = vsel %vm5506_vm3, %v1270_v37, %v1252_v23  ;;  %vm4791_vm14 = vmand %vm4705_vm2, %vm4669_vm8  ;;  %v1217_v56 = vsel %vm5509_vm4, %v1211_v49, %v1209_v38  ;;  %v1213_v3 = vsel %vm5509_vm4, %v1209_v38, %v1211_v49 }
 0x441   : > { %v1240_v54 = vrot.slane %v1154_v50, 2  ;;  %v5508_v6 = vsel %vm4791_vm14, 4294967295, %v5507_v6  ;;  %vm5510_vm9 = vmmov %vm5505_vm1  ;;  %v1225_v5 = vsel %vm4791_vm14, %v1217_v56, 0.0  ;;  %vm5522_vm4 = vcmask 138240  }
 0x442   : > { %v1266_v57 = vsel %vm5510_vm9, %v1263_v39, %v1235_v31  ;;  %vm5511_vm15 = vmmov %vm5505_vm1  ;;  %vm1279_vm9 = vcmask 154624  }
 0x443   : > { %v1265_v58 = vsel %vm5511_vm15, %v1262_v36, %v1234_v28  ;;  %v1269_v61 = vsel %vm5512_vm12, %v1266_v57, %v1241_v55  ;;  %vm5513_vm1 = vmmov %vm5512_vm12  ;;  %vm5417_vm12 = vcmask 1042432  }
 0x444   : > { %v1275_v62 = vsel %vm5513_vm1, %v1273_v4, %v1259_v45  ;;  %vm5514_vm3 = vmmov %vm5513_vm1 }
 0x445   : > { %v1268_v0 = vsel %vm5514_vm3, %v1265_v58, %v1240_v54  ;;  %vm5515_vm10 = vmmov %vm5513_vm1  ;;  %v3285_v7 = vpack.c.bf16 %v1275_v62, %v1269_v61  ;;  %vm5520_vm1 = vcmask 130048  }
 0x446   : > { %v1274_v1 = vsel %vm5515_vm10, %v1272_v53, %v1258_v42  ;;  %vm4806_vm2 = vmand %vm4683_vm13, %vm4665_vm7  ;;  %vm5518_vm10 = vcmask 1041408  }
 0x447   : > { %v5517_v2 = vsel %vm4806_vm2, 4294967295, %v5516_v2  ;;  %v3287_v8 = vpack.c.bf16 %v1274_v1, %v1268_v0  ;;  %3286 = vmatprep.subr.bf16.mxu1 %v3285_v7  ;;  %v1224_v9 = vsel %vm4806_vm2, %v1213_v3, 0.0  ;;  %v1277_v10 = vsel %vm5518_vm10, %v1225_v5, 1.0  ;;  %vm5519_vm15 = vmmov %vm5518_vm10 }
 0x448   : > { %v1276_v12 = vsel %vm5519_vm15, %v1224_v9, 1.0  ;;  %vm5521_vm3 = vmmov %vm5520_vm1  ;;  %vm5524_vm15 = vnez %v5468_v20  ;;  %vm5529_vm2 = vnez %v5484_v40 }
 0x449   : > { %3288 = vmatpush1.bf16.msra.mxu1 %v3287_v8  ;;  %vm5523_vm10 = vmmov %vm5522_vm4  ;;  %v5534_v8 = vmov 0 }
 0x44a   : > { %2930 = vmatprep.subr.msk.mxu1 %vm5417_vm12, %v1277_v10 }
 0x44d   : > { %2931 = vmatpush1.msk.msra.mxu1 %vm5417_vm12, %v1276_v12 }
 0x44e   : > { %2932 = vmatmul.mubr.msk.f32.vlgmr.msra.gmra.mrb[6].mxu1 %vm1279_vm9, %v1278_v11  ;;  %vm5423_vm9 = vmpackc.low %vm4661_vm6, %vm4727_vm0 }
 0x44f   : > { %1526 = vmatprep.mubr.f32.mxu1 %v3734_v16  ;;  %vm5427_vm0 = vmpackc.low %vm4677_vm11, %vm5529_vm2 }
 0x521   : > { %v1356_v13 = vpop.f32.mrb[6].mxu1 }
 0x522   : > { %v4823_v14 = vmax.f32 %v1356_v13, 0.0  ;;  %v1358_v15 = vpop.f32.mrb[7].mxu1  ;;  %v5536_v13 = vmov 0 }
 0x523   : > { %v4825_v17 = vmax.f32 %v1358_v15, 0.0 }
 0x525   : > { %v3487_v18 = vpack.i.bf16 %v4823_v14, %v4825_v17  ;;  %v3507_v19 = vpack.i.bf16 %v4825_v17, %v4823_v14 }
 0x527   : > { %3488 = vrot.lane.b32.xlu0 %v3487_v18, %s3737_s8  ;;  %3483 = vrot.lane.b32.xlu1 %v3487_v18, %s3738_s9 }
 0x52b   : > { %3498 = vrot.lane.b32.xlu0 %v3487_v18, %s3743_s15  ;;  %3493 = vrot.lane.b32.xlu1 %v3487_v18, %s3736_s30 }
 0x52f   : > { %3508 = vrot.lane.b32.xlu0 %v3507_v19, %s3741_s12  ;;  %3503 = vrot.lane.b32.xlu1 %v3507_v19, %s3739_s27 }
 0x533   : > { %3518 = vrot.lane.b32.xlu0 %v3507_v19, %s3742_s14  ;;  %3513 = vrot.lane.b32.xlu1 %v3507_v19, %s3740_s10 }
 0x599   : > { %v3489_v23 = vpop.permute.xlu0 %3488  ;;  %v3484_v24 = vpop.permute.xlu1 %3483 }
 0x59a   : > { %v3491_v28 = vunpack.i.h.bf16 %v3489_v23  ;;  %v3490_v31 = vunpack.i.l.bf16 %v3489_v23  ;;  %v3486_v32 = vunpack.i.h.bf16 %v3484_v24  ;;  %v3485_v33 = vunpack.i.l.bf16 %v3484_v24 }
 0x59c   : > { %v1381_v36 = vsel %vm5520_vm1, %v3491_v28, %v3490_v31  ;;  %v1384_v37 = vsel %vm5521_vm3, %v3490_v31, %v3491_v28  ;;  %v1370_v38 = vsel %vm5522_vm4, %v3486_v32, %v3485_v33  ;;  %v1373_v39 = vsel %vm5523_vm10, %v3485_v33, %v3486_v32  ;;  %vm5422_vm1 = vmpackc.low %vm5524_vm15, %vm4713_vm5 }
 0x59d   : > { %v3289_v41 = vpack.c.bf16 %v1381_v36, %v1370_v38  ;;  %v3292_v42 = vpack.c.bf16 %v1384_v37, %v1373_v39  ;;  %v3499_v45 = vpop.permute.xlu0 %3498  ;;  %v3494_v47 = vpop.permute.xlu1 %3493  ;;  %vm5525_vm3 = vcmask 7168   ;;  %vm5527_vm10 = vcmask 121856  }
 0x59e   : > { %v3501_v48 = vunpack.i.h.bf16 %v3499_v45  ;;  %v3500_v49 = vunpack.i.l.bf16 %v3499_v45  ;;  %v3496_v50 = vunpack.i.h.bf16 %v3494_v47  ;;  %v3495_v51 = vunpack.i.l.bf16 %v3494_v47  ;;  %vm5526_vm4 = vmmov %vm5525_vm3  ;;  %v2933_v45 = vld [vmem:[%s5394_s5 + $0x10] sm:$0xff] }
 0x59f   : > { %3291 = vmatprep.subr.msk.bf16.mxu1 %vm5423_vm9, %v3289_v41  ;;  %vm5528_vm12 = vmmov %vm5527_vm10  ;;  %vm5432_vm9 = vmmov 1   ;;  %v5547_v36 = vmov 0  ;;  %v3745_v38 = vmov 1.0   ;;  %v5552_v41 = vmov 0 }
 0x5a0   : > { %v1403_v4 = vsel %vm5525_vm3, %v3501_v48, %v3500_v49  ;;  %v1406_v53 = vsel %vm5526_vm4, %v3500_v49, %v3501_v48  ;;  %v1392_v54 = vsel %vm5527_vm10, %v3496_v50, %v3495_v51  ;;  %v1395_v55 = vsel %vm5528_vm12, %v3495_v51, %v3496_v50  ;;  %3294 = vmatpush1.bf16.msk.msra.mxu1 %vm5422_vm1, %v3292_v42  ;;  %vm4888_vm5 = vmpackc.low %vm4669_vm8, %vm5432_vm9 }
 0x5a1   : > { %v3295_v56 = vpack.c.bf16 %v1403_v4, %v1392_v54  ;;  %v3298_v57 = vpack.c.bf16 %v1406_v53, %v1395_v55  ;;  %v3509_v58 = vpop.permute.xlu0 %3508  ;;  %v3504_v61 = vpop.permute.xlu1 %3503  ;;  %vm5530_vm3 = vnez %v5482_v35  ;;  %vm5531_vm4 = vnez %v5476_v26 }
 0x5a2   : > { %vm5426_vm12 = vmpackc.low %vm5531_vm4, %vm5530_vm3  ;;  %v3506_v62 = vunpack.i.h.bf16 %v3504_v61  ;;  %v3505_v0 = vunpack.i.l.bf16 %v3504_v61  ;;  %v3511_v1 = vunpack.i.h.bf16 %v3509_v58  ;;  %v3510_v3 = vunpack.i.l.bf16 %v3509_v58 }
 0x5a3   : > { %3297 = vmatprep.subr.msk.bf16.mxu1 %vm5427_vm0, %v3295_v56  ;;  %vm5532_vm10 = vcmask 1039360   ;;  %v5535_v8 = vsel %vm4888_vm5, 4294967295, %v5534_v8  ;;  %vm5540_vm0 = vcmask 908288   ;;  %vm5541_vm8 = vcmask 916480   ;;  %v2953_v56 = vld [vmem:[%s5394_s5 + $0x20] sm:$0xff] }
 0x5a4   : > { %v1413_v5 = vsel %vm5532_vm10, %v3505_v0, %v3506_v62  ;;  %vm5533_vm1 = vmmov %vm5532_vm10  ;;  %3300 = vmatpush1.bf16.msk.msra.mxu1 %vm5426_vm12, %v3298_v57  ;;  %vm5538_vm10 = vcmask 924672   ;;  %v3522_v47 = vpack.i.bf16 %v4135_v30, %v4131_v29  ;;  %v3542_v48 = vpack.i.bf16 %v4131_v29, %v4135_v30 }
 0x5a5   : > { %v1417_v7 = vsel %vm5533_vm1, %v3506_v62, %v3505_v0  ;;  %v3304_v10 = vpack.c.bf16 %v1413_v5, %v4823_v14  ;;  %v3519_v11 = vpop.permute.xlu0 %3518  ;;  %v3514_v12 = vpop.permute.xlu1 %3513  ;;  %vm4897_vm1 = vmpackc.low %vm4665_vm7, %vm5432_vm9  ;;  %v1424_v24 = vsel %vm5538_vm10, %v3510_v3, %v3511_v1  ;;  %vm5543_vm9 = vnez %v5494_v63 }
 0x5a6   : > { %v3301_v9 = vpack.c.bf16 %v1417_v7, %v4825_v17  ;;  %v5537_v13 = vsel %vm4897_vm1, 4294967295, %v5536_v13  ;;  %v3521_v15 = vunpack.i.h.bf16 %v3519_v11  ;;  %v3520_v18 = vunpack.i.l.bf16 %v3519_v11  ;;  %vm5539_vm12 = vmmov %vm5538_vm10  ;;  %3523 = vrot.lane.b32.xlu0 %v3522_v47, %s3737_s8  ;;  %3538 = vrot.lane.b32.xlu1 %v3522_v47, %s3743_s15 }
 0x5a7   : > { %v3516_v19 = vunpack.i.h.bf16 %v3514_v12  ;;  %v3515_v23 = vunpack.i.l.bf16 %v3514_v12  ;;  %v1428_v14 = vsel %vm5539_vm12, %v3511_v1, %v3510_v3  ;;  %vm5542_vm11 = vmmov %vm5541_vm8  ;;  %vm5544_vm7 = vnez %v5486_v43 }
 0x5a8   : > { %3303 = vmatprep.subr.msk.bf16.mxu1 %vm4888_vm5, %v3301_v9  ;;  %v1450_v17 = vsel %vm5540_vm0, %v3521_v15, %v3520_v18  ;;  %vm5440_vm4 = vmpackc.low %vm5544_vm7, %vm5543_vm9  ;;  %vm5545_vm10 = vnez %v5492_v60  ;;  %vm5546_vm0 = vcmask 1040384   ;;  %v5556_v53 = vmov 0 }
 0x5a9   : > { %v1435_v28 = vsel %vm5541_vm8, %v3515_v23, %v3516_v19  ;;  %v1439_v31 = vsel %vm5542_vm11, %v3516_v19, %v3515_v23  ;;  %3306 = vmatpush1.bf16.msk.msra.mxu1 %vm4897_vm1, %v3304_v10  ;;  %vm5438_vm12 = vmpackc.low %vm4683_vm13, %vm5545_vm10  ;;  %vm5549_vm11 = vcmask 908288   ;;  %v3313_v39 = vpack.c.bf16 %v3745_v38, %v1450_v17 }
 0x5aa   : > { %v3307_v32 = vpack.c.bf16 %v1439_v31, %v1428_v14  ;;  %v3310_v33 = vpack.c.bf16 %v1435_v28, %v1424_v24  ;;  %vm4921_vm8 = vmpackc.low %vm5546_vm0, %vm4791_vm14  ;;  %v1446_v37 = vsel %vm5549_vm11, %v3520_v18, %v3521_v15  ;;  %vm5550_vm0 = vnez %v5517_v2  ;;  %3528 = vrot.lane.b32.xlu0 %v3522_v47, %s3736_s30 }
 0x5ab   : > { %v5548_v36 = vsel %vm4921_vm8, 4294967295, %v5547_v36  ;;  %vm5551_vm11 = vcmask 1040384   ;;  %v3316_v42 = vpack.c.bf16 %v3745_v38, %v1446_v37  ;;  %3543 = vrot.lane.b32.xlu1 %v3542_v48, %s3739_s27  ;;  %v3746_v57 = vmov 1966171168  }
 0x5ac   : > { %3309 = vmatprep.subr.msk.bf16.mxu1 %vm5440_vm4, %v3307_v32  ;;  %vm4942_vm1 = vmpackc.low %vm5551_vm11, %vm5550_vm0  ;;  %vm5554_vm11 = vmmov 1   ;;  %v1616_v58 = vunpack.c.l.s4 %v3746_v57  ;;  %vm5564_vm5 = vcmask 138240   ;;  %vm5574_vm7 = vcmask 1039360  }
 0x5ad   : > { %3312 = vmatpush1.bf16.msk.msra.mxu1 %vm5438_vm12, %v3310_v33  ;;  %v5553_v41 = vsel %vm4942_vm1, 4294967295, %v5552_v41  ;;  %vm5439_vm12 = vcmask 596992   ;;  %vm5575_vm13 = vmmov %vm5574_vm7  ;;  %vm5576_vm14 = vcmask 1041408   ;;  %vm5578_vm9 = vnez %v5472_v22 }
 0x5ae   : > { %3315 = vmatprep.subr.msk.bf16.mxu1 %vm4921_vm8, %v3313_v39  ;;  %3533 = vrot.lane.b32.xlu0 %v3522_v47, %s3738_s9  ;;  %v1617_v61 = vunpack.c.0.s8 %v1616_v58  ;;  %vm5577_vm0 = vmmov %vm5576_vm14  ;;  %vm5579_vm10 = vnez %v5474_v25 }
 0x5b0   : > { %v4985_v1 = vsub.s32 %v1617_v61, %v4060_v59  ;;  %v5558_v59 = vmov 0 }
 0x5b1   : > { %3318 = vmatpush1.bf16.msk.msra.mxu1 %vm4942_vm1, %v3316_v42  ;;  %vm5442_vm1 = vcmask 72704  }
 0x5b4   : > { %2952 = vmatmul.mubr.msk.f32.vlgmr.msra.gmra.mrb[8].mxu1 %vm5439_vm12, %v2933_v45  ;;  %vm5555_vm12 = vcmask 1040384  }
 0x5b5   : > { %2520 = vmatprep.mubr.f32.mxu1 %v3734_v16  ;;  %vm4965_vm4 = vmpackc.low %vm5555_vm12, %vm5554_vm11  ;;  %vm5001_vm12 = vcmp.lt.s32.totalorder %v305_v46, 256 }
 0x5b6   : > { %v5557_v53 = vsel %vm4965_vm4, 4294967295, %v5556_v53  ;;  %v5559_v59 = vsel %vm5001_vm12, 4294967295, %v5558_v59  ;;  %vm5565_vm11 = vmmov %vm5564_vm5 }
 0x618   : > { %v3524_v46 = vpop.permute.xlu0 %3523  ;;  %v3539_v19 = vpop.permute.xlu1 %3538 }
 0x619   : > { %v3526_v12 = vunpack.i.h.bf16 %v3524_v46  ;;  %v3525_v15 = vunpack.i.l.bf16 %v3524_v46  ;;  %v3541_v32 = vunpack.i.h.bf16 %v3539_v19  ;;  %v3540_v33 = vunpack.i.l.bf16 %v3539_v19 }
 0x61c   : > { %v3529_v11 = vpop.permute.xlu0 %3528 }
 0x61d   : > { %v3531_v23 = vunpack.i.h.bf16 %v3529_v11  ;;  %v3530_v24 = vunpack.i.l.bf16 %v3529_v11 }
 0x620   : > { %v3534_v18 = vpop.permute.xlu0 %3533 }
 0x621   : > { %v3536_v28 = vunpack.i.h.bf16 %v3534_v18  ;;  %v3535_v31 = vunpack.i.l.bf16 %v3534_v18 }
 0x623   : > { %v1881_v47 = vsel %vm5564_vm5, %v3536_v28, %v3535_v31  ;;  %vm5569_vm5 = vnez %v5490_v52 }
 0x624   : > { %v1886_v58 = vsel %vm5569_vm5, %v1881_v47, 0.0  ;;  %vm5580_vm5 = vcmask 1042432  }
 0x687   : > { %v1528_v49 = vpop.f32.mrb[8].mxu1 }
 0x688   : > { %v1533_v50 = vmax.f32 %v1528_v49, 0.0  ;;  %v1530_v51 = vpop.f32.mrb[9].mxu1  ;;  %v3544_v49 = vpop.permute.xlu1 %3543 }
 0x689   : > { %v1534_v4 = vmax.f32 %v1530_v51, 0.0  ;;  %v3546_v61 = vunpack.i.h.bf16 %v3544_v49 }
 0x68a   : > { %v3322_v55 = vpack.c.bf16 %v3745_v38, %v1533_v50 }
 0x68b   : > { %v3319_v54 = vpack.c.bf16 %v3745_v38, %v1534_v4 }
 0x68d   : > { %3321 = vmatprep.subr.msk.bf16.mxu0 %vm4965_vm4, %v3319_v54 }
 0x68e   : > { %3324 = vmatpush1.bf16.msk.msra.mxu0 %vm4965_vm4, %v3322_v55  ;;  %vm5562_vm4 = vcmask 121856  }
 0x68f   : > { %v1903_v42 = vsel %vm5562_vm4, %v3531_v23, %v3530_v24  ;;  %vm5563_vm8 = vmmov %vm5562_vm4  ;;  %vm5568_vm4 = vnez %v5488_v44 }
 0x690   : > { %v1906_v45 = vsel %vm5563_vm8, %v3530_v24, %v3531_v23  ;;  %vm5570_vm8 = vnez %v5476_v26 }
 0x691   : > { %2956 = vmatmul.mubr.msk.f32.vlgmr.msra.gmra.mrb[6].mxu0 %vm5442_vm1, %v2953_v56  ;;  %vm5560_vm1 = vcmask 130048   ;;  %v1907_v55 = vsel %vm5530_vm3, %v1906_v45, 0.0  ;;  %v1908_v56 = vsel %vm5529_vm2, %v1903_v42, 0.0 }
 0x692   : > { %1858 = vmatprep.mubr.f32.mxu0 %v3734_v16  ;;  %v1892_v14 = vsel %vm5560_vm1, %v3526_v12, %v3525_v15 }
 0x693   : > { %v1897_v39 = vsel %vm4661_vm6, %v1892_v14, 0.0 }
 0x694   : > { %v1967_v54 = vrot.slane %v1897_v39, 7 }
 0x764   : > { %v4980_v62 = vpop.f32.mrb[6].mxu0 }
 0x765   : > { %v4982_v0 = vpop.f32.mrb[7].mxu0 }
 0x766   : > { %v3552_v3 = vpack.i.bf16 %v4980_v62, %v4982_v0  ;;  %v3572_v5 = vpack.i.bf16 %v4982_v0, %v4980_v62  ;;  %v1614_v7 = vcombine.low %v4980_v62, %v4982_v0 }
 0x768   : > { %3553 = vrot.lane.b32.xlu0 %v3552_v3, %s3736_s30  ;;  %3548 = vrot.lane.b32.xlu1 %v3552_v3, %s3737_s8  ;;  %v1621_v9 = vrot.slane %v1614_v7, %v4985_v1  ;;  %v1973_v7 = vrot.slane %v1908_v56, 6 }
 0x76a   : > { %v1628_v10 = vrot.slane %v1621_v9, %v4985_v1 }
 0x76c   : > { %3563 = vrot.lane.b32.xlu0 %v3552_v3, %s3743_s15  ;;  %3558 = vrot.lane.b32.xlu1 %v3552_v3, %s3738_s9  ;;  %1634 = vst.msk [vmem:[%s304_s22] sm:$0x3] %vm5001_vm12, %v1628_v10  ;;  %vm5561_vm12 = vmmov %vm5560_vm1  ;;  %vm5566_vm1 = vcmask 7168   ;;  %v3545_v3 = vunpack.i.l.bf16 %v3544_v49 }
 0x76d   : > { %v1895_v17 = vsel %vm5561_vm12, %v3525_v15, %v3526_v12  ;;  %v1914_v50 = vsel %vm5566_vm1, %v3541_v32, %v3540_v33  ;;  %vm5567_vm12 = vmmov %vm5566_vm1  ;;  %vm5572_vm1 = vcmask 1040384  }
 0x76e   : > { %v1896_v37 = vsel %vm5524_vm15, %v1895_v17, 0.0  ;;  %v1917_v51 = vsel %vm5567_vm12, %v3540_v33, %v3541_v32  ;;  %vm5573_vm12 = vmmov %vm5572_vm1  ;;  %v1924_v12 = vsel %vm5574_vm7, %v3545_v3, %v3546_v61  ;;  %v1928_v15 = vsel %vm5575_vm13, %v3546_v61, %v3545_v3 }
 0x76f   : > { %v1966_v4 = vrot.slane %v1896_v37, 7  ;;  %v1918_v9 = vsel %vm5570_vm8, %v1917_v51, 0.0  ;;  %v2003_v11 = vsel %vm5573_vm12, %v1886_v58, %v1967_v54  ;;  %v1929_v14 = vsel %vm5578_vm9, %v1924_v12, 0.0 }
 0x770   : > { %3568 = vrot.lane.b32.xlu0 %v3542_v48, %s3741_s12  ;;  %3573 = vrot.lane.b32.xlu1 %v3572_v5, %s3739_s27  ;;  %v1978_v18 = vrot.slane %v1918_v9, 5  ;;  %v2005_v24 = vsel %vm5577_vm0, %v2003_v11, %v1973_v7  ;;  %v1930_v17 = vsel %vm5579_vm10, %v1928_v15, 0.0  ;;  %v1986_v32 = vrot.slane %v1929_v14, 3 }
 0x771   : > { %v1987_v33 = vrot.slane %v1930_v17, 3  ;;  %vm5455_vm7 = vcmask 1044480   ;;  %vm5582_vm13 = vcmask 1043456   ;;  %vm5584_vm0 = vcmask 121856  }
 0x772   : > { %vm5586_vm12 = vcmask 130048   ;;  %v1742_v7 = vrot.slane %v4980_v62, 4  ;;  %v1743_v9 = vrot.slane %v4982_v0, 4 }
 0x774   : > { %3593 = vrot.lane.b32.xlu0 %v3572_v5, %s3742_s14  ;;  %3578 = vrot.lane.b32.xlu1 %v3572_v5, %s3741_s12 }
 0x778   : > { %3583 = vrot.lane.b32.xlu1 %v3572_v5, %s3740_s10  ;;  %3598 = vrot.lane.b32.xlu0 %v3542_v48, %s3742_s14  ;;  %v1972_v5 = vrot.slane %v1907_v55, 6 }
 0x77c   : > { %3588 = vrot.lane.b32.xlu1 %v3542_v48, %s3740_s10  ;;  %v1884_v48 = vsel %vm5565_vm11, %v3535_v31, %v3536_v28  ;;  %vm5571_vm11 = vnez %v5478_v27 }
 0x77d   : > { %v1885_v57 = vsel %vm5568_vm4, %v1884_v48, 0.0  ;;  %v1919_v10 = vsel %vm5571_vm11, %v1914_v50, 0.0 }
 0x77e   : > { %v2002_v46 = vsel %vm5572_vm1, %v1885_v57, %v1966_v4  ;;  %v1979_v19 = vrot.slane %v1919_v10, 5  ;;  %vm5581_vm1 = vmmov %vm5580_vm5 }
 0x77f   : > { %v2004_v23 = vsel %vm5576_vm14, %v2002_v46, %v1972_v5  ;;  %vm5583_vm14 = vmmov %vm5582_vm13 }
 0x780   : > { %v2006_v28 = vsel %vm5580_vm5, %v2004_v23, %v1978_v18  ;;  %v2007_v31 = vsel %vm5581_vm1, %v2005_v24, %v1979_v19  ;;  %vm5585_vm5 = vmmov %vm5584_vm0 }
 0x781   : > { %v2008_v49 = vsel %vm5582_vm13, %v2006_v28, %v4135_v30  ;;  %v2009_v50 = vsel %vm5583_vm14, %v2007_v31, %v4131_v29  ;;  %vm5587_vm1 = vmmov %vm5586_vm12  ;;  %vm5588_vm13 = vcmask 7168  }
 0x782   : > { %v2010_v3 = vsel %vm5455_vm7, %v2008_v49, %v1986_v32  ;;  %v5071_v5 = vsel %vm5455_vm7, %v2009_v50, %v1987_v33  ;;  %vm5589_vm14 = vmmov %vm5588_vm13 }
 0x7da   : > { %v3554_v37 = vpop.permute.xlu0 %3553  ;;  %v3549_v39 = vpop.permute.xlu1 %3548 }
 0x7db   : > { %v3556_v42 = vunpack.i.h.bf16 %v3554_v37  ;;  %v3555_v45 = vunpack.i.l.bf16 %v3554_v37  ;;  %v3551_v47 = vunpack.i.h.bf16 %v3549_v39  ;;  %v3550_v48 = vunpack.i.l.bf16 %v3549_v39 }
 0x7dd   : > { %v1663_v51 = vsel %vm5584_vm0, %v3556_v42, %v3555_v45  ;;  %v1666_v4 = vsel %vm5585_vm5, %v3555_v45, %v3556_v42  ;;  %v1652_v54 = vsel %vm5586_vm12, %v3551_v47, %v3550_v48  ;;  %v1655_v55 = vsel %vm5587_vm1, %v3550_v48, %v3551_v47 }
 0x7de   : > { %v1667_v56 = vsel %vm5530_vm3, %v1666_v4, 0.0  ;;  %v1668_v57 = vsel %vm5529_vm2, %v1663_v51, 0.0  ;;  %v1656_v30 = vsel %vm5524_vm15, %v1655_v55, 0.0  ;;  %v1657_v29 = vsel %vm4661_vm6, %v1652_v54, 0.0  ;;  %v3564_v58 = vpop.permute.xlu0 %3563  ;;  %v3559_v61 = vpop.permute.xlu1 %3558 }
 0x7df   : > { %v3566_v10 = vunpack.i.h.bf16 %v3564_v58  ;;  %v3565_v46 = vunpack.i.l.bf16 %v3564_v58  ;;  %v3561_v11 = vunpack.i.h.bf16 %v3559_v61  ;;  %v3560_v12 = vunpack.i.l.bf16 %v3559_v61 }
 0x7e0   : > { %v1732_v15 = vrot.slane %v1667_v56, 6  ;;  %v1733_v18 = vrot.slane %v1668_v57, 6  ;;  %v1726_v19 = vrot.slane %v1656_v30, 7  ;;  %v1727_v23 = vrot.slane %v1657_v29, 7 }
 0x7e1   : > { %v1674_v24 = vsel %vm5588_vm13, %v3566_v10, %v3565_v46  ;;  %v1677_v14 = vsel %vm5589_vm14, %v3565_v46, %v3566_v10  ;;  %vm5590_vm0 = vcmask 138240   ;;  %vm5592_vm12 = vnez %v5490_v52 }
 0x7e2   : > { %v1641_v17 = vsel %vm5590_vm0, %v3561_v11, %v3560_v12  ;;  %vm5591_vm5 = vmmov %vm5590_vm0  ;;  %v3569_v31 = vpop.permute.xlu0 %3568  ;;  %v3574_v62 = vpop.permute.xlu1 %3573  ;;  %v1678_v0 = vsel %vm5570_vm8, %v1677_v14, 0.0  ;;  %v1679_v32 = vsel %vm5571_vm11, %v1674_v24, 0.0  ;;  %vm5593_vm1 = vcmask 1040384  }
 0x7e3   : > { %v1644_v28 = vsel %vm5591_vm5, %v3560_v12, %v3561_v11  ;;  %v1646_v37 = vsel %vm5592_vm12, %v1641_v17, 0.0  ;;  %v1738_v39 = vrot.slane %v1678_v0, 5  ;;  %v1739_v42 = vrot.slane %v1679_v32, 5  ;;  %vm5594_vm13 = vmmov %vm5593_vm1 }
 0x7e4   : > { %v1645_v33 = vsel %vm5568_vm4, %v1644_v28, 0.0  ;;  %v1765_v47 = vsel %vm5594_vm13, %v1646_v37, %v1727_v23  ;;  %vm5595_vm14 = vcmask 1041408   ;;  %v3571_v50 = vunpack.i.h.bf16 %v3569_v31 }
 0x7e5   : > { %v1764_v45 = vsel %vm5593_vm1, %v1645_v33, %v1726_v19  ;;  %vm5596_vm0 = vmmov %vm5595_vm14  ;;  %v3570_v51 = vunpack.i.l.bf16 %v3569_v31  ;;  %vm5597_vm5 = vcmask 1042432   ;;  %v3576_v55 = vunpack.i.h.bf16 %v3574_v62 }
 0x7e6   : > { %v1766_v48 = vsel %vm5595_vm14, %v1764_v45, %v1732_v15  ;;  %v1767_v49 = vsel %vm5596_vm0, %v1765_v47, %v1733_v18  ;;  %vm5598_vm7 = vmmov %vm5597_vm5  ;;  %v3575_v56 = vunpack.i.l.bf16 %v3574_v62  ;;  %v3579_v57 = vpop.permute.xlu1 %3578  ;;  %vm5599_vm8 = vcmask 924672   ;;  %v3594_v10 = vpop.permute.xlu0 %3593 }
 0x7e7   : > { %v1768_v4 = vsel %vm5597_vm5, %v1766_v48, %v1738_v39  ;;  %v1769_v54 = vsel %vm5598_vm7, %v1767_v49, %v1739_v42  ;;  %v1935_v30 = vsel %vm5599_vm8, %v3570_v51, %v3571_v50  ;;  %vm5600_vm11 = vmmov %vm5599_vm8  ;;  %vm5601_vm1 = vcmask 1043456  }
 0x7e8   : > { %v1939_v29 = vsel %vm5600_vm11, %v3571_v50, %v3570_v51  ;;  %v1770_v58 = vsel %vm5601_vm1, %v1768_v4, %v1742_v7  ;;  %vm5602_vm13 = vmmov %vm5601_vm1  ;;  %vm5603_vm14 = vnez %v5492_v60  ;;  %vm5604_vm0 = vnez %v5494_v63 }
 0x7e9   : > { %v1771_v61 = vsel %vm5602_vm13, %v1769_v54, %v1743_v9  ;;  %v1940_v46 = vsel %vm5603_vm14, %v1935_v30, 0.0  ;;  %v1941_v11 = vsel %vm5604_vm0, %v1939_v29, 0.0  ;;  %vm5605_vm5 = vcmask 1039360  }
 0x7ea   : > { %v1684_v12 = vsel %vm5605_vm5, %v3575_v56, %v3576_v55  ;;  %vm5606_vm7 = vmmov %vm5605_vm5  ;;  %v1992_v18 = vrot.slane %v1940_v46, 2  ;;  %v1993_v19 = vrot.slane %v1941_v11, 2  ;;  %v3596_v14 = vunpack.i.h.bf16 %v3594_v10  ;;  %v3584_v28 = vpop.permute.xlu1 %3583  ;;  %v3599_v49 = vpop.permute.xlu0 %3598 }
 0x7eb   : > { %v1688_v15 = vsel %vm5606_vm7, %v3576_v55, %v3575_v56  ;;  %v1689_v23 = vsel %vm5578_vm9, %v1684_v12, 0.0  ;;  %v3595_v17 = vunpack.i.l.bf16 %v3594_v10  ;;  %vm5607_vm11 = vcmask 1045504  }
 0x7ec   : > { %v1690_v7 = vsel %vm5579_vm10, %v1688_v15, 0.0  ;;  %v1748_v9 = vrot.slane %v1689_v23, 3  ;;  %v2012_v31 = vsel %vm5607_vm11, %v2010_v3, %v1992_v18  ;;  %v3581_v62 = vunpack.i.h.bf16 %v3579_v57  ;;  %vm5614_vm11 = vmmov %vm5599_vm8 }
 0x7ed   : > { %v1749_v24 = vrot.slane %v1690_v7, 3  ;;  %v3580_v0 = vunpack.i.l.bf16 %v3579_v57  ;;  %v3586_v32 = vunpack.i.h.bf16 %v3584_v28  ;;  %vm5608_vm1 = vcmask 1044480  }
 0x7ee   : > { %v1773_v33 = vsel %vm5608_vm1, %v1770_v58, %v1748_v9  ;;  %vm5609_vm13 = vmmov %vm5608_vm1  ;;  %vm5610_vm5 = vcmask 908288   ;;  %vm5612_vm9 = vnez %v5517_v2  ;;  %vm5613_vm10 = vnez %v5508_v6  ;;  %v3589_v55 = vpop.permute.xlu1 %3588  ;;  %v2965_v6 = vld [vmem:[%s5394_s5 + $0x50] sm:$0xff] }
 0x7ef   : > { %v1774_v37 = vsel %vm5609_vm13, %v1771_v61, %v1749_v24  ;;  %v1717_v39 = vsel %vm5610_vm5, %v3595_v17, %v3596_v14  ;;  %vm5611_vm7 = vmmov %vm5610_vm5  ;;  %v1695_v48 = vsel %vm5599_vm8, %v3580_v0, %v3581_v62  ;;  %v1699_v3 = vsel %vm5614_vm11, %v3581_v62, %v3580_v0 }
 0x7f0   : > { %v1721_v42 = vsel %vm5611_vm7, %v3596_v14, %v3595_v17  ;;  %v1722_v45 = vsel %vm5612_vm9, %v1717_v39, 0.0  ;;  %vm5615_vm3 = vcmask 1040384   ;;  %v1700_v4 = vsel %vm5603_vm14, %v1695_v48, 0.0 }
 0x7f1   : > { %v1723_v47 = vsel %vm5613_vm10, %v1721_v42, 0.0  ;;  %v1780_v50 = vsel %vm5615_vm3, %v1722_v45, 1.0  ;;  %vm5616_vm1 = vmmov %vm5615_vm3  ;;  %v1701_v54 = vsel %vm5604_vm0, %v1699_v3, 0.0  ;;  %v1754_v56 = vrot.slane %v1700_v4, 2 }
 0x7f2   : > { %v1781_v51 = vsel %vm5616_vm1, %v1723_v47, 1.0  ;;  %v1755_v57 = vrot.slane %v1701_v54, 2  ;;  %v3585_v30 = vunpack.i.l.bf16 %v3584_v28  ;;  %v3591_v29 = vunpack.i.h.bf16 %v3589_v55 }
 0x7f3   : > { %v3590_v58 = vunpack.i.l.bf16 %v3589_v55  ;;  %v3601_v61 = vunpack.i.h.bf16 %v3599_v49  ;;  %v3600_v10 = vunpack.i.l.bf16 %v3599_v49  ;;  %vm5617_vm8 = vcmask 1045504  }
 0x7f4   : > { %v2013_v46 = vsel %vm5617_vm8, %v5071_v5, %v1993_v19  ;;  %vm5618_vm3 = vmmov %vm5617_vm8  ;;  %vm5619_vm13 = vcmask 916480   ;;  %vm5622_vm11 = vnez %v5480_v34  ;;  %vm5623_vm1 = vnez %v5486_v43 }
 0x7f5   : > { %v1775_v11 = vsel %vm5618_vm3, %v1773_v33, %v1754_v56  ;;  %v1706_v12 = vsel %vm5619_vm13, %v3585_v30, %v3586_v32  ;;  %vm5620_vm5 = vmmov %vm5619_vm13  ;;  %vm5626_vm8 = vcmask 908288   ;;  %vm5628_vm13 = vcmask 1046528   ;;  %v2957_v56 = vld [vmem:[%s5394_s5 + $0x30] sm:$0xff] }
 0x7f6   : > { %v1710_v15 = vsel %vm5620_vm5, %v3586_v32, %v3585_v30  ;;  %vm5621_vm7 = vmmov %vm5618_vm3  ;;  %v1711_v23 = vsel %vm5622_vm11, %v1706_v12, 0.0  ;;  %v1957_v0 = vsel %vm5626_vm8, %v3600_v10, %v3601_v61 }
 0x7f7   : > { %v1776_v18 = vsel %vm5621_vm7, %v1774_v37, %v1755_v57  ;;  %v1712_v7 = vsel %vm5623_vm1, %v1710_v15, 0.0  ;;  %vm5624_vm14 = vmmov %vm5620_vm5  ;;  %v1760_v14 = vrot.slane %v1711_v23, 1  ;;  %v1962_v37 = vsel %vm5612_vm9, %v1957_v0, 0.0 }
 0x7f8   : > { %v1946_v9 = vsel %vm5624_vm14, %v3590_v58, %v3591_v29  ;;  %vm5625_vm0 = vmmov %vm5620_vm5  ;;  %v1761_v5 = vrot.slane %v1712_v7, 1  ;;  %vm5631_vm5 = vcmask 1041408   ;;  %v2966_v7 = vld [vmem:[%s5394_s5 + $0x58] sm:$0xff] }
 0x7f9   : > { %v1950_v24 = vsel %vm5625_vm0, %v3591_v29, %v3590_v58  ;;  %v1951_v19 = vsel %vm5622_vm11, %v1946_v9, 0.0  ;;  %vm5627_vm3 = vmmov %vm5626_vm8  ;;  %v1778_v33 = vsel %vm5628_vm13, %v1775_v11, %v1760_v14  ;;  %vm5630_vm0 = vmmov 1  }
 0x7fa   : > { %v1952_v17 = vsel %vm5623_vm1, %v1950_v24, 0.0  ;;  %v1998_v28 = vrot.slane %v1951_v19, 1  ;;  %v1961_v32 = vsel %vm5627_vm3, %v3601_v61, %v3600_v10  ;;  %vm5629_vm14 = vmmov %vm5628_vm13  ;;  %vm5633_vm1 = vcmask 1040384  }
 0x7fb   : > { %v1999_v62 = vrot.slane %v1952_v17, 1  ;;  %v1963_v39 = vsel %vm5613_vm10, %v1961_v32, 0.0  ;;  %v1779_v42 = vsel %vm5629_vm14, %v1776_v18, %v1761_v5  ;;  %vm3326_vm7 = vmpackc.low %vm5631_vm5, %vm5630_vm0  ;;  %v2016_v47 = vsel %vm5633_vm1, %v1962_v37, 1.0 }
 0x7fc   : > { %vm5632_vm11 = vmmov %vm5628_vm13  ;;  %v3325_v3 = vpack.c.bf16 %v1781_v51, %v1779_v42  ;;  %v3328_v49 = vpack.c.bf16 %v1780_v50, %v1778_v33  ;;  %vm1784_vm13 = vcmask 80896  }
 0x7fd   : > { %v2014_v45 = vsel %vm5632_vm11, %v2012_v31, %v1998_v28  ;;  %vm5634_vm8 = vmmov %vm5633_vm1  ;;  %v2961_v31 = vld [vmem:[%s5394_s5 + $0x40] sm:$0xff] }
 0x7fe   : > { %v2017_v48 = vsel %vm5634_vm8, %v1963_v39, 1.0  ;;  %vm5635_vm3 = vmmov %vm5632_vm11  ;;  %3327 = vmatprep.subr.msk.bf16.mxu0 %vm3326_vm7, %v3325_v3  ;;  %v3334_v55 = vpack.c.bf16 %v2016_v47, %v2014_v45  ;;  %vm5636_vm11 = vcmask 138240  }
 0x7ff   : > { %v2015_v4 = vsel %vm5635_vm3, %v2013_v46, %v1999_v62  ;;  %3330 = vmatpush1.bf16.msk.msra.mxu0 %vm3326_vm7, %v3328_v49  ;;  %vm5637_vm1 = vmmov %vm5636_vm11  ;;  %vm5641_vm3 = vcmask 130048  }
 0x800   : > { %v3331_v54 = vpack.c.bf16 %v2017_v48, %v2015_v4  ;;  %vm5638_vm14 = vmmov %vm5637_vm1 }
 0x801   : > { %vm5639_vm0 = vmmov %vm5637_vm1 }
 0x802   : > { %3333 = vmatprep.subr.msk.bf16.mxu0 %vm3326_vm7, %v3331_v54  ;;  %2960 = vmatmul.mubr.msk.f32.vlgmr.msra.gmra.mrb[8].mxu0 %vm1784_vm13, %v2957_v56  ;;  %vm5640_vm5 = vmmov %vm5639_vm0 }
 0x803   : > { %3336 = vmatpush1.bf16.msk.msra.mxu0 %vm3326_vm7, %v3334_v55  ;;  %2093 = vmatprep.mubr.f32.mxu0 %v3734_v16  ;;  %vm3338_vm7 = vmpackc.low %vm5592_vm12, %vm5592_vm12 }
 0x804   : > { %vm3341_vm8 = vmpackc.low %vm5568_vm4, %vm5568_vm4 }
 0x806   : > { %2964 = vmatmul.mubr.msk.f32.vlgmr.msra.gmra.mrb[10].mxu0 %vm1784_vm13, %v2961_v31  ;;  %vm5642_vm13 = vmmov %vm5641_vm3 }
 0x807   : > { %3001 = vmatprep.mubr.msk.f32.mxu0 %vm5636_vm11, %v2966_v7  ;;  %vm5643_vm11 = vmmov %vm5641_vm3 }
 0x8d5   : > { %v1860_v50 = vpop.f32.mrb[8].mxu0 }
 0x8d6   : > { %v5161_v51 = vmax.f32 %v1860_v50, 0.0  ;;  %v1862_v57 = vpop.f32.mrb[9].mxu0 }
 0x8d7   : > { %v5163_v30 = vmax.f32 %v1862_v57, 0.0 }
 0x8d9   : > { %v2095_v29 = vpop.f32.mrb[10].mxu0  ;;  %v3642_v58 = vpack.i.bf16 %v5163_v30, %v5161_v51 }
 0x8da   : > { %v5167_v61 = vmax.f32 %v2095_v29, 0.0  ;;  %v2097_v10 = vpop.f32.mrb[11].mxu0 }
 0x8db   : > { %v5169_v46 = vmax.f32 %v2097_v10, 0.0 }
 0x8dc   : > { %v3602_v11 = vpack.i.bf16 %v5167_v61, %v5161_v51  ;;  %v3363_v23 = vpack.c.bf16 %v5167_v61, %v5161_v51 }
 0x8dd   : > { %v3617_v12 = vpack.i.bf16 %v5169_v46, %v5163_v30  ;;  %v3662_v15 = vpack.i.bf16 %v5169_v46, %v5167_v61  ;;  %v3361_v18 = vpack.c.bf16 %v5169_v46, %v5163_v30 }
 0x8de   : > { %3603 = vrot.lane.b32.xlu0 %v3602_v11, %s3738_s9 }
 0x8df   : > { %3618 = vrot.lane.b32.xlu1 %v3617_v12, %s3738_s9 }
 0x8e2   : > { %3608 = vrot.lane.b32.xlu0 %v3602_v11, %s3737_s8 }
 0x8e3   : > { %3623 = vrot.lane.b32.xlu1 %v3617_v12, %s3737_s8 }
 0x8e6   : > { %3613 = vrot.lane.b32.xlu0 %v3602_v11, %s3736_s30 }
 0x8e7   : > { %3628 = vrot.lane.b32.xlu1 %v3617_v12, %s3736_s30 }
 0x8ea   : > { %3638 = vrot.lane.b32.xlu0 %v3602_v11, %s3743_s15 }
 0x8eb   : > { %3633 = vrot.lane.b32.xlu1 %v3617_v12, %s3743_s15 }
 0x8ee   : > { %3663 = vrot.lane.b32.xlu0 %v3662_v15, %s3739_s27 }
 0x8ef   : > { %3643 = vrot.lane.b32.xlu1 %v3642_v58, %s3739_s27 }
 0x8f2   : > { %3668 = vrot.lane.b32.xlu0 %v3662_v15, %s3741_s12 }
 0x8f3   : > { %3648 = vrot.lane.b32.xlu1 %v3642_v58, %s3741_s12 }
 0x8f6   : > { %3673 = vrot.lane.b32.xlu0 %v3662_v15, %s3740_s10 }
 0x8f7   : > { %3653 = vrot.lane.b32.xlu1 %v3642_v58, %s3740_s10 }
 0x8fa   : > { %3678 = vrot.lane.b32.xlu0 %v3662_v15, %s3742_s14 }
 0x8fb   : > { %3658 = vrot.lane.b32.xlu1 %v3642_v58, %s3742_s14 }
 0x950   : > { %v3604_v9 = vpop.permute.xlu0 %3603 }
 0x951   : > { %v3606_v24 = vunpack.i.h.bf16 %v3604_v9  ;;  %v3605_v14 = vunpack.i.l.bf16 %v3604_v9  ;;  %v3619_v5 = vpop.permute.xlu1 %3618 }
 0x952   : > { %v3621_v19 = vunpack.i.h.bf16 %v3619_v5  ;;  %v3620_v17 = vunpack.i.l.bf16 %v3619_v5 }
 0x954   : > { %v2117_v28 = vsel %vm5637_vm1, %v3606_v24, %v3621_v19  ;;  %v2123_v62 = vsel %vm5638_vm14, %v3621_v19, %v3606_v24  ;;  %v2116_v0 = vsel %vm5639_vm0, %v3605_v14, %v3620_v17  ;;  %v2122_v32 = vsel %vm5640_vm5, %v3620_v17, %v3605_v14  ;;  %v3609_v33 = vpop.permute.xlu0 %3608  ;;  %vm5644_vm1 = vmmov %vm5641_vm3 }
 0x955   : > { %v3337_v37 = vpack.c.bf16 %v2117_v28, %v2116_v0  ;;  %v3340_v39 = vpack.c.bf16 %v2123_v62, %v2122_v32  ;;  %v3611_v42 = vunpack.i.h.bf16 %v3609_v33  ;;  %v3610_v45 = vunpack.i.l.bf16 %v3609_v33  ;;  %v3624_v47 = vpop.permute.xlu1 %3623  ;;  %vm3344_vm14 = vmpackc.low %vm4661_vm6, %vm4661_vm6 }
 0x956   : > { %v3626_v48 = vunpack.i.h.bf16 %v3624_v47  ;;  %v3625_v3 = vunpack.i.l.bf16 %v3624_v47  ;;  %vm3347_vm0 = vmpackc.low %vm5524_vm15, %vm5524_vm15  ;;  %vm5645_vm5 = vcmask 121856  }
 0x957   : > { %3339 = vmatprep.subr.msk.bf16.mxu0 %vm3338_vm7, %v3337_v37  ;;  %vm5646_vm7 = vmmov %vm5645_vm5 }
 0x958   : > { %v2139_v49 = vsel %vm5641_vm3, %v3611_v42, %v3626_v48  ;;  %v2145_v4 = vsel %vm5642_vm13, %v3626_v48, %v3611_v42  ;;  %v2138_v54 = vsel %vm5643_vm11, %v3610_v45, %v3625_v3  ;;  %v2144_v55 = vsel %vm5644_vm1, %v3625_v3, %v3610_v45  ;;  %v3614_v56 = vpop.permute.xlu0 %3613  ;;  %3342 = vmatpush1.bf16.msk.msra.mxu0 %vm3341_vm8, %v3340_v39  ;;  %vm5647_vm8 = vmmov %vm5645_vm5 }
 0x959   : > { %v3343_v31 = vpack.c.bf16 %v2139_v49, %v2138_v54  ;;  %v3346_v50 = vpack.c.bf16 %v2145_v4, %v2144_v55  ;;  %v3616_v57 = vunpack.i.h.bf16 %v3614_v56  ;;  %v3615_v29 = vunpack.i.l.bf16 %v3614_v56  ;;  %v3629_v58 = vpop.permute.xlu1 %3628  ;;  %vm5648_vm3 = vmmov %vm5645_vm5 }
 0x95a   : > { %v3631_v10 = vunpack.i.h.bf16 %v3629_v58  ;;  %v3630_v11 = vunpack.i.l.bf16 %v3629_v58  ;;  %vm3350_vm13 = vmpackc.low %vm5529_vm2, %vm5529_vm2  ;;  %vm5649_vm11 = vnez %v5482_v35 }
 0x95b   : > { %3345 = vmatprep.subr.msk.bf16.mxu0 %vm3344_vm14, %v3343_v31  ;;  %vm3353_vm1 = vmpackc.low %vm5649_vm11, %vm5649_vm11  ;;  %vm5650_vm14 = vcmask 7168  }
 0x95c   : > { %v2161_v12 = vsel %vm5645_vm5, %v3616_v57, %v3631_v10  ;;  %v2167_v15 = vsel %vm5646_vm7, %v3631_v10, %v3616_v57  ;;  %v2160_v7 = vsel %vm5647_vm8, %v3615_v29, %v3630_v11  ;;  %v2166_v9 = vsel %vm5648_vm3, %v3630_v11, %v3615_v29  ;;  %v3639_v24 = vpop.permute.xlu0 %3638  ;;  %3348 = vmatpush1.bf16.msk.msra.mxu0 %vm3347_vm0, %v3346_v50  ;;  %vm5651_vm5 = vmmov %vm5650_vm14 }
 0x95d   : > { %v3349_v14 = vpack.c.bf16 %v2161_v12, %v2160_v7  ;;  %v3352_v5 = vpack.c.bf16 %v2167_v15, %v2166_v9  ;;  %v3641_v19 = vunpack.i.h.bf16 %v3639_v24  ;;  %v3640_v17 = vunpack.i.l.bf16 %v3639_v24  ;;  %v3634_v28 = vpop.permute.xlu1 %3633  ;;  %vm5652_vm0 = vmmov %vm5651_vm5 }
 0x95e   : > { %v3636_v62 = vunpack.i.h.bf16 %v3634_v28  ;;  %v3635_v0 = vunpack.i.l.bf16 %v3634_v28  ;;  %vm5653_vm7 = vmmov %vm5652_vm0  ;;  %vm5654_vm8 = vnez %v5478_v27 }
 0x95f   : > { %3351 = vmatprep.subr.msk.bf16.mxu0 %vm3350_vm13, %v3349_v14  ;;  %vm3356_vm3 = vmpackc.low %vm5654_vm8, %vm5654_vm8  ;;  %vm5655_vm13 = vnez %v5476_v26 }
 0x960   : > { %v2183_v32 = vsel %vm5650_vm14, %v3641_v19, %v3636_v62  ;;  %v2189_v33 = vsel %vm5651_vm5, %v3636_v62, %v3641_v19  ;;  %v2182_v37 = vsel %vm5652_vm0, %v3640_v17, %v3635_v0  ;;  %v2188_v39 = vsel %vm5653_vm7, %v3635_v0, %v3640_v17  ;;  %v3664_v42 = vpop.permute.xlu0 %3663  ;;  %3354 = vmatpush1.bf16.msk.msra.mxu0 %vm3353_vm1, %v3352_v5  ;;  %vm3359_vm14 = vmpackc.low %vm5655_vm13, %vm5655_vm13 }
 0x961   : > { %v3355_v45 = vpack.c.bf16 %v2183_v32, %v2182_v37  ;;  %v3358_v47 = vpack.c.bf16 %v2189_v33, %v2188_v39  ;;  %v3666_v48 = vunpack.i.h.bf16 %v3664_v42  ;;  %v3665_v3 = vunpack.i.l.bf16 %v3664_v42  ;;  %v3644_v49 = vpop.permute.xlu1 %3643 }
 0x962   : > { %v3646_v4 = vunpack.i.h.bf16 %v3644_v49  ;;  %v3645_v54 = vunpack.i.l.bf16 %v3644_v49  ;;  %vm5656_vm5 = vcmask 1039360   ;;  %vm5658_vm1 = vnez %v5474_v25 }
 0x963   : > { %3357 = vmatprep.subr.msk.bf16.mxu0 %vm3356_vm3, %v3355_v45  ;;  %v2211_v55 = vsel %vm5656_vm5, %v3666_v48, %v3665_v3  ;;  %vm5657_vm0 = vmmov %vm5656_vm5  ;;  %vm5666_vm13 = vcmask 916480  }
 0x964   : > { %v2210_v56 = vsel %vm5657_vm0, %v3646_v4, %v3645_v54  ;;  %v3669_v31 = vpop.permute.xlu0 %3668  ;;  %3360 = vmatpush1.bf16.msk.msra.mxu0 %vm3359_vm14, %v3358_v47  ;;  %vm3366_vm7 = vmpackc.low %vm5658_vm1, %vm5658_vm1  ;;  %vm5663_vm1 = vnez %v5472_v22 }
 0x965   : > { %v3671_v50 = vunpack.i.h.bf16 %v3669_v31  ;;  %v3670_v57 = vunpack.i.l.bf16 %v3669_v31  ;;  %v3649_v29 = vpop.permute.xlu1 %3648  ;;  %3362 = vmatprep.subr.bf16.mxu0 %v3361_v18  ;;  %vm5659_vm3 = vmmov %vm5657_vm0  ;;  %v3365_v15 = vpack.c.bf16 %v2211_v55, %v2210_v56 }
 0x966   : > { %v3651_v58 = vunpack.i.h.bf16 %v3649_v29  ;;  %v3650_v10 = vunpack.i.l.bf16 %v3649_v29  ;;  %v2203_v11 = vsel %vm5659_vm3, %v3665_v3, %v3666_v48  ;;  %vm5660_vm5 = vmmov %vm5657_vm0  ;;  %vm5661_vm0 = vcmask 924672  }
 0x967   : > { %v2202_v12 = vsel %vm5660_vm5, %v3645_v54, %v3646_v4  ;;  %v2233_v7 = vsel %vm5661_vm0, %v3671_v50, %v3670_v57  ;;  %vm5662_vm14 = vmmov %vm5661_vm0  ;;  %vm5664_vm5 = vnez %v5494_v63 }
 0x968   : > { %v2232_v9 = vsel %vm5662_vm14, %v3651_v58, %v3650_v10  ;;  %v3674_v24 = vpop.permute.xlu0 %3673  ;;  %3364 = vmatpush1.bf16.msra.mxu0 %v3363_v23  ;;  %vm3369_vm3 = vmpackc.low %vm5663_vm1, %vm5663_vm1  ;;  %v3368_v25 = vpack.c.bf16 %v2203_v11, %v2202_v12  ;;  %v2225_v19 = vsel %vm5662_vm14, %v3670_v57, %v3671_v50 }
 0x969   : > { %v3676_v30 = vunpack.i.h.bf16 %v3674_v24  ;;  %v3675_v46 = vunpack.i.l.bf16 %v3674_v24  ;;  %v3654_v18 = vpop.permute.xlu1 %3653  ;;  %3367 = vmatprep.subr.msk.bf16.mxu0 %vm3366_vm7, %v3365_v15  ;;  %vm3372_vm0 = vmpackc.low %vm5664_vm5, %vm5664_vm5  ;;  %v3371_v61 = vpack.c.bf16 %v2233_v7, %v2232_v9  ;;  %vm5668_vm7 = vnez %v5492_v60 }
 0x96a   : > { %v3656_v14 = vunpack.i.h.bf16 %v3654_v18  ;;  %v3655_v5 = vunpack.i.l.bf16 %v3654_v18  ;;  %vm5665_vm11 = vmmov %vm5662_vm14 }
 0x96b   : > { %v2224_v51 = vsel %vm5665_vm11, %v3650_v10, %v3651_v58  ;;  %v2255_v23 = vsel %vm5666_vm13, %v3676_v30, %v3675_v46  ;;  %vm5667_vm2 = vmmov %vm5666_vm13  ;;  %vm5669_vm11 = vnez %v5486_v43 }
 0x96c   : > { %v2254_v17 = vsel %vm5667_vm2, %v3656_v14, %v3655_v5  ;;  %v3679_v28 = vpop.permute.xlu0 %3678  ;;  %3370 = vmatpush1.bf16.msk.msra.mxu0 %vm3369_vm3, %v3368_v25  ;;  %vm3375_vm1 = vmpackc.low %vm5668_vm7, %vm5668_vm7  ;;  %v3374_v32 = vpack.c.bf16 %v2225_v19, %v2224_v51  ;;  %v2246_v42 = vsel %vm5667_vm2, %v3655_v5, %v3656_v14  ;;  %vm5671_vm3 = vcmask 908288  }
 0x96d   : > { %v3681_v22 = vunpack.i.h.bf16 %v3679_v28  ;;  %v3680_v62 = vunpack.i.l.bf16 %v3679_v28  ;;  %v3659_v0 = vpop.permute.xlu1 %3658  ;;  %3373 = vmatprep.subr.msk.bf16.mxu0 %vm3372_vm0, %v3371_v61  ;;  %vm3378_vm14 = vmpackc.low %vm5669_vm11, %vm5669_vm11  ;;  %v3377_v45 = vpack.c.bf16 %v2255_v23, %v2254_v17  ;;  %vm5673_vm0 = vnez %v5480_v34 }
 0x96e   : > { %v3661_v33 = vunpack.i.h.bf16 %v3659_v0  ;;  %v3660_v37 = vunpack.i.l.bf16 %v3659_v0  ;;  %vm5670_vm13 = vmmov %vm5667_vm2  ;;  %vm5683_vm2 = vcmask 7168  }
 0x96f   : > { %v2247_v39 = vsel %vm5670_vm13, %v3675_v46, %v3676_v30  ;;  %v2277_v47 = vsel %vm5671_vm3, %v3681_v22, %v3680_v62  ;;  %vm5672_vm5 = vmmov %vm5671_vm3 }
 0x970   : > { %v2276_v48 = vsel %vm5672_vm5, %v3661_v33, %v3660_v37  ;;  %3376 = vmatpush1.bf16.msk.msra.mxu0 %vm3375_vm1, %v3374_v32  ;;  %vm3381_vm7 = vmpackc.low %vm5673_vm0, %vm5673_vm0  ;;  %v3380_v3 = vpack.c.bf16 %v2247_v39, %v2246_v42  ;;  %vm5676_vm1 = vcmask 1040384  }
 0x971   : > { %3379 = vmatprep.subr.msk.bf16.mxu0 %vm3378_vm14, %v3377_v45  ;;  %vm3384_vm11 = vmpackc.low %vm5613_vm10, %vm5613_vm10  ;;  %v3383_v54 = vpack.c.bf16 %v2277_v47, %v2276_v48 }
 0x972   : > { %vm5674_vm8 = vmmov %vm5671_vm3 }
 0x973   : > { %v2269_v49 = vsel %vm5674_vm8, %v3680_v62, %v3681_v22  ;;  %vm5675_vm13 = vmmov %vm5671_vm3 }
 0x974   : > { %v2268_v4 = vsel %vm5675_vm13, %v3660_v37, %v3661_v33  ;;  %3382 = vmatpush1.bf16.msk.msra.mxu0 %vm3381_vm7, %v3380_v3  ;;  %vm3387_vm5 = vmpackc.low %vm5612_vm9, %vm5612_vm9  ;;  %vm5678_vm9 = vcmask 130048   ;;  %vm5680_vm7 = vcmask 138240   ;;  %vm5685_vm13 = vcmask 121856  }
 0x975   : > { %3385 = vmatprep.subr.msk.bf16.mxu0 %vm3384_vm11, %v3383_v54  ;;  %v3386_v55 = vpack.c.bf16 %v2269_v49, %v2268_v4  ;;  %vm5677_vm10 = vmmov %vm5676_vm1 }
 0x976   : > { %vm5679_vm8 = vmmov %vm5678_vm9 }
 0x977   : > { %vm5681_vm11 = vmmov %vm5680_vm7 }
 0x978   : > { %3388 = vmatpush1.bf16.msk.msra.mxu0 %vm3387_vm5, %v3386_v55  ;;  %vm5682_vm14 = vmpackc.low %vm4661_vm6, %vm5592_vm12  ;;  %vm5688_vm6 = vnez %v5478_v27  ;;  %vm5689_vm12 = vnez %v5484_v40 }
 0x979   : > { %2999 = vmatprep.subr.msk.mxu0 %vm5676_vm1, %v3745_v38  ;;  %vm5684_vm3 = vmmov %vm5683_vm2 }
 0x97a   : > { %vm5686_vm5 = vmmov %vm5685_vm13 }
 0x97b   : > { %vm5687_vm1 = vmpackc.low %vm5524_vm15, %vm5568_vm4  ;;  %vm5693_vm15 = vnez %v5476_v26  ;;  %vm5694_vm4 = vnez %v5482_v35 }
 0x97c   : > { %3000 = vmatpush1.msk.msra.mxu0 %vm5677_vm10, %v3745_v38  ;;  %vm5690_vm10 = vmpackc.low %vm5688_vm6, %vm5689_vm12  ;;  %vm5704_vm12 = vnez %v5486_v43  ;;  %v3002_v43 = vld [vmem:[%s5394_s5 + $0x60] sm:$0xff] }
 0x97d   : > { %2353 = vmatmul.mubr.f32.vlgmr.msra.gmra.mrb[12].mxu0 %v2965_v6 }
 0xa50   : > { %v2354_v56 = vpop.f32.mrb[12].mxu0 }
 0xa51   : > { %v5294_v31 = vmax.f32 %v2354_v56, 0.0  ;;  %v2356_v50 = vpop.f32.mrb[13].mxu0 }
 0xa52   : > { %v2360_v2 = vmax.f32 %v2356_v50, 0.0 }
 0xa54   : > { %v3687_v57 = vpack.i.bf16 %v5294_v31, %v2360_v2  ;;  %v3707_v29 = vpack.i.bf16 %v2360_v2, %v5294_v31 }
 0xa56   : > { %3688 = vrot.lane.b32.xlu0 %v3687_v57, %s3737_s8  ;;  %3683 = vrot.lane.b32.xlu1 %v3687_v57, %s3738_s9 }
 0xa5a   : > { %3698 = vrot.lane.b32.xlu0 %v3687_v57, %s3743_s15  ;;  %3693 = vrot.lane.b32.xlu1 %v3687_v57, %s3736_s30 }
 0xa5e   : > { %3708 = vrot.lane.b32.xlu0 %v3707_v29, %s3741_s12  ;;  %3703 = vrot.lane.b32.xlu1 %v3707_v29, %s3739_s27 }
 0xa62   : > { %3718 = vrot.lane.b32.xlu0 %v3707_v29, %s3742_s14  ;;  %3713 = vrot.lane.b32.xlu1 %v3707_v29, %s3740_s10  ;;  %s300_s14 = scalar_lea.vmem %s5395_s6, %s4073_s11 }
 0xac8   : > { %v3689_v58 = vpop.permute.xlu0 %3688  ;;  %v3684_v10 = vpop.permute.xlu1 %3683 }
 0xac9   : > { %v3691_v11 = vunpack.i.h.bf16 %v3689_v58  ;;  %v3690_v12 = vunpack.i.l.bf16 %v3689_v58  ;;  %v3686_v15 = vunpack.i.h.bf16 %v3684_v10  ;;  %v3685_v7 = vunpack.i.l.bf16 %v3684_v10 }
 0xacb   : > { %v2379_v9 = vsel %vm5678_vm9, %v3691_v11, %v3690_v12  ;;  %v2382_v24 = vsel %vm5679_vm8, %v3690_v12, %v3691_v11  ;;  %v2368_v30 = vsel %vm5680_vm7, %v3686_v15, %v3685_v7  ;;  %v2371_v46 = vsel %vm5681_vm11, %v3685_v7, %v3686_v15  ;;  %vm5695_vm7 = vmpackc.low %vm5693_vm15, %vm5694_vm4 }
 0xacc   : > { %v3389_v18 = vpack.c.bf16 %v2379_v9, %v2368_v30  ;;  %v3392_v25 = vpack.c.bf16 %v2382_v24, %v2371_v46  ;;  %v3699_v14 = vpop.permute.xlu0 %3698  ;;  %v3694_v5 = vpop.permute.xlu1 %3693  ;;  %vm5691_vm9 = vcmask 1039360   ;;  %vm5696_vm11 = vcmask 924672  }
 0xacd   : > { %v3701_v19 = vunpack.i.h.bf16 %v3699_v14  ;;  %v3700_v51 = vunpack.i.l.bf16 %v3699_v14  ;;  %v3696_v61 = vunpack.i.h.bf16 %v3694_v5  ;;  %v3695_v23 = vunpack.i.l.bf16 %v3694_v5  ;;  %vm5692_vm8 = vmmov %vm5691_vm9 }
 0xace   : > { %3391 = vmatprep.subr.msk.bf16.mxu1 %vm5682_vm14, %v3389_v18  ;;  %vm5697_vm14 = vnez %v5535_v8  ;;  %vm5709_vm4 = vnez %v5548_v36 }
 0xacf   : > { %v2401_v17 = vsel %vm5683_vm2, %v3701_v19, %v3700_v51  ;;  %v2404_v28 = vsel %vm5684_vm3, %v3700_v51, %v3701_v19  ;;  %v2390_v22 = vsel %vm5685_vm13, %v3696_v61, %v3695_v23  ;;  %v2393_v62 = vsel %vm5686_vm5, %v3695_v23, %v3696_v61  ;;  %3394 = vmatpush1.bf16.msk.msra.mxu1 %vm5687_vm1, %v3392_v25  ;;  %vm5698_vm2 = vmmov %vm5696_vm11 }
 0xad0   : > { %v3395_v0 = vpack.c.bf16 %v2401_v17, %v2390_v22  ;;  %v3398_v21 = vpack.c.bf16 %v2404_v28, %v2393_v62  ;;  %v3709_v32 = vpop.permute.xlu0 %3708  ;;  %v3704_v52 = vpop.permute.xlu1 %3703  ;;  %vm5699_vm3 = vcmask 908288   ;;  %vm5700_vm13 = vcmask 916480  }
 0xad1   : > { %v3706_v33 = vunpack.i.h.bf16 %v3704_v52  ;;  %v3705_v37 = vunpack.i.l.bf16 %v3704_v52  ;;  %v3711_v39 = vunpack.i.h.bf16 %v3709_v32  ;;  %v3710_v42 = vunpack.i.l.bf16 %v3709_v32  ;;  %vm5701_vm5 = vmmov %vm5700_vm13 }
 0xad2   : > { %3397 = vmatprep.subr.msk.bf16.mxu1 %vm5690_vm10, %v3395_v0  ;;  %vm5702_vm1 = vnez %v5537_v13  ;;  %vm5703_vm6 = vmmov %vm5699_vm3  ;;  %vm5705_vm10 = vnez %v5494_v63 }
 0xad3   : > { %v2411_v20 = vsel %vm5691_vm9, %v3705_v37, %v3706_v33  ;;  %v2415_v44 = vsel %vm5692_vm8, %v3706_v33, %v3705_v37  ;;  %3400 = vmatpush1.bf16.msk.msra.mxu1 %vm5695_vm7, %v3398_v21  ;;  %v2422_v54 = vsel %vm5696_vm11, %v3710_v42, %v3711_v39  ;;  %v2426_v26 = vsel %vm5698_vm2, %v3711_v39, %v3710_v42  ;;  %vm5706_vm9 = vmpackc.low %vm5704_vm12, %vm5705_vm10 }
 0xad4   : > { %v3401_v45 = vpack.c.bf16 %v2415_v44, %v2360_v2  ;;  %v3404_v47 = vpack.c.bf16 %v2411_v20, %v5294_v31  ;;  %v3719_v48 = vpop.permute.xlu0 %3718  ;;  %v3714_v3 = vpop.permute.xlu1 %3713  ;;  %vm5707_vm8 = vnez %v5492_v60  ;;  %vm5710_vm7 = vnez %v5553_v41  ;;  %v3022_v41 = vld [vmem:[%s5394_s5 + $0x70] sm:$0xff] }
 0xad5   : > { %v3721_v27 = vunpack.i.h.bf16 %v3719_v48  ;;  %v3720_v49 = vunpack.i.l.bf16 %v3719_v48  ;;  %v3716_v40 = vunpack.i.h.bf16 %v3714_v3  ;;  %v3715_v4 = vunpack.i.l.bf16 %v3714_v3  ;;  %vm5708_vm15 = vmpackc.low %vm5673_vm0, %vm5707_vm8 }
 0xad6   : > { %3403 = vmatprep.subr.msk.bf16.mxu1 %vm5697_vm14, %v3401_v45  ;;  %vm5711_vm11 = vcmask 596992   ;;  %vm5712_vm0 = vnez %v5557_v53  ;;  %vm5713_vm14 = vcmask 72704   ;;  %vm5714_vm2 = vnez %v5559_v59 }
 0xad7   : > { %v2448_v35 = vsel %vm5699_vm3, %v3721_v27, %v3720_v49  ;;  %v2433_v55 = vsel %vm5700_vm13, %v3715_v4, %v3716_v40  ;;  %v2437_v6 = vsel %vm5701_vm5, %v3716_v40, %v3715_v4  ;;  %3406 = vmatpush1.bf16.msk.msra.mxu1 %vm5702_vm1, %v3404_v47  ;;  %v2444_v50 = vsel %vm5703_vm6, %v3720_v49, %v3721_v27 }
 0xad8   : > { %v3407_v56 = vpack.c.bf16 %v2437_v6, %v2426_v26  ;;  %v3410_v31 = vpack.c.bf16 %v2433_v55, %v2422_v54  ;;  %v3413_v2 = vpack.c.bf16 %v3745_v38, %v2448_v35  ;;  %v3416_v8 = vpack.c.bf16 %v3745_v38, %v2444_v50 }
 0xada   : > { %3409 = vmatprep.subr.msk.bf16.mxu1 %vm5706_vm9, %v3407_v56 }
 0xadb   : > { %3412 = vmatpush1.bf16.msk.msra.mxu1 %vm5708_vm15, %v3410_v31 }
 0xadc   : > { %3415 = vmatprep.subr.msk.bf16.mxu1 %vm5709_vm4, %v3413_v2 }
 0xadf   : > { %3418 = vmatpush1.bf16.msk.msra.mxu1 %vm5710_vm7, %v3416_v8 }
 0xae2   : > { %3021 = vmatmul.mubr.msk.f32.vlgmr.msra.gmra.mrb[10].mxu1 %vm5711_vm11, %v3002_v43 }
 0xae3   : > { %2598 = vmatprep.mubr.f32.mxu1 %v3734_v16 }
 0xbb5   : > { %v2522_v34 = vpop.f32.mrb[10].mxu1 }
 0xbb6   : > { %v2527_v60 = vmax.f32 %v2522_v34, 0.0  ;;  %v2524_v63 = vpop.f32.mrb[11].mxu1 }
 0xbb7   : > { %v2528_v13 = vmax.f32 %v2524_v63, 0.0 }
 0xbb8   : > { %v3422_v57 = vpack.c.bf16 %v3745_v38, %v2527_v60 }
 0xbb9   : > { %v3419_v36 = vpack.c.bf16 %v3745_v38, %v2528_v13 }
 0xbbb   : > { %3421 = vmatprep.subr.msk.bf16.mxu1 %vm5712_vm0, %v3419_v36 }
 0xbbc   : > { %3424 = vmatpush1.bf16.msk.msra.mxu1 %vm5712_vm0, %v3422_v57 }
 0xbbf   : > { %3025 = vmatmul.mubr.msk.f32.vlgmr.msra.gmra.mrb[12].mxu1 %vm5713_vm14, %v3022_v41 }
 0xc92   : > { %v2600_v16 = vpop.f32.mrb[12].mxu1 }
 0xc93   : > { %v2602_v29 = vpop.f32.mrb[13].mxu1 }
 0xc94   : > { %v2607_v58 = vcombine.low %v2600_v16, %v2602_v29 }
 0xc96   : > { %v2614_v10 = vrot.slane %v2607_v58, %v4985_v1 }
 0xc98   : > { %v2621_v38 = vrot.slane %v2614_v10, %v4985_v1 }
 0xc9a   : > { %2623 = vst.msk [vmem:[%s300_s14] sm:$0x3] %vm5714_vm2, %v2621_v38 }
 0xc9b PF: > { %s18_s24 = sadd.s32 1, %s3732_s24  }
 0xc9c   : > { %p15_p4 = scmp.ge.s32.totalorder %s18_s24, 4  }
 0xc9e   :  { %17 = sbr.rel (!%p15_p4) target bundleno = 1 (0x1), region = 101 }

</bundles_post_ra>
